<compile_context>
chip_gen: v5e
topology: v5e:2x2
jax: 0.10.0
libtpu: 0.0.40
codegen_flags: <defaults>
</compile_context>

<pallas_src>
import jax
import jax.numpy as jnp
from jax import lax
from jax.experimental import pallas as pl
from jax.experimental.pallas import tpu as pltpu

F = 32        # feature width: nl = [F, F, F, F]
NBLK = 2      # number of inner blocks = nhid - 1 = len(nl) - 2
NPVEC = 5     # packed per-feature vectors: [b1*beta, alpha, ln_w, ln_b, b2]
EPS = 1e-5    # torch.nn.LayerNorm default eps


def resblock_kernel(x_ref, w1_ref, w2_ref, p_ref, o_ref):
    h = x_ref[...].astype(jnp.float32)
    for blk in range(NBLK):                      # static unrolled loop
        b1    = p_ref[blk, 0:1, :].astype(jnp.float32)   # beta already folded in
        alpha = p_ref[blk, 1:2, :].astype(jnp.float32)
        gamma = p_ref[blk, 2:3, :].astype(jnp.float32)
        delta = p_ref[blk, 3:4, :].astype(jnp.float32)
        b2    = p_ref[blk, 4:5, :].astype(jnp.float32)
        # actfun: alpha * SiLU(beta * (h @ W1 + b1)) == alpha * SiLU(h @ W1' + b1')
        z = jnp.dot(h, w1_ref[blk].astype(jnp.float32),
                    preferred_element_type=jnp.float32) + b1
        h = alpha * (z * jax.nn.sigmoid(z))                       # SiLU
        # LayerNorm over the feature axis (f32 stats)
        mu = jnp.mean(h, axis=-1, keepdims=True)
        var = jnp.mean((h - mu) ** 2, axis=-1, keepdims=True)
        h = (h - mu) * lax.rsqrt(var + EPS)
        h = h * gamma + delta
        # Linear(nl[i], nl[i+1])
        h = jnp.dot(h, w2_ref[blk].astype(jnp.float32),
                    preferred_element_type=jnp.float32) + b2
    # residual add: re-read x from the VMEM ref (cheap vld, frees vregs)
    o_ref[...] = (h + x_ref[...].astype(jnp.float32)).astype(o_ref.dtype)


def resblock_pallas(x, kernel_params, tm=512):
    """x: (N, F). kernel_params: output of prepare_params()."""
    w1f, w2, pvec = kernel_params
    N, Fdim = x.shape
    assert Fdim == F
    # Don't tile wider than the (sublane-rounded) problem; pad N up to tm.
    tm = max(8, min(tm, pl.cdiv(N, 8) * 8))
    n_pad = (-N) % tm
    xp = jnp.pad(x, ((0, n_pad), (0, 0))) if n_pad else x
    Np = N + n_pad

    def whole(shape):
        return pl.BlockSpec(shape, lambda i, _r=len(shape): (0,) * _r)

    out = pl.pallas_call(
        resblock_kernel,
        out_shape=jax.ShapeDtypeStruct((Np, F), x.dtype),
        grid_spec=pltpu.PrefetchScalarGridSpec(
            num_scalar_prefetch=0,
            grid=(Np // tm,),
            in_specs=[
                pl.BlockSpec((tm, F), lambda i: (i, 0)),  # x row tile
                whole((NBLK, F, F)),                      # W1*beta (stored (in,out))
                whole((NBLK, F, F)),                      # W2      (stored (in,out))
                whole((NBLK, NPVEC, F)),                  # packed per-feature params
            ],
            out_specs=pl.BlockSpec((tm, F), lambda i: (i, 0)),
        ),
        compiler_params=pltpu.CompilerParams(
            dimension_semantics=("parallel",)),
    )(xp, w1f, w2, pvec)
    return out[:N] if n_pad else out


def prepare_params(params, io_dtype=jnp.float32):
    """One-time parameter transform: fold beta into W1/b1, pack the per-feature
    vectors into one slab, and cast to the HBM I/O dtype."""
    w1, b1, alpha, beta, gamma, delta, w2, b2 = params
    w1f = w1 * beta                                   # (NBLK,F,F) * (NBLK,1,F)
    b1f = b1 * beta
    pvec = jnp.concatenate([b1f, alpha, gamma, delta, b2], axis=1)  # (NBLK,5,F)
    return (w1f.astype(io_dtype), w2.astype(io_dtype), pvec.astype(io_dtype))


def resblock_ref(x, params):
    """Pure-JAX reference of the same forward pass (for verification)."""
    w1, b1, alpha, beta, gamma, delta, w2, b2 = params
    h = x
    for blk in range(NBLK):
        z = (h @ w1[blk] + b1[blk]) * beta[blk]
        h = alpha[blk] * jax.nn.silu(z)
        mu = h.mean(-1, keepdims=True)
        var = ((h - mu) ** 2).mean(-1, keepdims=True)
        h = (h - mu) / jnp.sqrt(var + EPS)
        h = h * gamma[blk] + delta[blk]
        h = h @ w2[blk] + b2[blk]
    return h + x


def init_params(key):
    keys = jax.random.split(key, 2 * NBLK)

    def xavier(k, fan_in, fan_out):
        bound = (6.0 / (fan_in + fan_out)) ** 0.5
        # torch Linear weight is (out, in); we store the transpose (in, out)
        # so the kernel computes h @ W directly.
        return jax.random.uniform(k, (fan_in, fan_out), jnp.float32, -bound, bound)

    w1 = jnp.stack([xavier(keys[2 * b], F, F) for b in range(NBLK)])
    # NOTE: the PyTorch __init__ zero-inits the *last* Linear weight (exact
    # identity at init). We use xavier for all linears so the numerical check
    # is non-trivial; forward-pass semantics are unchanged.
    w2 = jnp.stack([xavier(keys[2 * b + 1], F, F) for b in range(NBLK)])
    b1 = jnp.zeros((NBLK, 1, F), jnp.float32)              # zeros_(bias)
    b2 = jnp.zeros((NBLK, 1, F), jnp.float32)              # zeros_(bias)
    alpha = jnp.full((NBLK, 1, F), 1.0 / F, jnp.float32)   # Relu_like alpha init
    beta = jnp.full((NBLK, 1, F), 0.1, jnp.float32)        # Relu_like beta init
    gamma = jnp.ones((NBLK, 1, F), jnp.float32)            # LayerNorm weight
    delta = jnp.zeros((NBLK, 1, F), jnp.float32)           # LayerNorm bias
    return (w1, b1, alpha, beta, gamma, delta, w2, b2)


if __name__ == "__main__":
    key = jax.random.PRNGKey(0)
    kx, kp = jax.random.split(key)
    N = 2048                                # e.g. batch * atoms flattened
    x = jax.random.normal(kx, (N, F), jnp.float32)
    params = init_params(kp)
    ref = resblock_ref(x, params)

    # --- f32 I/O path (tight check) ---
    kparams_f32 = prepare_params(params, jnp.float32)
    out = jax.block_until_ready(resblock_pallas(x, kparams_f32, tm=256))
    assert out.shape == x.shape and out.dtype == x.dtype
    assert jnp.allclose(out, ref, atol=1e-5, rtol=1e-5), \
        float(jnp.max(jnp.abs(out - ref)))

    # --- bf16 HBM I/O path (f32 compute in-kernel); loose check ---
    kparams_bf16 = prepare_params(params, jnp.bfloat16)
    out_bf = jax.block_until_ready(
        resblock_pallas(x.astype(jnp.bfloat16), kparams_bf16, tm=256))
    assert out_bf.dtype == jnp.bfloat16 and out_bf.shape == x.shape
    assert jnp.allclose(out_bf.astype(jnp.float32), ref, atol=1e-1, rtol=1e-1), \
        float(jnp.max(jnp.abs(out_bf.astype(jnp.float32) - ref)))

    print("KERNEL_OK")
</pallas_src>

<mosaic_0001>
module attributes {stable_mosaic.version = 11 : i64} {
  func.func @resblock_kernel(%arg0: i32, %arg1: memref<256x32xf32, #tpu.memory_space<vmem>>, %arg2: memref<2x32x32xf32, #tpu.memory_space<vmem>>, %arg3: memref<2x32x32xf32, #tpu.memory_space<vmem>>, %arg4: memref<2x5x32xf32, #tpu.memory_space<vmem>>, %arg5: memref<256x32xf32, #tpu.memory_space<vmem>>) attributes {dimension_semantics = [#tpu.dimension_semantics<parallel>], iteration_bounds = array<i64: 8>, scalar_prefetch = 0 : i64, scratch_operands = 0 : i64, tpu.core_type = #tpu.core_type<tc>, window_params = [{transform_indices = @transform_0, window_bounds = array<i64: 256, 32>}, {pipeline_mode = #tpu.pipeline_mode<synchronous>, transform_indices = @transform_1, window_bounds = array<i64: 2, 32, 32>}, {pipeline_mode = #tpu.pipeline_mode<synchronous>, transform_indices = @transform_2, window_bounds = array<i64: 2, 32, 32>}, {pipeline_mode = #tpu.pipeline_mode<synchronous>, transform_indices = @transform_3, window_bounds = array<i64: 2, 5, 32>}, {transform_indices = @transform_4, window_bounds = array<i64: 256, 32>}]} {
    %c0 = arith.constant 0 : index
    %c0_0 = arith.constant 0 : index
    %0 = vector.load %arg1[%c0, %c0_0] : memref<256x32xf32, #tpu.memory_space<vmem>>, vector<256x32xf32>
    %c0_1 = arith.constant 0 : index
    %c0_2 = arith.constant 0 : index
    %c0_3 = arith.constant 0 : index
    %1 = vector.load %arg4[%c0_1, %c0_2, %c0_3] : memref<2x5x32xf32, #tpu.memory_space<vmem>>, vector<1x1x32xf32>
    %2 = vector.shape_cast %1 : vector<1x1x32xf32> to vector<1x32xf32>
    %c0_4 = arith.constant 0 : index
    %c1 = arith.constant 1 : index
    %c0_5 = arith.constant 0 : index
    %3 = vector.load %arg4[%c0_4, %c1, %c0_5] : memref<2x5x32xf32, #tpu.memory_space<vmem>>, vector<1x1x32xf32>
    %4 = vector.shape_cast %3 : vector<1x1x32xf32> to vector<1x32xf32>
    %c0_6 = arith.constant 0 : index
    %c2 = arith.constant 2 : index
    %c0_7 = arith.constant 0 : index
    %5 = vector.load %arg4[%c0_6, %c2, %c0_7] : memref<2x5x32xf32, #tpu.memory_space<vmem>>, vector<1x1x32xf32>
    %6 = vector.shape_cast %5 : vector<1x1x32xf32> to vector<1x32xf32>
    %c0_8 = arith.constant 0 : index
    %c3 = arith.constant 3 : index
    %c0_9 = arith.constant 0 : index
    %7 = vector.load %arg4[%c0_8, %c3, %c0_9] : memref<2x5x32xf32, #tpu.memory_space<vmem>>, vector<1x1x32xf32>
    %8 = vector.shape_cast %7 : vector<1x1x32xf32> to vector<1x32xf32>
    %c0_10 = arith.constant 0 : index
    %c4 = arith.constant 4 : index
    %c0_11 = arith.constant 0 : index
    %9 = vector.load %arg4[%c0_10, %c4, %c0_11] : memref<2x5x32xf32, #tpu.memory_space<vmem>>, vector<1x1x32xf32>
    %10 = vector.shape_cast %9 : vector<1x1x32xf32> to vector<1x32xf32>
    %c0_12 = arith.constant 0 : index
    %c0_13 = arith.constant 0 : index
    %c0_14 = arith.constant 0 : index
    %11 = vector.load %arg2[%c0_12, %c0_13, %c0_14] : memref<2x32x32xf32, #tpu.memory_space<vmem>>, vector<1x32x32xf32>
    %12 = vector.shape_cast %11 : vector<1x32x32xf32> to vector<32x32xf32>
    %cst = arith.constant dense<0.000000e+00> : vector<256x32xf32>
    %13 = tpu.matmul %0, %12, %cst {dimension_numbers = #tpu.dot_dimension_numbers<[1], [0], [0], [1], [0, 0, 1, 1], [], []>} : vector<256x32xf32>, vector<32x32xf32>, vector<256x32xf32> -> vector<256x32xf32>
    %14 = vector.broadcast %2 : vector<1x32xf32> to vector<256x32xf32>
    %15 = arith.addf %13, %14 : vector<256x32xf32>
    %16 = arith.negf %15 : vector<256x32xf32>
    %17 = math.exp %16 : vector<256x32xf32>
    %cst_15 = arith.constant 1.000000e+00 : f32
    %18 = vector.broadcast %cst_15 : f32 to vector<256x32xf32>
    %19 = arith.addf %18, %17 : vector<256x32xf32>
    %20 = arith.divf %18, %19 : vector<256x32xf32>
    %21 = arith.mulf %15, %20 : vector<256x32xf32>
    %22 = vector.broadcast %4 : vector<1x32xf32> to vector<256x32xf32>
    %23 = arith.mulf %22, %21 : vector<256x32xf32>
    %cst_16 = arith.constant dense<0.000000e+00> : vector<256xf32>
    %24 = vector.multi_reduction <add>, %23, %cst_16 [1] : vector<256x32xf32> to vector<256xf32>
    %25 = vector.shape_cast %24 : vector<256xf32> to vector<256x1xf32>
    %cst_17 = arith.constant 3.200000e+01 : f32
    %26 = vector.broadcast %cst_17 : f32 to vector<256x1xf32>
    %27 = arith.divf %25, %26 : vector<256x1xf32>
    %28 = vector.broadcast %27 : vector<256x1xf32> to vector<256x32xf32>
    %29 = arith.subf %23, %28 : vector<256x32xf32>
    %30 = arith.mulf %29, %29 : vector<256x32xf32>
    %cst_18 = arith.constant dense<0.000000e+00> : vector<256xf32>
    %31 = vector.multi_reduction <add>, %30, %cst_18 [1] : vector<256x32xf32> to vector<256xf32>
    %32 = vector.shape_cast %31 : vector<256xf32> to vector<256x1xf32>
    %cst_19 = arith.constant 3.200000e+01 : f32
    %33 = vector.broadcast %cst_19 : f32 to vector<256x1xf32>
    %34 = arith.divf %32, %33 : vector<256x1xf32>
    %35 = vector.broadcast %27 : vector<256x1xf32> to vector<256x32xf32>
    %36 = arith.subf %23, %35 : vector<256x32xf32>
    %cst_20 = arith.constant 9.99999974E-6 : f32
    %37 = vector.broadcast %cst_20 : f32 to vector<256x1xf32>
    %38 = arith.addf %34, %37 : vector<256x1xf32>
    %39 = math.rsqrt %38 : vector<256x1xf32>
    %40 = vector.broadcast %39 : vector<256x1xf32> to vector<256x32xf32>
    %41 = arith.mulf %36, %40 : vector<256x32xf32>
    %42 = vector.broadcast %6 : vector<1x32xf32> to vector<256x32xf32>
    %43 = arith.mulf %41, %42 : vector<256x32xf32>
    %44 = vector.broadcast %8 : vector<1x32xf32> to vector<256x32xf32>
    %45 = arith.addf %43, %44 : vector<256x32xf32>
    %c0_21 = arith.constant 0 : index
    %c0_22 = arith.constant 0 : index
    %c0_23 = arith.constant 0 : index
    %46 = vector.load %arg3[%c0_21, %c0_22, %c0_23] : memref<2x32x32xf32, #tpu.memory_space<vmem>>, vector<1x32x32xf32>
    %47 = vector.shape_cast %46 : vector<1x32x32xf32> to vector<32x32xf32>
    %cst_24 = arith.constant dense<0.000000e+00> : vector<256x32xf32>
    %48 = tpu.matmul %45, %47, %cst_24 {dimension_numbers = #tpu.dot_dimension_numbers<[1], [0], [0], [1], [0, 0, 1, 1], [], []>} : vector<256x32xf32>, vector<32x32xf32>, vector<256x32xf32> -> vector<256x32xf32>
    %49 = vector.broadcast %10 : vector<1x32xf32> to vector<256x32xf32>
    %50 = arith.addf %48, %49 : vector<256x32xf32>
    %c1_25 = arith.constant 1 : index
    %c0_26 = arith.constant 0 : index
    %c0_27 = arith.constant 0 : index
    %51 = vector.load %arg4[%c1_25, %c0_26, %c0_27] : memref<2x5x32xf32, #tpu.memory_space<vmem>>, vector<1x1x32xf32>
    %52 = vector.shape_cast %51 : vector<1x1x32xf32> to vector<1x32xf32>
    %c1_28 = arith.constant 1 : index
    %c1_29 = arith.constant 1 : index
    %c0_30 = arith.constant 0 : index
    %53 = vector.load %arg4[%c1_28, %c1_29, %c0_30] : memref<2x5x32xf32, #tpu.memory_space<vmem>>, vector<1x1x32xf32>
    %54 = vector.shape_cast %53 : vector<1x1x32xf32> to vector<1x32xf32>
    %c1_31 = arith.constant 1 : index
    %c2_32 = arith.constant 2 : index
    %c0_33 = arith.constant 0 : index
    %55 = vector.load %arg4[%c1_31, %c2_32, %c0_33] : memref<2x5x32xf32, #tpu.memory_space<vmem>>, vector<1x1x32xf32>
    %56 = vector.shape_cast %55 : vector<1x1x32xf32> to vector<1x32xf32>
    %c1_34 = arith.constant 1 : index
    %c3_35 = arith.constant 3 : index
    %c0_36 = arith.constant 0 : index
    %57 = vector.load %arg4[%c1_34, %c3_35, %c0_36] : memref<2x5x32xf32, #tpu.memory_space<vmem>>, vector<1x1x32xf32>
    %58 = vector.shape_cast %57 : vector<1x1x32xf32> to vector<1x32xf32>
    %c1_37 = arith.constant 1 : index
    %c4_38 = arith.constant 4 : index
    %c0_39 = arith.constant 0 : index
    %59 = vector.load %arg4[%c1_37, %c4_38, %c0_39] : memref<2x5x32xf32, #tpu.memory_space<vmem>>, vector<1x1x32xf32>
    %60 = vector.shape_cast %59 : vector<1x1x32xf32> to vector<1x32xf32>
    %c1_40 = arith.constant 1 : index
    %c0_41 = arith.constant 0 : index
    %c0_42 = arith.constant 0 : index
    %61 = vector.load %arg2[%c1_40, %c0_41, %c0_42] : memref<2x32x32xf32, #tpu.memory_space<vmem>>, vector<1x32x32xf32>
    %62 = vector.shape_cast %61 : vector<1x32x32xf32> to vector<32x32xf32>
    %cst_43 = arith.constant dense<0.000000e+00> : vector<256x32xf32>
    %63 = tpu.matmul %50, %62, %cst_43 {dimension_numbers = #tpu.dot_dimension_numbers<[1], [0], [0], [1], [0, 0, 1, 1], [], []>} : vector<256x32xf32>, vector<32x32xf32>, vector<256x32xf32> -> vector<256x32xf32>
    %64 = vector.broadcast %52 : vector<1x32xf32> to vector<256x32xf32>
    %65 = arith.addf %63, %64 : vector<256x32xf32>
    %66 = arith.negf %65 : vector<256x32xf32>
    %67 = math.exp %66 : vector<256x32xf32>
    %cst_44 = arith.constant 1.000000e+00 : f32
    %68 = vector.broadcast %cst_44 : f32 to vector<256x32xf32>
    %69 = arith.addf %68, %67 : vector<256x32xf32>
    %70 = arith.divf %68, %69 : vector<256x32xf32>
    %71 = arith.mulf %65, %70 : vector<256x32xf32>
    %72 = vector.broadcast %54 : vector<1x32xf32> to vector<256x32xf32>
    %73 = arith.mulf %72, %71 : vector<256x32xf32>
    %cst_45 = arith.constant dense<0.000000e+00> : vector<256xf32>
    %74 = vector.multi_reduction <add>, %73, %cst_45 [1] : vector<256x32xf32> to vector<256xf32>
    %75 = vector.shape_cast %74 : vector<256xf32> to vector<256x1xf32>
    %cst_46 = arith.constant 3.200000e+01 : f32
    %76 = vector.broadcast %cst_46 : f32 to vector<256x1xf32>
    %77 = arith.divf %75, %76 : vector<256x1xf32>
    %78 = vector.broadcast %77 : vector<256x1xf32> to vector<256x32xf32>
    %79 = arith.subf %73, %78 : vector<256x32xf32>
    %80 = arith.mulf %79, %79 : vector<256x32xf32>
    %cst_47 = arith.constant dense<0.000000e+00> : vector<256xf32>
    %81 = vector.multi_reduction <add>, %80, %cst_47 [1] : vector<256x32xf32> to vector<256xf32>
    %82 = vector.shape_cast %81 : vector<256xf32> to vector<256x1xf32>
    %cst_48 = arith.constant 3.200000e+01 : f32
    %83 = vector.broadcast %cst_48 : f32 to vector<256x1xf32>
    %84 = arith.divf %82, %83 : vector<256x1xf32>
    %85 = vector.broadcast %77 : vector<256x1xf32> to vector<256x32xf32>
    %86 = arith.subf %73, %85 : vector<256x32xf32>
    %cst_49 = arith.constant 9.99999974E-6 : f32
    %87 = vector.broadcast %cst_49 : f32 to vector<256x1xf32>
    %88 = arith.addf %84, %87 : vector<256x1xf32>
    %89 = math.rsqrt %88 : vector<256x1xf32>
    %90 = vector.broadcast %89 : vector<256x1xf32> to vector<256x32xf32>
    %91 = arith.mulf %86, %90 : vector<256x32xf32>
    %92 = vector.broadcast %56 : vector<1x32xf32> to vector<256x32xf32>
    %93 = arith.mulf %91, %92 : vector<256x32xf32>
    %94 = vector.broadcast %58 : vector<1x32xf32> to vector<256x32xf32>
    %95 = arith.addf %93, %94 : vector<256x32xf32>
    %c1_50 = arith.constant 1 : index
    %c0_51 = arith.constant 0 : index
    %c0_52 = arith.constant 0 : index
    %96 = vector.load %arg3[%c1_50, %c0_51, %c0_52] : memref<2x32x32xf32, #tpu.memory_space<vmem>>, vector<1x32x32xf32>
    %97 = vector.shape_cast %96 : vector<1x32x32xf32> to vector<32x32xf32>
    %cst_53 = arith.constant dense<0.000000e+00> : vector<256x32xf32>
    %98 = tpu.matmul %95, %97, %cst_53 {dimension_numbers = #tpu.dot_dimension_numbers<[1], [0], [0], [1], [0, 0, 1, 1], [], []>} : vector<256x32xf32>, vector<32x32xf32>, vector<256x32xf32> -> vector<256x32xf32>
    %99 = vector.broadcast %60 : vector<1x32xf32> to vector<256x32xf32>
    %100 = arith.addf %98, %99 : vector<256x32xf32>
    %c0_54 = arith.constant 0 : index
    %c0_55 = arith.constant 0 : index
    %101 = vector.load %arg1[%c0_54, %c0_55] : memref<256x32xf32, #tpu.memory_space<vmem>>, vector<256x32xf32>
    %102 = arith.addf %100, %101 : vector<256x32xf32>
    %c0_56 = arith.constant 0 : index
    %c0_57 = arith.constant 0 : index
    %103 = vector.load %arg5[%c0_56, %c0_57] : memref<256x32xf32, #tpu.memory_space<vmem>>, vector<256x32xf32>
    tpu.vector_store %arg5[%c0_56, %c0_57], %102 {strides = array<i32>} : memref<256x32xf32, #tpu.memory_space<vmem>>, vector<256x32xf32>,
    return
  }
  func.func @transform_0(%arg0: i32) -> (i32, i32) {
    %c0_i32 = arith.constant 0 : i32
    %c0_i32_0 = arith.constant 0 : i32
    return %arg0, %c0_i32 : i32, i32
  }
  func.func @transform_1(%arg0: i32) -> (i32, i32, i32) {
    %c0_i32 = arith.constant 0 : i32
    %c0_i32_0 = arith.constant 0 : i32
    %c0_i32_1 = arith.constant 0 : i32
    %c0_i32_2 = arith.constant 0 : i32
    return %c0_i32, %c0_i32_0, %c0_i32_1 : i32, i32, i32
  }
  func.func @transform_2(%arg0: i32) -> (i32, i32, i32) {
    %c0_i32 = arith.constant 0 : i32
    %c0_i32_0 = arith.constant 0 : i32
    %c0_i32_1 = arith.constant 0 : i32
    %c0_i32_2 = arith.constant 0 : i32
    return %c0_i32, %c0_i32_0, %c0_i32_1 : i32, i32, i32
  }
  func.func @transform_3(%arg0: i32) -> (i32, i32, i32) {
    %c0_i32 = arith.constant 0 : i32
    %c0_i32_0 = arith.constant 0 : i32
    %c0_i32_1 = arith.constant 0 : i32
    %c0_i32_2 = arith.constant 0 : i32
    return %c0_i32, %c0_i32_0, %c0_i32_1 : i32, i32, i32
  }
  func.func @transform_4(%arg0: i32) -> (i32, i32) {
    %c0_i32 = arith.constant 0 : i32
    %c0_i32_0 = arith.constant 0 : i32
    return %arg0, %c0_i32 : i32, i32
  }
}

</mosaic_0001>

<bundles_post_ra>
// kernel: tpu_custom_call.1
= control target key start
LH: loop header
LB: loop body
LE: loop exit
PB: predicated region body
PF: predicated region fallthrough
CT: control target
= control target key end

     0   :  { %s4822_s15 = smov 0   ;;  %s8416_s0 = inlined_call_operand.vmem [shape: f32[2048,32], index: 0, kind: input, shape index: {}]   ;;  %s8417_s1 = inlined_call_operand.vmem [shape: f32[2,32,32], index: 1, kind: input, shape index: {}]   ;;  %s8418_s2 = inlined_call_operand.vmem [shape: f32[2,32,32], index: 2, kind: input, shape index: {}]   ;;  %s8419_s3 = inlined_call_operand.vmem [shape: f32[2,5,32], index: 3, kind: input, shape index: {}]   ;;  %s8420_s4 = inlined_call_operand.vmem [shape: f32[2048,32], index: 4, kind: output, shape index: {}]  }
   0x1 LB: > { %s4116_s16 = sadd.s32 4294967295, %s4794_s15   ;;  %p4120_p0 = scmp.ge.s32.totalorder %s4794_s15, 1  ;;  %s4794_s15 = sphi %s4822_s15, %s14_s15  }
   0x2   : > { %p163_p1 = scmp.lt.s32.totalorder %s4794_s15, 9 }
   0x4   : > { %p164_p2 = pnand %p4120_p0, %p163_p1 }
   0x5   : > { %s4121_s21 = sshll.u32 (!%p164_p2), %s4116_s16, 5 }
   0x6   : > { %167 = sbr.rel (%p164_p2) target bundleno = 1798 (0x706), region = 36  ;;  %p190_p3 = scmp.lt.s32.totalorder (!%p164_p2), %s4121_s21, 255 }
   0xb   : > { %v241_v0 = vld [vmem:[%s8417_s1 + $0x18] sm:$0xff]  ;;  %v240_v1 = vld [vmem:[%s8417_s1 + $0x10] sm:$0xff]  ;;  %v239_v2 = vld [vmem:[%s8417_s1 + $0x8] sm:$0xff]  ;;  %s8580_s21 = smov (!%p190_p3, %s4121_s21), 255  ;;  %vm243_vm0 = vcmask 261120  }
   0xc   : > { %352 = vmatpush.msra.mxu0 %v241_v0  ;;  %v238_v3 = vld [vmem:[%s8417_s1] sm:$0xff]  ;;  %s4122_s26 = sshll.u32 %s8580_s21, 3 }
   0xd   : > { %s4850_s29 = scalar_lea.vmem %s8416_s0, %s4122_s26  ;;  %v4877_v15 = vld [vmem:[%s8419_s3] ss:$0 sm:$0xff]  ;;  %v4901_v48 = vld [vmem:[%s8419_s3 + $0x1] ss:$0 sm:$0xff]  ;;  %s7753_s10 = scalar_lea.vmem %s8420_s4, %s4122_s26 }
   0xe   : > { %353 = vmatpush.msra.mxu0 %v240_v1  ;;  %v201_v4 = vld [vmem:[%s4850_s29] sm:$0xff]  ;;  %v202_v5 = vld [vmem:[%s4850_s29 + $0x8] sm:$0xff]  ;;  %v203_v6 = vld [vmem:[%s4850_s29 + $0x10] sm:$0xff] }
   0xf   : > { %v204_v7 = vld [vmem:[%s4850_s29 + $0x18] sm:$0xff]  ;;  %v205_v8 = vld [vmem:[%s4850_s29 + $0x20] sm:$0xff]  ;;  %v206_v9 = vld [vmem:[%s4850_s29 + $0x28] sm:$0xff] }
  0x10   : > { %354 = vmatpush.msra.mxu0 %v239_v2  ;;  %v207_v10 = vld [vmem:[%s4850_s29 + $0x30] sm:$0xff]  ;;  %v208_v11 = vld [vmem:[%s4850_s29 + $0x38] sm:$0xff]  ;;  %v209_v12 = vld [vmem:[%s4850_s29 + $0x40] sm:$0xff] }
  0x11   : > { %v210_v13 = vld [vmem:[%s4850_s29 + $0x48] sm:$0xff]  ;;  %v211_v14 = vld [vmem:[%s4850_s29 + $0x50] sm:$0xff]  ;;  %v212_v19 = vld [vmem:[%s4850_s29 + $0x58] sm:$0xff] }
  0x12   : > { %355 = vmatpush.msra.mxu0 %v238_v3  ;;  %v213_v25 = vld [vmem:[%s4850_s29 + $0x60] sm:$0xff]  ;;  %v214_v33 = vld [vmem:[%s4850_s29 + $0x68] sm:$0xff] }
  0x13   : > { %4125 = vmatmul.msk.f32.vlgmr.msra.gmra.mxu0 %vm243_vm0, %v201_v4 }
  0x1b   : > { %4126 = vmatmul.msk.f32.gmra.mxu0 %vm243_vm0, %v202_v5 }
  0x23   : > { %4127 = vmatmul.msk.f32.gmra.mxu0 %vm243_vm0, %v203_v6 }
  0x2b   : > { %4128 = vmatmul.msk.f32.gmra.mxu0 %vm243_vm0, %v204_v7 }
  0x33   : > { %4129 = vmatmul.msk.f32.gmra.mxu0 %vm243_vm0, %v205_v8 }
  0x3b   : > { %4130 = vmatmul.msk.f32.gmra.mxu0 %vm243_vm0, %v206_v9 }
  0x43   : > { %4131 = vmatmul.msk.f32.gmra.mxu0 %vm243_vm0, %v207_v10 }
  0x4b   : > { %4132 = vmatmul.msk.f32.gmra.mxu0 %vm243_vm0, %v208_v11 }
  0x53   : > { %4133 = vmatmul.msk.f32.gmra.mxu0 %vm243_vm0, %v209_v12 }
  0x5b   : > { %4134 = vmatmul.msk.f32.gmra.mxu0 %vm243_vm0, %v210_v13 }
  0x63   : > { %4135 = vmatmul.msk.f32.gmra.mxu0 %vm243_vm0, %v211_v14 }
  0x6b   : > { %4136 = vmatmul.msk.f32.gmra.mxu0 %vm243_vm0, %v212_v19 }
  0x73   : > { %4137 = vmatmul.msk.f32.gmra.mxu0 %vm243_vm0, %v213_v25 }
  0x7b   : > { %4138 = vmatmul.msk.f32.gmra.mxu0 %vm243_vm0, %v214_v33 }
  0x90   : > { %v357_v16 = vpop.f32.mrf.mxu0 }
  0x91   : > { %v358_v17 = vadd.f32 %v4877_v15, %v357_v16 }
  0x93   : > { %v4157_v18 = vmul.f32 -1.442695, %v358_v17 }
  0x95   : > { %4351 = vpow2.f32 %v4157_v18 }
  0x98   : > { %v360_v20 = vpop.f32.mrf.mxu0 }
  0x99   : > { %v4883_v21 = vadd.f32 %v4877_v15, %v360_v20 }
  0x9b   : > { %v4352_v22 = vpop.eup %4351  ;;  %v4158_v23 = vmul.f32 -1.442695, %v4883_v21 }
  0x9c   : > { %v549_v24 = vadd.f32 1.0, %v4352_v22 }
  0x9d   : > { %4353 = vpow2.f32 %v4158_v23 }
  0x9e   : > { %4355 = vrcp.f32 %v549_v24  ;;  %v592_v36 = vand.u32 2147483648, %v549_v24  ;;  %v590_v39 = vand.u32 2147483647, %v549_v24  ;;  %vm586_vm2 = vweird.f32 %v549_v24 }
  0xa0   : > { %v363_v26 = vpop.f32.mrf.mxu0  ;;  %v593_v45 = vor.u32 1.1754944e-38, %v592_v36  ;;  %vm591_vm4 = vcmp.eq.f32.partialorder %v590_v39, 8.507059e+37 }
  0xa1   : > { %v4889_v27 = vadd.f32 %v4877_v15, %v363_v26 }
  0xa3   : > { %v4354_v28 = vpop.eup %4353  ;;  %v4159_v29 = vmul.f32 -1.442695, %v4889_v27 }
  0xa4   : > { %v4356_v30 = vpop.eup %4355  ;;  %v550_v31 = vadd.f32 1.0, %v4354_v28 }
  0xa5   : > { %4357 = vpow2.f32 %v4159_v29  ;;  %v582_v32 = vmul.f32 %v4356_v30, %v549_v24  ;;  %vm587_vm1 = vweird.f32 %v4356_v30 }
  0xa6   : > { %4359 = vrcp.f32 %v550_v31  ;;  %vm588_vm3 = vmor %vm586_vm2, %vm587_vm1  ;;  %v605_v52 = vand.u32 2147483647, %v550_v31  ;;  %v607_v53 = vand.u32 2147483648, %v550_v31  ;;  %vm601_vm6 = vweird.f32 %v550_v31 }
  0xa7   : > { %v583_v34 = vsub.f32 1.0, %v582_v32 }
  0xa8   : > { %v366_v35 = vpop.f32.mrf.mxu0  ;;  %v608_v63 = vor.u32 1.1754944e-38, %v607_v53  ;;  %vm606_vm8 = vcmp.eq.f32.partialorder %v605_v52, 8.507059e+37 }
  0xa9   : > { %v4895_v37 = vadd.f32 %v4877_v15, %v366_v35  ;;  %v584_v38 = vmul.f32 %v4356_v30, %v583_v34 }
  0xab   : > { %v4358_v40 = vpop.eup %4357  ;;  %v4160_v41 = vmul.f32 -1.442695, %v4895_v37  ;;  %v585_v42 = vadd.f32 %v4356_v30, %v584_v38 }
  0xac   : > { %v4360_v43 = vpop.eup %4359  ;;  %v551_v44 = vadd.f32 1.0, %v4358_v40 }
  0xad   : > { %v597_v46 = vmul.f32 %v4360_v43, %v550_v31  ;;  %4361 = vpow2.f32 %v4160_v41  ;;  %v589_v47 = vsel %vm588_vm3, %v4356_v30, %v585_v42  ;;  %vm602_vm5 = vweird.f32 %v4360_v43 }
  0xae   : > { %4363 = vrcp.f32 %v551_v44  ;;  %v594_v49 = vsel %vm591_vm4, %v593_v45, %v589_v47  ;;  %vm603_vm7 = vmor %vm601_vm6, %vm602_vm5  ;;  %v620_v7 = vand.u32 2147483647, %v551_v44  ;;  %v622_v8 = vand.u32 2147483648, %v551_v44  ;;  %v215_v45 = vld [vmem:[%s4850_s29 + $0x70] sm:$0xff] }
  0xaf   : > { %v598_v50 = vsub.f32 1.0, %v597_v46  ;;  %v1061_v51 = vmul.f32 %v594_v49, %v358_v17  ;;  %vm616_vm10 = vweird.f32 %v551_v44  ;;  %4139 = vmatmul.msk.f32.gmra.mxu0 %vm243_vm0, %v215_v45 }
  0xb0   : > { %v369_v54 = vpop.f32.mrf.mxu0  ;;  %v623_v19 = vor.u32 1.1754944e-38, %v622_v8  ;;  %vm621_vm12 = vcmp.eq.f32.partialorder %v620_v7, 8.507059e+37 }
  0xb1   : > { %v599_v55 = vmul.f32 %v4360_v43, %v598_v50  ;;  %v4904_v56 = vadd.f32 %v4877_v15, %v369_v54  ;;  %v4907_v57 = vmul.f32 %v4901_v48, %v1061_v51 }
  0xb3   : > { %v4362_v58 = vpop.eup %4361  ;;  %v600_v59 = vadd.f32 %v4360_v43, %v599_v55  ;;  %v4161_v60 = vmul.f32 -1.442695, %v4904_v56  ;;  %v1126_v61 = vsel %vm243_vm0, %v4907_v57, 0.0 }
  0xb4   : > { %v4364_v62 = vpop.eup %4363  ;;  %v552_v0 = vadd.f32 1.0, %v4362_v58  ;;  %1127 = vadd.xlane.f32.xlu0 %v1126_v61 }
  0xb5   : > { %v604_v1 = vsel %vm603_vm7, %v4360_v43, %v600_v59  ;;  %4365 = vpow2.f32 %v4161_v60  ;;  %v612_v2 = vmul.f32 %v4364_v62, %v551_v44  ;;  %vm617_vm9 = vweird.f32 %v4364_v62 }
  0xb6   : > { %v609_v3 = vsel %vm606_vm8, %v608_v63, %v604_v1  ;;  %4367 = vrcp.f32 %v552_v0  ;;  %vm618_vm11 = vmor %vm616_vm10, %vm617_vm9  ;;  %v635_v25 = vand.u32 2147483647, %v552_v0  ;;  %v637_v26 = vand.u32 2147483648, %v552_v0 }
  0xb7   : > { %v1062_v4 = vmul.f32 %v609_v3, %v4883_v21  ;;  %v613_v5 = vsub.f32 1.0, %v612_v2  ;;  %vm631_vm14 = vweird.f32 %v552_v0 }
  0xb8   : > { %v372_v6 = vpop.f32.mrf.mxu0  ;;  %v638_v36 = vor.u32 1.1754944e-38, %v637_v26  ;;  %vm636_vm1 = vcmp.eq.f32.partialorder %v635_v25, 8.507059e+37 }
  0xb9   : > { %v4914_v9 = vadd.f32 %v4877_v15, %v372_v6  ;;  %v4917_v10 = vmul.f32 %v4901_v48, %v1062_v4  ;;  %v614_v11 = vmul.f32 %v4364_v62, %v613_v5 }
  0xbb   : > { %v4366_v12 = vpop.eup %4365  ;;  %v4162_v13 = vmul.f32 -1.442695, %v4914_v9  ;;  %v1129_v14 = vsel %vm243_vm0, %v4917_v10, 0.0  ;;  %v615_v16 = vadd.f32 %v4364_v62, %v614_v11 }
  0xbc   : > { %v4368_v17 = vpop.eup %4367  ;;  %v553_v18 = vadd.f32 1.0, %v4366_v12  ;;  %1130 = vadd.xlane.f32.xlu0 %v1129_v14 }
  0xbd   : > { %v627_v20 = vmul.f32 %v4368_v17, %v552_v0  ;;  %4369 = vpow2.f32 %v4162_v13  ;;  %v619_v21 = vsel %vm618_vm11, %v4364_v62, %v615_v16  ;;  %vm632_vm13 = vweird.f32 %v4368_v17  ;;  %v216_v0 = vld [vmem:[%s4850_s29 + $0x78] sm:$0xff] }
  0xbe   : > { %4371 = vrcp.f32 %v553_v18  ;;  %v624_v22 = vsel %vm621_vm12, %v623_v19, %v619_v21  ;;  %vm633_vm15 = vmor %vm631_vm14, %vm632_vm13  ;;  %vm646_vm2 = vweird.f32 %v553_v18  ;;  %v652_v44 = vand.u32 2147483648, %v553_v18  ;;  %4140 = vmatmul.msk.f32.gmra.mxu0 %vm243_vm0, %v216_v0 }
  0xbf   : > { %v628_v23 = vsub.f32 1.0, %v627_v20  ;;  %v1063_v24 = vmul.f32 %v624_v22, %v4889_v27  ;;  %v650_v46 = vand.u32 2147483647, %v553_v18 }
  0xc0   : > { %v375_v28 = vpop.f32.mrf.mxu0  ;;  %v653_v53 = vor.u32 1.1754944e-38, %v652_v44 }
  0xc1   : > { %v629_v29 = vmul.f32 %v4368_v17, %v628_v23  ;;  %v4924_v30 = vadd.f32 %v4877_v15, %v375_v28  ;;  %v4927_v31 = vmul.f32 %v4901_v48, %v1063_v24  ;;  %vm651_vm5 = vcmp.eq.f32.partialorder %v650_v46, 8.507059e+37 }
  0xc3   : > { %v4370_v32 = vpop.eup %4369  ;;  %v630_v33 = vadd.f32 %v4368_v17, %v629_v29  ;;  %v4163_v34 = vmul.f32 -1.442695, %v4924_v30  ;;  %v1132_v35 = vsel %vm243_vm0, %v4927_v31, 0.0  ;;  %v218_v29 = vld [vmem:[%s4850_s29 + $0x88] sm:$0xff] }
  0xc4   : > { %v4372_v27 = vpop.eup %4371  ;;  %v554_v38 = vadd.f32 1.0, %v4370_v32  ;;  %1133 = vadd.xlane.f32.xlu1 %v1132_v35 }
  0xc5   : > { %v634_v39 = vsel %vm633_vm15, %v4368_v17, %v630_v33  ;;  %4373 = vpow2.f32 %v4163_v34  ;;  %v642_v40 = vmul.f32 %v4372_v27, %v553_v18  ;;  %vm647_vm3 = vweird.f32 %v4372_v27  ;;  %v217_v17 = vld [vmem:[%s4850_s29 + $0x80] sm:$0xff] }
  0xc6   : > { %v639_v41 = vsel %vm636_vm1, %v638_v36, %v634_v39  ;;  %4375 = vrcp.f32 %v554_v38  ;;  %vm4938_vm4 = vmor %vm646_vm2, %vm647_vm3  ;;  %vm661_vm6 = vweird.f32 %v554_v38  ;;  %v667_v60 = vand.u32 2147483648, %v554_v38  ;;  %4141 = vmatmul.msk.f32.gmra.mxu0 %vm243_vm0, %v217_v17 }
  0xc7   : > { %v1064_v42 = vmul.f32 %v639_v41, %v4895_v37  ;;  %v643_v43 = vsub.f32 1.0, %v642_v40  ;;  %v665_v62 = vand.u32 2147483647, %v554_v38 }
  0xc8   : > { %v668_v3 = vor.u32 1.1754944e-38, %v667_v60  ;;  %v378_v28 = vpop.f32.mrf.mxu0 }
  0xc9   : > { %v4936_v47 = vmul.f32 %v4901_v48, %v1064_v42  ;;  %v644_v49 = vmul.f32 %v4372_v27, %v643_v43  ;;  %vm666_vm9 = vcmp.eq.f32.partialorder %v665_v62, 8.507059e+37  ;;  %v4971_v32 = vadd.f32 %v4877_v15, %v378_v28 }
  0xca   : > { %v4796_v42 = vmov 32.0  }
  0xcb   : > { %v4374_v51 = vpop.eup %4373  ;;  %v1135_v52 = vsel %vm243_vm0, %v4936_v47, 0.0  ;;  %v645_v37 = vadd.f32 %v4372_v27, %v644_v49  ;;  %v4164_v34 = vmul.f32 -1.442695, %v4971_v32 }
  0xcc   : > { %v4376_v54 = vpop.eup %4375  ;;  %v555_v55 = vadd.f32 1.0, %v4374_v51  ;;  %1136 = vadd.xlane.f32.xlu1 %v1135_v52 }
  0xcd   : > { %v657_v58 = vmul.f32 %v4376_v54, %v554_v38  ;;  %v649_v59 = vsel %vm4938_vm4, %v4372_v27, %v645_v37  ;;  %vm662_vm7 = vweird.f32 %v4376_v54 }
  0xce   : > { %4377 = vrcp.f32 %v555_v55  ;;  %v654_v63 = vsel %vm651_vm5, %v653_v53, %v649_v59  ;;  %vm663_vm8 = vmor %vm661_vm6, %vm662_vm7  ;;  %vm676_vm10 = vweird.f32 %v555_v55  ;;  %v680_v16 = vand.u32 2147483647, %v555_v55  ;;  %4142 = vmatmul.msk.f32.gmra.mxu0 %vm243_vm0, %v218_v29  ;;  %v219_v59 = vld [vmem:[%s4850_s29 + $0x90] sm:$0xff] }
  0xcf   : > { %v658_v61 = vsub.f32 1.0, %v657_v58  ;;  %v1065_v1 = vmul.f32 %v654_v63, %v4904_v56  ;;  %v682_v56 = vand.u32 2147483648, %v555_v55  ;;  %4379 = vpow2.f32 %v4164_v34 }
  0xd0   : > { %vm681_vm13 = vcmp.eq.f32.partialorder %v680_v16, 8.507059e+37  ;;  %v381_v33 = vpop.f32.mrf.mxu0 }
  0xd1   : > { %v659_v2 = vmul.f32 %v4376_v54, %v658_v61  ;;  %v4950_v4 = vmul.f32 %v4901_v48, %v1065_v1  ;;  %v683_v20 = vor.u32 1.1754944e-38, %v682_v56 }
  0xd3   : > { %v660_v5 = vadd.f32 %v4376_v54, %v659_v2  ;;  %v1138_v7 = vsel %vm243_vm0, %v4950_v4, 0.0 }
  0xd4   : > { %v4378_v6 = vpop.eup %4377  ;;  %1139 = vadd.xlane.f32.xlu2 %v1138_v7 }
  0xd5   : > { %v664_v8 = vsel %vm663_vm8, %v4376_v54, %v660_v5  ;;  %v672_v11 = vmul.f32 %v4378_v6, %v555_v55  ;;  %vm677_vm11 = vweird.f32 %v4378_v6  ;;  %v4380_v36 = vpop.eup %4379 }
  0xd6   : > { %v669_v12 = vsel %vm666_vm9, %v668_v3, %v664_v8  ;;  %vm678_vm12 = vmor %vm676_vm10, %vm677_vm11  ;;  %v556_v39 = vadd.f32 1.0, %v4380_v36  ;;  %4143 = vmatmul.msk.f32.gmra.mxu0 %vm243_vm0, %v219_v59  ;;  %v220_v8 = vld [vmem:[%s4850_s29 + $0x98] sm:$0xff] }
  0xd7   : > { %v1066_v13 = vmul.f32 %v669_v12, %v4914_v9  ;;  %v673_v14 = vsub.f32 1.0, %v672_v11 }
  0xd8   : > { %v384_v35 = vpop.f32.mrf.mxu0  ;;  %vm691_vm14 = vweird.f32 %v556_v39  ;;  %v697_v5 = vand.u32 2147483648, %v556_v39  ;;  %v695_v12 = vand.u32 2147483647, %v556_v39 }
  0xd9   : > { %v674_v18 = vmul.f32 %v4378_v6, %v673_v14  ;;  %v4958_v19 = vmul.f32 %v4901_v48, %v1066_v13  ;;  %v4979_v38 = vadd.f32 %v4877_v15, %v384_v35 }
  0xda   : > { %v698_v17 = vor.u32 1.1754944e-38, %v697_v5  ;;  %vm696_vm3 = vcmp.eq.f32.partialorder %v695_v12, 8.507059e+37 }
  0xdb   : > { %v675_v21 = vadd.f32 %v4378_v6, %v674_v18  ;;  %v1141_v22 = vsel %vm243_vm0, %v4958_v19, 0.0  ;;  %v4166_v40 = vmul.f32 -1.442695, %v4979_v38 }
  0xdc   : > { %1142 = vadd.xlane.f32.xlu2 %v1141_v22 }
  0xdd   : > { %v679_v23 = vsel %vm678_vm12, %v4378_v6, %v675_v21 }
  0xde   : > { %v684_v9 = vsel %vm681_vm13, %v683_v20, %v679_v23  ;;  %4144 = vmatmul.msk.f32.gmra.mxu0 %vm243_vm0, %v220_v8 }
  0xdf   : > { %v1067_v24 = vmul.f32 %v684_v9, %v4924_v30  ;;  %v4975_v30 = vadd.f32 %v4877_v15, %v381_v33 }
  0xe0   : > { %v387_v41 = vpop.f32.mrf.mxu0 }
  0xe1   : > { %v4964_v25 = vmul.f32 %v4901_v48, %v1067_v24  ;;  %v4165_v27 = vmul.f32 -1.442695, %v4975_v30  ;;  %v4985_v46 = vadd.f32 %v4877_v15, %v387_v41 }
  0xe3   : > { %v1144_v26 = vsel %vm243_vm0, %v4964_v25, 0.0  ;;  %4381 = vpow2.f32 %v4165_v27  ;;  %v4167_v53 = vmul.f32 -1.442695, %v4985_v46  ;;  %v221_v27 = vld [vmem:[%s4850_s29 + $0xa0] sm:$0xff] }
  0xe4   : > { %1145 = vadd.xlane.f32.xlu1 %v1144_v26  ;;  %4383 = vrcp.f32 %v4796_v42 }
  0xe5   : > { %4385 = vrcp.f32 %v556_v39 }
  0xe6   : > { %4387 = vpow2.f32 %v4166_v40  ;;  %4145 = vmatmul.msk.f32.gmra.mxu0 %vm243_vm0, %v221_v27 }
  0xe8   : > { %v390_v50 = vpop.f32.mrf.mxu0 }
  0xe9   : > { %v4382_v43 = vpop.eup %4381  ;;  %v4992_v58 = vadd.f32 %v4877_v15, %v390_v50 }
  0xea   : > { %v4982_v44 = vadd.f32 1.0, %v4382_v43  ;;  %v4384_v45 = vpop.eup %4383 }
  0xeb   : > { %v4386_v49 = vpop.eup %4385  ;;  %v1223_v51 = vmul.f32 32.0, %v4384_v45  ;;  %v4168_v0 = vmul.f32 -1.442695, %v4992_v58  ;;  %vm1227_vm1 = vweird.f32 %v4384_v45 }
  0xec   : > { %4389 = vrcp.f32 %v4982_v44  ;;  %v4388_v52 = vpop.eup %4387  ;;  %v687_v37 = vmul.f32 %v4386_v49, %v556_v39  ;;  %vm692_vm15 = vweird.f32 %v4386_v49  ;;  %vm706_vm4 = vweird.f32 %v4982_v44 }
  0xed   : > { %v4989_v54 = vadd.f32 1.0, %v4388_v52  ;;  %v1224_v55 = vsub.f32 1.0, %v1223_v51  ;;  %4391 = vpow2.f32 %v4167_v53  ;;  %vm5009_vm2 = vmor %vm691_vm14, %vm692_vm15  ;;  %v710_v34 = vand.u32 2147483647, %v4982_v44 }
  0xee   : > { %v688_v60 = vsub.f32 1.0, %v687_v37  ;;  %v712_v35 = vand.u32 2147483648, %v4982_v44 }
  0xef   : > { %4393 = vrcp.f32 %v4989_v54  ;;  %v1225_v63 = vmul.f32 %v4384_v45, %v1224_v55  ;;  %vm711_vm7 = vcmp.eq.f32.partialorder %v710_v34, 8.507059e+37  ;;  %vm721_vm8 = vweird.f32 %v4989_v54 }
  0xf0   : > { %v393_v62 = vpop.f32.mrf.mxu0  ;;  %v689_v1 = vmul.f32 %v4386_v49, %v688_v60  ;;  %4395 = vpow2.f32 %v4168_v0  ;;  %v725_v60 = vand.u32 2147483647, %v4989_v54 }
  0xf1   : > { %v1226_v6 = vadd.f32 %v4384_v45, %v1225_v63  ;;  %v5003_v7 = vadd.f32 %v4877_v15, %v393_v62 }
  0xf2   : > { %v4996_v61 = vpop.eup %4389  ;;  %v690_v11 = vadd.f32 %v4386_v49, %v689_v1  ;;  %vm726_vm11 = vcmp.eq.f32.partialorder %v725_v60, 8.507059e+37 }
  0xf3   : > { %v702_v2 = vmul.f32 %v4996_v61, %v4982_v44  ;;  %v4392_v3 = vpop.eup %4391  ;;  %v5015_v18 = vsel %vm1227_vm1, %v4384_v45, %v1226_v6  ;;  %v4169_v20 = vmul.f32 -1.442695, %v5003_v7  ;;  %vm707_vm5 = vweird.f32 %v4996_v61 }
  0xf4   : > { %v5013_v16 = vadd.f32 1.0, %v4392_v3  ;;  %v694_v22 = vsel %vm5009_vm2, %v4386_v49, %v690_v11  ;;  %vm5040_vm6 = vmor %vm706_vm4, %vm707_vm5 }
  0xf5   : > { %v703_v56 = vsub.f32 1.0, %v702_v2  ;;  %v5007_v13 = vpop.eup %4393  ;;  %v699_v33 = vsel %vm696_vm3, %v698_v17, %v694_v22 }
  0xf6   : > { %v717_v9 = vmul.f32 %v5007_v13, %v4989_v54  ;;  %v4396_v24 = vpop.eup %4395  ;;  %4397 = vrcp.f32 %v5013_v16  ;;  %v1068_v49 = vmul.f32 %v699_v33, %v4971_v32  ;;  %vm722_vm9 = vweird.f32 %v5007_v13 }
  0xf7   : > { %v704_v23 = vmul.f32 %v4996_v61, %v703_v56  ;;  %4399 = vpow2.f32 %v4169_v20  ;;  %v5037_v41 = vadd.f32 1.0, %v4396_v24  ;;  %vm5072_vm10 = vmor %vm721_vm8, %vm722_vm9  ;;  %vm736_vm12 = vweird.f32 %v5013_v16 }
  0xf8   : > { %v396_v21 = vpop.f32.mrf.mxu0  ;;  %v718_v39 = vsub.f32 1.0, %v717_v9  ;;  %v5068_v0 = vmul.f32 %v4901_v48, %v1068_v49  ;;  %v742_v9 = vand.u32 2147483648, %v5013_v16  ;;  %v740_v33 = vand.u32 2147483647, %v5013_v16 }
  0xf9   : > { %v5028_v29 = vadd.f32 %v4877_v15, %v396_v21  ;;  %v705_v36 = vadd.f32 %v4996_v61, %v704_v23  ;;  %4401 = vrcp.f32 %v5037_v41  ;;  %vm751_vm1 = vweird.f32 %v5037_v41 }
  0xfa   : > { %v719_v51 = vmul.f32 %v5007_v13, %v718_v39  ;;  %v1147_v12 = vsel %vm243_vm0, %v5068_v0, 0.0  ;;  %v743_v39 = vor.u32 1.1754944e-38, %v742_v9  ;;  %vm741_vm15 = vcmp.eq.f32.partialorder %v740_v33, 8.507059e+37 }
  0xfb   : > { %v4170_v44 = vmul.f32 -1.442695, %v5028_v29  ;;  %v709_v50 = vsel %vm5040_vm6, %v4996_v61, %v705_v36  ;;  %v727_v61 = vand.u32 2147483648, %v4989_v54 }
  0xfc   : > { %v5047_v45 = vpop.eup %4397  ;;  %v720_v62 = vadd.f32 %v5007_v13, %v719_v51 }
  0xfd   : > { %v4400_v37 = vpop.eup %4399  ;;  %v732_v32 = vmul.f32 %v5047_v45, %v5013_v16  ;;  %4403 = vpow2.f32 %v4170_v44  ;;  %vm737_vm13 = vweird.f32 %v5047_v45 }
  0xfe   : > { %v5070_v1 = vadd.f32 1.0, %v4400_v37  ;;  %v724_v11 = vsel %vm5072_vm10, %v5007_v13, %v720_v62  ;;  %vm5110_vm14 = vmor %vm736_vm12, %vm737_vm13  ;;  %v755_v37 = vand.u32 2147483647, %v5037_v41 }
  0xff   : > { %v5076_v3 = vpop.eup %4401  ;;  %v733_v5 = vsub.f32 1.0, %v732_v32 }
 0x100   : > { %4405 = vrcp.f32 %v5070_v1  ;;  %v747_v14 = vmul.f32 %v5076_v3, %v5037_v41  ;;  %vm752_vm2 = vweird.f32 %v5076_v3  ;;  %vm756_vm4 = vcmp.eq.f32.partialorder %v755_v37, 8.507059e+37 }
 0x101   : > { %vm5138_vm3 = vmor %vm751_vm1, %vm752_vm2  ;;  %vm766_vm5 = vweird.f32 %v5070_v1 }
 0x102   : > { %v748_v24 = vsub.f32 1.0, %v747_v14 }
 0x103   : > { %v4404_v8 = vpop.eup %4403 }
 0x104   : > { %v5092_v22 = vadd.f32 1.0, %v4404_v8  ;;  %v749_v42 = vmul.f32 %v5076_v3, %v748_v24  ;;  %v223_v24 = vld [vmem:[%s4850_s29 + $0xb0] sm:$0xff] }
 0x106   : > { %4407 = vrcp.f32 %v5092_v22  ;;  %vm781_vm9 = vweird.f32 %v5092_v22 }
 0x127   : > { %v1128_v26 = vpop.xlane.xlu0 %1127 }
 0x128   : > { %v1229_v28 = vmul.f32 %v5015_v18, %v1128_v26  ;;  %v5103_v26 = vpop.eup %4405 }
 0x129   : > { %v762_v16 = vmul.f32 %v5103_v26, %v5070_v1  ;;  %v5134_v51 = vpop.eup %4407  ;;  %vm767_vm6 = vweird.f32 %v5103_v26 }
 0x12a   : > { %v5035_v40 = vsub.f32 %v4907_v57, %v1229_v28  ;;  %v713_v57 = vor.u32 1.1754944e-38, %v712_v35  ;;  %vm782_vm10 = vweird.f32 %v5134_v51 }
 0x12c   : > { %v1293_v43 = vmul.f32 %v5035_v40, %v5035_v40  ;;  %v714_v59 = vsel %vm711_vm7, %v713_v57, %v709_v50  ;;  %v757_v57 = vand.u32 2147483648, %v5037_v41  ;;  %vm5168_vm7 = vmor %vm766_vm5, %vm767_vm6 }
 0x12d   : > { %v1069_v6 = vmul.f32 %v714_v59, %v4975_v30  ;;  %v734_v30 = vmul.f32 %v5047_v45, %v733_v5  ;;  %v222_v5 = vld [vmem:[%s4850_s29 + $0xa8] sm:$0xff] }
 0x12e   : > { %v1325_v52 = vsel %vm243_vm0, %v1293_v43, 0.0  ;;  %v758_v60 = vor.u32 1.1754944e-38, %v757_v57  ;;  %4146 = vmatmul.msk.f32.gmra.mxu0 %vm243_vm0, %v222_v5 }
 0x12f   : > { %1326 = vadd.xlane.f32.xlu0 %v1325_v52  ;;  %v1131_v53 = vpop.xlane.xlu0 %1130  ;;  %v5100_v23 = vmul.f32 %v4901_v48, %v1069_v6  ;;  %v735_v28 = vadd.f32 %v5047_v45, %v734_v30 }
 0x130   : > { %v1230_v55 = vmul.f32 %v5015_v18, %v1131_v53  ;;  %v763_v53 = vsub.f32 1.0, %v762_v16 }
 0x131   : > { %v1150_v36 = vsel %vm243_vm0, %v5100_v23, 0.0 }
 0x132   : > { %v5065_v63 = vsub.f32 %v4917_v10, %v1230_v55  ;;  %v728_v10 = vor.u32 1.1754944e-38, %v727_v61  ;;  %v777_v61 = vmul.f32 %v5134_v51, %v5092_v22  ;;  %v764_v2 = vmul.f32 %v5103_v26, %v763_v53 }
 0x134   : > { %v1294_v54 = vmul.f32 %v5065_v63, %v5065_v63  ;;  %v729_v21 = vsel %vm726_vm11, %v728_v10, %v724_v11  ;;  %v772_v10 = vand.u32 2147483648, %v5070_v1  ;;  %v765_v11 = vadd.f32 %v5103_v26, %v764_v2  ;;  %vm783_vm11 = vmor %vm781_vm9, %vm782_vm10 }
 0x135   : > { %v1070_v35 = vmul.f32 %v729_v21, %v4979_v38  ;;  %v739_v38 = vsel %vm5110_vm14, %v5047_v45, %v735_v28  ;;  %v750_v45 = vadd.f32 %v5076_v3, %v749_v42  ;;  %v787_v28 = vand.u32 2147483648, %v5092_v22 }
 0x136   : > { %v1328_v56 = vsel %vm243_vm0, %v1294_v54, 0.0  ;;  %v744_v52 = vsel %vm741_vm15, %v743_v39, %v739_v38  ;;  %4147 = vmatmul.msk.f32.gmra.mxu0 %vm243_vm0, %v223_v24  ;;  %v224_v38 = vld [vmem:[%s4850_s29 + $0xb8] sm:$0xff] }
 0x137   : > { %v1134_v17 = vpop.xlane.xlu1 %1133  ;;  %1148 = vadd.xlane.f32.xlu0 %v1147_v12  ;;  %1329 = vadd.xlane.f32.xlu2 %v1328_v56  ;;  %v5128_v49 = vmul.f32 %v4901_v48, %v1070_v35  ;;  %v1071_v59 = vmul.f32 %v744_v52, %v4985_v46  ;;  %v754_v41 = vsel %vm5138_vm3, %v5076_v3, %v750_v45  ;;  %v778_v3 = vsub.f32 1.0, %v777_v61 }
 0x138   : > { %v1231_v20 = vmul.f32 %v5015_v18, %v1134_v17  ;;  %v759_v6 = vsel %vm756_vm4, %v758_v60, %v754_v41  ;;  %v770_v12 = vand.u32 2147483647, %v5070_v1  ;;  %v788_v39 = vor.u32 1.1754944e-38, %v787_v28  ;;  %v226_v28 = vld [vmem:[%s4850_s29 + $0xc8] sm:$0xff] }
 0x139   : > { %v5161_v8 = vmul.f32 %v4901_v48, %v1071_v59  ;;  %v1072_v17 = vmul.f32 %v759_v6, %v4992_v58  ;;  %v779_v21 = vmul.f32 %v5134_v51, %v778_v3 }
 0x13a   : > { %v5097_v13 = vsub.f32 %v4927_v31, %v1231_v20  ;;  %v773_v20 = vor.u32 1.1754944e-38, %v772_v10  ;;  %vm771_vm8 = vcmp.eq.f32.partialorder %v770_v12, 8.507059e+37  ;;  %v785_v31 = vand.u32 2147483647, %v5092_v22 }
 0x13b   : > { %v1156_v9 = vsel %vm243_vm0, %v5161_v8, 0.0  ;;  %v780_v35 = vadd.f32 %v5134_v51, %v779_v21 }
 0x13c   : > { %v1295_v34 = vmul.f32 %v5097_v13, %v5097_v13  ;;  %vm786_vm12 = vcmp.eq.f32.partialorder %v785_v31, 8.507059e+37 }
 0x13e   : > { %v1331_v27 = vsel %vm243_vm0, %v1295_v34, 0.0  ;;  %v5189_v34 = vmul.f32 %v4901_v48, %v1072_v17  ;;  %4148 = vmatmul.msk.f32.gmra.mxu0 %vm243_vm0, %v224_v38 }
 0x13f   : > { %1332 = vadd.xlane.f32.xlu1 %v1331_v27  ;;  %v1137_v43 = vpop.xlane.xlu1 %1136  ;;  %1151 = vadd.xlane.f32.xlu2 %v1150_v36 }
 0x140   : > { %v1232_v44 = vmul.f32 %v5015_v18, %v1137_v43  ;;  %v1159_v16 = vsel %vm243_vm0, %v5189_v34, 0.0  ;;  %v784_v43 = vsel %vm783_vm11, %v5134_v51, %v780_v35 }
 0x142   : > { %v5132_v50 = vsub.f32 %v4936_v47, %v1232_v44  ;;  %v1153_v47 = vsel %vm243_vm0, %v5128_v49, 0.0 }
 0x144   : > { %v1296_v55 = vmul.f32 %v5132_v50, %v5132_v50 }
 0x146   : > { %v1334_v62 = vsel %vm243_vm0, %v1296_v55, 0.0 }
 0x147   : > { %1154 = vadd.xlane.f32.xlu1 %v1153_v47  ;;  %1335 = vadd.xlane.f32.xlu0 %v1334_v62  ;;  %v1140_v54 = vpop.xlane.xlu2 %1139  ;;  %v225_v47 = vld [vmem:[%s4850_s29 + $0xc0] sm:$0xff] }
 0x148   : > { %v1233_v46 = vmul.f32 %v5015_v18, %v1140_v54  ;;  %4149 = vmatmul.msk.f32.gmra.mxu0 %vm243_vm0, %v225_v47 }
 0x14a   : > { %v5166_v56 = vsub.f32 %v4950_v4, %v1233_v46  ;;  %v769_v4 = vsel %vm5168_vm7, %v5103_v26, %v765_v11 }
 0x14b   : > { %v774_v26 = vsel %vm771_vm8, %v773_v20, %v769_v4  ;;  %v1906_v20 = vld [vmem:[%s8418_s2 + $0x18] sm:$0xff]  ;;  %v1905_v4 = vld [vmem:[%s8418_s2 + $0x10] sm:$0xff] }
 0x14c   : > { %v1297_v30 = vmul.f32 %v5166_v56, %v5166_v56  ;;  %v1073_v36 = vmul.f32 %v774_v26, %v5003_v7  ;;  %v789_v7 = vsel %vm786_vm12, %v788_v39, %v784_v43  ;;  %2016 = vmatpush.msra.mxu1 %v1906_v20 }
 0x14d   : > { %v1074_v51 = vmul.f32 %v789_v7, %v5028_v29 }
 0x14e   : > { %v1337_v1 = vsel %vm243_vm0, %v1297_v30, 0.0  ;;  %v5206_v57 = vmul.f32 %v4901_v48, %v1073_v36  ;;  %2017 = vmatpush.msra.mxu1 %v1905_v4  ;;  %v1903_v36 = vld [vmem:[%s8418_s2] sm:$0xff] }
 0x14f   : > { %1157 = vadd.xlane.f32.xlu0 %v1156_v9  ;;  %v1143_v58 = vpop.xlane.xlu2 %1142  ;;  %1338 = vadd.xlane.f32.xlu2 %v1337_v1  ;;  %v5219_v32 = vmul.f32 %v4901_v48, %v1074_v51 }
 0x150   : > { %v1234_v33 = vmul.f32 %v5015_v18, %v1143_v58  ;;  %v1162_v37 = vsel %vm243_vm0, %v5206_v57, 0.0  ;;  %4150 = vmatmul.msk.f32.gmra.mxu0 %vm243_vm0, %v226_v28 }
 0x151   : > { %v1165_v55 = vsel %vm243_vm0, %v5219_v32, 0.0 }
 0x152   : > { %v5194_v27 = vsub.f32 %v4958_v19, %v1234_v33  ;;  %v1904_v33 = vld [vmem:[%s8418_s2 + $0x8] sm:$0xff] }
 0x153   : > { %2018 = vmatpush.msra.mxu1 %v1904_v33 }
 0x154   : > { %v1298_v42 = vmul.f32 %v5194_v27, %v5194_v27 }
 0x155   : > { %2019 = vmatpush.msra.mxu1 %v1903_v36 }
 0x156   : > { %v1340_v44 = vsel %vm243_vm0, %v1298_v42, 0.0 }
 0x157   : > { %v1146_v22 = vpop.xlane.xlu1 %1145  ;;  %1341 = vadd.xlane.f32.xlu1 %v1340_v44  ;;  %1160 = vadd.xlane.f32.xlu2 %v1159_v16 }
 0x158   : > { %v1235_v19 = vmul.f32 %v5015_v18, %v1146_v22 }
 0x15a   : > { %v5210_v52 = vsub.f32 %v4964_v25, %v1235_v19  ;;  %v399_v25 = vpop.f32.mrf.mxu0 }
 0x15b   : > { %v5226_v59 = vadd.f32 %v4877_v15, %v399_v25 }
 0x15c   : > { %v1299_v45 = vmul.f32 %v5210_v52, %v5210_v52 }
 0x15d   : > { %v4171_v62 = vmul.f32 -1.442695, %v5226_v59 }
 0x15e   : > { %v1343_v53 = vsel %vm243_vm0, %v1299_v45, 0.0 }
 0x15f   : > { %1344 = vadd.xlane.f32.xlu0 %v1343_v53  ;;  %1163 = vadd.xlane.f32.xlu1 %v1162_v37  ;;  %4409 = vpow2.f32 %v4171_v62  ;;  %v227_v37 = vld [vmem:[%s4850_s29 + $0xd0] sm:$0xff] }
 0x160   : > { %4151 = vmatmul.msk.f32.gmra.mxu0 %vm243_vm0, %v227_v37 }
 0x162   : > { %v402_v29 = vpop.f32.mrf.mxu0 }
 0x163   : > { %v5229_v60 = vadd.f32 %v4877_v15, %v402_v29 }
 0x165   : > { %v4172_v48 = vmul.f32 -1.442695, %v5229_v60  ;;  %v4410_v5 = vpop.eup %4409 }
 0x166   : > { %v5237_v6 = vadd.f32 1.0, %v4410_v5 }
 0x167   : > { %1166 = vadd.xlane.f32.xlu0 %v1165_v55  ;;  %4411 = vpow2.f32 %v4172_v48 }
 0x168   : > { %vm796_vm13 = vweird.f32 %v5237_v6  ;;  %v800_v7 = vand.u32 2147483647, %v5237_v6  ;;  %v802_v53 = vand.u32 2147483648, %v5237_v6 }
 0x16a   : > { %v405_v61 = vpop.f32.mrf.mxu0  ;;  %vm5310_vm3 = vcmp.eq.f32.partialorder %v800_v7, 8.507059e+37 }
 0x16b   : > { %v5234_v41 = vadd.f32 %v4877_v15, %v405_v61 }
 0x16d   : > { %v4173_v2 = vmul.f32 -1.442695, %v5234_v41  ;;  %v4412_v46 = vpop.eup %4411 }
 0x16e   : > { %v5242_v3 = vadd.f32 1.0, %v4412_v46 }
 0x16f   : > { %4413 = vpow2.f32 %v4173_v2 }
 0x170   : > { %4415 = vrcp.f32 %v5237_v6  ;;  %v815_v55 = vand.u32 2147483647, %v5242_v3  ;;  %v817_v25 = vand.u32 2147483648, %v5242_v3  ;;  %vm811_vm15 = vweird.f32 %v5242_v3 }
 0x171   : > { %4417 = vrcp.f32 %v5242_v3 }
 0x172   : > { %v408_v54 = vpop.f32.mrf.mxu0  ;;  %vm5322_vm5 = vcmp.eq.f32.partialorder %v815_v55, 8.507059e+37 }
 0x173   : > { %v5240_v10 = vadd.f32 %v4877_v15, %v408_v54 }
 0x175   : > { %v4414_v11 = vpop.eup %4413  ;;  %v4174_v12 = vmul.f32 -1.442695, %v5240_v10 }
 0x176   : > { %v5247_v14 = vadd.f32 1.0, %v4414_v11  ;;  %v5249_v17 = vpop.eup %4415 }
 0x177   : > { %4419 = vpow2.f32 %v4174_v12  ;;  %v5255_v21 = vpop.eup %4417  ;;  %v792_v24 = vmul.f32 %v5249_v17, %v5237_v6  ;;  %vm797_vm14 = vweird.f32 %v5249_v17  ;;  %v803_v6 = vor.u32 1.1754944e-38, %v802_v53 }
 0x178   : > { %4421 = vrcp.f32 %v5247_v14  ;;  %v807_v58 = vmul.f32 %v5255_v21, %v5242_v3  ;;  %vm812_vm1 = vweird.f32 %v5255_v21  ;;  %vm5304_vm2 = vmor %vm796_vm13, %vm797_vm14  ;;  %v818_v12 = vor.u32 1.1754944e-38, %v817_v25 }
 0x179   : > { %v793_v31 = vsub.f32 1.0, %v792_v24  ;;  %vm5318_vm4 = vmor %vm811_vm15, %vm812_vm1  ;;  %vm826_vm6 = vweird.f32 %v5247_v14  ;;  %v832_v28 = vand.u32 2147483648, %v5247_v14  ;;  %v830_v36 = vand.u32 2147483647, %v5247_v14 }
 0x17a   : > { %v411_v30 = vpop.f32.mrf.mxu0  ;;  %v808_v16 = vsub.f32 1.0, %v807_v58 }
 0x17b   : > { %v5258_v9 = vadd.f32 %v4877_v15, %v411_v30  ;;  %v794_v38 = vmul.f32 %v5249_v17, %v793_v31  ;;  %v5329_v30 = vld [vmem:[%s8419_s3] ss:$0 sm:$0xff]  ;;  %vm831_vm9 = vcmp.eq.f32.partialorder %v830_v36, 8.507059e+37 }
 0x17c   : > { %v809_v51 = vmul.f32 %v5255_v21, %v808_v16  ;;  %v228_v16 = vld [vmem:[%s4850_s29 + $0xd8] sm:$0xff] }
 0x17d   : > { %v4420_v1 = vpop.eup %4419  ;;  %v4175_v35 = vmul.f32 -1.442695, %v5258_v9  ;;  %4152 = vmatmul.msk.f32.gmra.mxu0 %vm243_vm0, %v228_v16 }
 0x17e   : > { %v5271_v26 = vpop.eup %4421  ;;  %v5278_v39 = vadd.f32 1.0, %v4420_v1  ;;  %v810_v5 = vadd.f32 %v5255_v21, %v809_v51 }
 0x17f   : > { %v822_v43 = vmul.f32 %v5271_v26, %v5247_v14  ;;  %4423 = vpow2.f32 %v4175_v35  ;;  %vm827_vm7 = vweird.f32 %v5271_v26 }
 0x180   : > { %4425 = vrcp.f32 %v5278_v39  ;;  %v814_v31 = vsel %vm5318_vm4, %v5255_v21, %v810_v5  ;;  %vm5354_vm8 = vmor %vm826_vm6, %vm827_vm7  ;;  %vm841_vm10 = vweird.f32 %v5278_v39 }
 0x181   : > { %v823_v45 = vsub.f32 1.0, %v822_v43  ;;  %v819_v14 = vsel %vm5322_vm5, %v818_v12, %v814_v31  ;;  %v847_v12 = vand.u32 2147483648, %v5278_v39 }
 0x182   : > { %v414_v42 = vpop.f32.mrf.mxu0  ;;  %v1076_v61 = vmul.f32 %v819_v14, %v5229_v60 }
 0x183   : > { %v5287_v19 = vadd.f32 %v4877_v15, %v414_v42  ;;  %v795_v15 = vadd.f32 %v5249_v17, %v794_v38  ;;  %v824_v54 = vmul.f32 %v5271_v26, %v823_v45  ;;  %v833_v45 = vor.u32 1.1754944e-38, %v832_v28 }
 0x185   : > { %v4424_v29 = vpop.eup %4423  ;;  %v4176_v62 = vmul.f32 -1.442695, %v5287_v19  ;;  %v799_v24 = vsel %vm5304_vm2, %v5249_v17, %v795_v15  ;;  %v825_v17 = vadd.f32 %v5271_v26, %v824_v54 }
 0x186   : > { %v5316_v46 = vpop.eup %4425  ;;  %v5339_v58 = vadd.f32 1.0, %v4424_v29  ;;  %v804_v7 = vsel %vm5310_vm3, %v803_v6, %v799_v24 }
 0x187   : > { %v837_v42 = vmul.f32 %v5316_v46, %v5278_v39  ;;  %v829_v37 = vsel %vm5354_vm8, %v5271_v26, %v825_v17  ;;  %v1075_v15 = vmul.f32 %v804_v7, %v5226_v59  ;;  %vm842_vm12 = vweird.f32 %v5316_v46 }
 0x188   : > { %v834_v5 = vsel %vm831_vm9, %v833_v45, %v829_v37  ;;  %vm5426_vm15 = vmor %vm841_vm10, %vm842_vm12  ;;  %vm856_vm5 = vweird.f32 %v5339_v58 }
 0x189   : > { %v838_v53 = vsub.f32 1.0, %v837_v42  ;;  %v5417_v42 = vld [vmem:[%s8419_s3 + $0x2] ss:$0 sm:$0xff] }
 0x18a   : > { %v417_v48 = vpop.f32.mrf.mxu0 }
 0x18b   : > { %v5332_v20 = vadd.f32 %v5329_v30, %v417_v48  ;;  %v839_v59 = vmul.f32 %v5316_v46, %v838_v53 }
 0x18d   : > { %v4177_v21 = vmul.f32 -1.442695, %v5332_v20 }
 0x1a2   : > { %v1327_v44 = vpop.xlane.xlu0 %1326 }
 0x1a3   : > { %v1421_v22 = vmul.f32 %v1327_v44, %v5015_v18 }
 0x1a5   : > { %v5296_v47 = vadd.f32 1e-05, %v1421_v22 }
 0x1a7   : > { %4427 = vrsqrt.f32 %v5296_v47  ;;  %vm1491_vm13 = vweird.f32 %v5296_v47 }
 0x1a8   : > { %4429 = vpow2.f32 %v4176_v62 }
 0x1a9   : > { %4431 = vrcp.f32 %v5339_v58 }
 0x1aa   : > { %v1330_v4 = vpop.xlane.xlu2 %1329  ;;  %v1149_v1 = vpop.xlane.xlu0 %1148 }
 0x1ab   : > { %v1422_v33 = vmul.f32 %v1330_v4, %v5015_v18  ;;  %v1236_v35 = vmul.f32 %v5015_v18, %v1149_v1  ;;  %v5399_v1 = vld [vmem:[%s8419_s3 + $0x1] ss:$0 sm:$0xff] }
 0x1ac   : > { %v5402_v28 = vmul.f32 %v5399_v1, %v1075_v15  ;;  %v5440_v45 = vmul.f32 %v5399_v1, %v1076_v61 }
 0x1ad   : > { %v4428_v43 = vpop.eup %4427  ;;  %v5358_v44 = vadd.f32 1e-05, %v1422_v33  ;;  %v5361_v22 = vsub.f32 %v5068_v0, %v1236_v35 }
 0x1ae   : > { %v1486_v51 = vmul.f32 %v4428_v43, %v5296_v47  ;;  %v4430_v25 = vpop.eup %4429  ;;  %vm1492_vm11 = vweird.f32 %v4428_v43  ;;  %v840_v47 = vadd.f32 %v5316_v46, %v839_v59 }
 0x1af   : > { %4433 = vrsqrt.f32 %v5358_v44  ;;  %v1300_v0 = vmul.f32 %v5361_v22, %v5361_v22  ;;  %v5383_v6 = vpop.eup %4431  ;;  %v5386_v11 = vadd.f32 1.0, %v4430_v25  ;;  %vm1493_vm14 = vmor %vm1491_vm13, %vm1492_vm11  ;;  %vm1501_vm3 = vweird.f32 %v5358_v44 }
 0x1b0   : > { %v1487_v55 = vmul.f32 %v4428_v43, %v1486_v51  ;;  %4435 = vpow2.f32 %v4177_v21  ;;  %v852_v17 = vmul.f32 %v5383_v6, %v5339_v58  ;;  %v1168_v51 = vsel %vm243_vm0, %v5402_v28, 0.0 }
 0x1b1   : > { %v1346_v29 = vsel %vm243_vm0, %v1300_v0, 0.0  ;;  %v848_v0 = vor.u32 1.1754944e-38, %v847_v12  ;;  %v844_v61 = vsel %vm5426_vm15, %v5316_v46, %v840_v47  ;;  %vm857_vm6 = vweird.f32 %v5383_v6 }
 0x1b2   : > { %v1488_v62 = vmul.f32 0.5, %v1487_v55  ;;  %v1333_v48 = vpop.xlane.xlu1 %1332  ;;  %v1152_v2 = vpop.xlane.xlu2 %1151  ;;  %1347 = vadd.xlane.f32.xlu2 %v1346_v29  ;;  %v853_v15 = vsub.f32 1.0, %v852_v17  ;;  %v860_v21 = vand.u32 2147483647, %v5339_v58  ;;  %vm5490_vm8 = vmor %vm856_vm5, %vm857_vm6  ;;  %vm871_vm12 = vweird.f32 %v5386_v11 }
 0x1b3   : > { %v1423_v26 = vmul.f32 %v1333_v48, %v5015_v18  ;;  %v1237_v54 = vmul.f32 %v5015_v18, %v1152_v2 }
 0x1b4   : > { %v1489_v3 = vsub.f32 1.5, %v1488_v62  ;;  %vm861_vm11 = vcmp.eq.f32.partialorder %v860_v21, 8.507059e+37 }
 0x1b5   : > { %v5388_v60 = vpop.eup %4433  ;;  %v5391_v24 = vadd.f32 1e-05, %v1423_v26  ;;  %v5394_v4 = vsub.f32 %v5100_v23, %v1237_v54  ;;  %v845_v23 = vand.u32 2147483647, %v5278_v39  ;;  %v1077_v39 = vmul.f32 %v834_v5, %v5234_v41 }
 0x1b6   : > { %v1490_v33 = vmul.f32 %v4428_v43, %v1489_v3  ;;  %v1496_v35 = vmul.f32 %v5388_v60, %v5358_v44  ;;  %v4436_v31 = vpop.eup %4435  ;;  %vm1502_vm2 = vweird.f32 %v5388_v60  ;;  %v1171_v54 = vsel %vm243_vm0, %v5440_v45, 0.0 }
 0x1b7   : > { %4437 = vrsqrt.f32 %v5391_v24  ;;  %v1301_v36 = vmul.f32 %v5394_v4, %v5394_v4  ;;  %v5443_v25 = vadd.f32 1.0, %v4436_v31  ;;  %vm846_vm1 = vcmp.eq.f32.partialorder %v845_v23, 8.507059e+37  ;;  %vm1503_vm4 = vmor %vm1501_vm3, %vm1502_vm2 }
 0x1b8   : > { %v1494_v16 = vsel %vm1493_vm14, %v4428_v43, %v1490_v33  ;;  %v1497_v38 = vmul.f32 %v5388_v60, %v1496_v35  ;;  %4439 = vrcp.f32 %v5386_v11  ;;  %v5437_v43 = vld [vmem:[%s8419_s3 + $0x3] ss:$0 sm:$0xff]  ;;  %v849_v12 = vsel %vm846_vm1, %v848_v0, %v844_v61 }
 0x1b9   : > { %v1349_v7 = vsel %vm243_vm0, %v1301_v36, 0.0  ;;  %v1805_v14 = vmul.f32 %v1494_v16, %v5035_v40  ;;  %4441 = vrcp.f32 %v5443_v25  ;;  %v862_v44 = vand.u32 2147483648, %v5339_v58 }
 0x1ba   : > { %v1498_v37 = vmul.f32 0.5, %v1497_v38  ;;  %v1155_v53 = vpop.xlane.xlu1 %1154  ;;  %1350 = vadd.xlane.f32.xlu1 %v1349_v7  ;;  %1169 = vadd.xlane.f32.xlu2 %v1168_v51  ;;  %v1336_v55 = vpop.xlane.xlu0 %1335  ;;  %v1078_v47 = vmul.f32 %v849_v12, %v5240_v10  ;;  %vm1511_vm9 = vweird.f32 %v5391_v24 }
 0x1bb   : > { %v1238_v40 = vmul.f32 %v5015_v18, %v1155_v53  ;;  %v1424_v29 = vmul.f32 %v1336_v55, %v5015_v18  ;;  %v1838_v62 = vmul.f32 %v5417_v42, %v1805_v14  ;;  %v5496_v53 = vmul.f32 %v5399_v1, %v1077_v39 }
 0x1bc   : > { %v1499_v41 = vsub.f32 1.5, %v1498_v37 }
 0x1bd   : > { %v4438_v48 = vpop.eup %4437  ;;  %v5453_v2 = vsub.f32 %v5128_v49, %v1238_v40  ;;  %v5455_v5 = vadd.f32 1e-05, %v1424_v29  ;;  %v1871_v26 = vadd.f32 %v5437_v43, %v1838_v62  ;;  %v854_v49 = vmul.f32 %v5383_v6, %v853_v15 }
 0x1be   : > { %v5460_v59 = vpop.eup %4439  ;;  %v1500_v3 = vmul.f32 %v5388_v60, %v1499_v41  ;;  %v1506_v46 = vmul.f32 %v4438_v48, %v5391_v24  ;;  %vm1512_vm7 = vweird.f32 %v4438_v48  ;;  %v863_v15 = vor.u32 1.1754944e-38, %v862_v44 }
 0x1bf   : > { %4443 = vrsqrt.f32 %v5455_v5  ;;  %4189 = vmatmul.msk.f32.vlgmr.msra.gmra.mxu1 %vm243_vm0, %v1871_v26  ;;  %v1302_v33 = vmul.f32 %v5453_v2, %v5453_v2  ;;  %v867_v23 = vmul.f32 %v5460_v59, %v5386_v11  ;;  %v855_v38 = vadd.f32 %v5383_v6, %v854_v49  ;;  %v5484_v0 = vpop.eup %4441  ;;  %vm1513_vm10 = vmor %vm1511_vm9, %vm1512_vm7 }
 0x1c0   : > { %v1504_v35 = vsel %vm1503_vm4, %v5388_v60, %v1500_v3  ;;  %v1507_v31 = vmul.f32 %v4438_v48, %v1506_v46  ;;  %v882_v26 = vmul.f32 %v5484_v0, %v5443_v25  ;;  %v1174_v46 = vsel %vm243_vm0, %v5496_v53, 0.0 }
 0x1c1   : > { %v1352_v17 = vsel %vm243_vm0, %v1302_v33, 0.0  ;;  %v1806_v36 = vmul.f32 %v1504_v35, %v5065_v63  ;;  %v868_v40 = vsub.f32 1.0, %v867_v23  ;;  %v859_v39 = vsel %vm5490_vm8, %v5383_v6, %v855_v38 }
 0x1c2   : > { %v1508_v16 = vmul.f32 0.5, %v1507_v31  ;;  %1353 = vadd.xlane.f32.xlu0 %v1352_v17  ;;  %1172 = vadd.xlane.f32.xlu1 %v1171_v54  ;;  %v1158_v60 = vpop.xlane.xlu0 %1157  ;;  %v1339_v7 = vpop.xlane.xlu2 %1338  ;;  %v864_v49 = vsel %vm861_vm11, %v863_v15, %v859_v39  ;;  %vm872_vm13 = vweird.f32 %v5460_v59  ;;  %v877_v35 = vand.u32 2147483648, %v5386_v11 }
 0x1c3   : > { %v1239_v51 = vmul.f32 %v5015_v18, %v1158_v60  ;;  %v1839_v14 = vmul.f32 %v5417_v42, %v1806_v36  ;;  %v1425_v10 = vmul.f32 %v1339_v7, %v5015_v18  ;;  %v869_v3 = vmul.f32 %v5460_v59, %v868_v40  ;;  %vm5540_vm1 = vmor %vm871_vm12, %vm872_vm13 }
 0x1c4   : > { %v1509_v37 = vsub.f32 1.5, %v1508_v16  ;;  %v883_v31 = vsub.f32 1.0, %v882_v26  ;;  %v1079_v60 = vmul.f32 %v864_v49, %v5258_v9  ;;  %v875_v38 = vand.u32 2147483647, %v5386_v11 }
 0x1c5   : > { %v4444_v55 = vpop.eup %4443  ;;  %v5499_v29 = vsub.f32 %v5161_v8, %v1239_v51  ;;  %v1872_v62 = vadd.f32 %v5437_v43, %v1839_v14  ;;  %v5504_v41 = vadd.f32 1e-05, %v1425_v10  ;;  %vm1521_vm15 = vweird.f32 %v5455_v5 }
 0x1c6   : > { %v1510_v61 = vmul.f32 %v4438_v48, %v1509_v37  ;;  %v1516_v58 = vmul.f32 %v4444_v55, %v5455_v5  ;;  %vm1522_vm14 = vweird.f32 %v4444_v55  ;;  %v878_v63 = vor.u32 1.1754944e-38, %v877_v35 }
 0x1c7   : > { %4190 = vmatmul.msk.f32.gmra.mxu1 %vm243_vm0, %v1872_v62  ;;  %v1303_v8 = vmul.f32 %v5499_v29, %v5499_v29  ;;  %4445 = vrsqrt.f32 %v5504_v41  ;;  %vm1523_vm2 = vmor %vm1521_vm15, %vm1522_vm14  ;;  %v884_v15 = vmul.f32 %v5484_v0, %v883_v31  ;;  %vm5562_vm3 = vcmp.eq.f32.partialorder %v875_v38, 8.507059e+37 }
 0x1c8   : > { %v1514_v54 = vsel %vm1513_vm10, %v4438_v48, %v1510_v61  ;;  %v1517_v24 = vmul.f32 %v4444_v55, %v1516_v58  ;;  %v5522_v48 = vmul.f32 %v5399_v1, %v1078_v47  ;;  %v870_v47 = vadd.f32 %v5460_v59, %v869_v3 }
 0x1c9   : > { %v1355_v6 = vsel %vm243_vm0, %v1303_v8, 0.0  ;;  %v1807_v12 = vmul.f32 %v1514_v54, %v5097_v13  ;;  %vm886_vm4 = vweird.f32 %v5443_v25  ;;  %v890_v39 = vand.u32 2147483647, %v5443_v25 }
 0x1ca   : > { %v1518_v33 = vmul.f32 0.5, %v1517_v24  ;;  %1175 = vadd.xlane.f32.xlu0 %v1174_v46  ;;  %1356 = vadd.xlane.f32.xlu2 %v1355_v6  ;;  %v1342_v44 = vpop.xlane.xlu1 %1341  ;;  %v1161_v23 = vpop.xlane.xlu2 %1160  ;;  %v1177_v5 = vsel %vm243_vm0, %v5522_v48, 0.0  ;;  %v874_v62 = vsel %vm5540_vm1, %v5460_v59, %v870_v47  ;;  %v5573_v59 = vmul.f32 %v5399_v1, %v1079_v60 }
 0x1cb   : > { %v1840_v17 = vmul.f32 %v5417_v42, %v1807_v12  ;;  %v1426_v13 = vmul.f32 %v1342_v44, %v5015_v18  ;;  %v1240_v16 = vmul.f32 %v5015_v18, %v1161_v23  ;;  %vm887_vm5 = vweird.f32 %v5484_v0 }
 0x1cc   : > { %v1519_v36 = vsub.f32 1.5, %v1518_v33  ;;  %v879_v46 = vsel %vm5562_vm3, %v878_v63, %v874_v62  ;;  %v885_v6 = vadd.f32 %v5484_v0, %v884_v15  ;;  %v892_v12 = vand.u32 2147483648, %v5443_v25  ;;  %vm5587_vm7 = vmor %vm886_vm4, %vm887_vm5 }
 0x1cd   : > { %v1873_v21 = vadd.f32 %v5437_v43, %v1840_v17  ;;  %v5533_v7 = vpop.eup %4445  ;;  %v5544_v9 = vadd.f32 1e-05, %v1426_v13  ;;  %v5547_v37 = vsub.f32 %v5189_v34, %v1240_v16  ;;  %v229_v34 = vld [vmem:[%s4850_s29 + $0xe0] sm:$0xff]  ;;  %vm1531_vm8 = vweird.f32 %v5504_v41  ;;  %v230_v16 = vld [vmem:[%s4850_s29 + $0xe8] sm:$0xff] }
 0x1ce   : > { %v1520_v51 = vmul.f32 %v4444_v55, %v1519_v36  ;;  %v1526_v10 = vmul.f32 %v5533_v7, %v5504_v41  ;;  %4153 = vmatmul.msk.f32.gmra.mxu0 %vm243_vm0, %v229_v34  ;;  %vm1532_vm6 = vweird.f32 %v5533_v7  ;;  %v1080_v60 = vmul.f32 %v879_v46, %v5287_v19 }
 0x1cf   : > { %4191 = vmatmul.msk.f32.gmra.mxu1 %vm243_vm0, %v1873_v21  ;;  %4447 = vrsqrt.f32 %v5544_v9  ;;  %v1304_v40 = vmul.f32 %v5547_v37, %v5547_v37  ;;  %vm1533_vm9 = vmor %vm1531_vm8, %vm1532_vm6  ;;  %v893_v25 = vor.u32 1.1754944e-38, %v892_v12  ;;  %v889_v41 = vsel %vm5587_vm7, %v5484_v0, %v885_v6 }
 0x1d0   : > { %v1524_v11 = vsel %vm1523_vm2, %v4444_v55, %v1520_v51  ;;  %v1527_v58 = vmul.f32 %v5533_v7, %v1526_v10  ;;  %vm891_vm10 = vcmp.eq.f32.partialorder %v890_v39, 8.507059e+37  ;;  %v5614_v0 = vmul.f32 %v5399_v1, %v1080_v60 }
 0x1d1   : > { %v1808_v55 = vmul.f32 %v1524_v11, %v5132_v50  ;;  %v1358_v26 = vsel %vm243_vm0, %v1304_v40, 0.0  ;;  %vm1541_vm12 = vweird.f32 %v5544_v9 }
 0x1d2   : > { %1178 = vadd.xlane.f32.xlu2 %v1177_v5  ;;  %v1345_v8 = vpop.xlane.xlu0 %1344  ;;  %v1528_v54 = vmul.f32 0.5, %v1527_v58  ;;  %v1164_v24 = vpop.xlane.xlu1 %1163  ;;  %1359 = vadd.xlane.f32.xlu1 %v1358_v26 }
 0x1d3   : > { %v1427_v50 = vmul.f32 %v1345_v8, %v5015_v18  ;;  %v1841_v3 = vmul.f32 %v5417_v42, %v1808_v55  ;;  %v1241_v49 = vmul.f32 %v5015_v18, %v1164_v24  ;;  %v231_v55 = vld [vmem:[%s4850_s29 + $0xf0] sm:$0xff] }
 0x1d4   : > { %v1529_v33 = vsub.f32 1.5, %v1528_v54 }
 0x1d5   : > { %v1459_v35 = vadd.f32 1e-05, %v1427_v50  ;;  %v1874_v31 = vadd.f32 %v5437_v43, %v1841_v3  ;;  %v4448_v44 = vpop.eup %4447  ;;  %v5592_v17 = vsub.f32 %v5206_v57, %v1241_v49  ;;  %v1180_v57 = vsel %vm243_vm0, %v5573_v59, 0.0  ;;  %v232_v49 = vld [vmem:[%s4850_s29 + $0xf8] sm:$0xff] }
 0x1d6   : > { %v1530_v36 = vmul.f32 %v5533_v7, %v1529_v33  ;;  %v1536_v13 = vmul.f32 %v4448_v44, %v5544_v9  ;;  %4154 = vmatmul.msk.f32.gmra.mxu0 %vm243_vm0, %v230_v16  ;;  %vm1542_vm11 = vweird.f32 %v4448_v44 }
 0x1d7   : > { %4449 = vrsqrt.f32 %v1459_v35  ;;  %4192 = vmatmul.msk.f32.gmra.mxu1 %vm243_vm0, %v1874_v31  ;;  %v1305_v47 = vmul.f32 %v5592_v17, %v5592_v17  ;;  %vm1543_vm13 = vmor %vm1541_vm12, %vm1542_vm11  ;;  %vm1551_vm15 = vweird.f32 %v1459_v35 }
 0x1d8   : > { %v1534_v38 = vsel %vm1533_vm9, %v5533_v7, %v1530_v36  ;;  %v1537_v21 = vmul.f32 %v4448_v44, %v1536_v13  ;;  %v894_v7 = vsel %vm891_vm10, %v893_v25, %v889_v41 }
 0x1d9   : > { %v1361_v19 = vsel %vm243_vm0, %v1305_v47, 0.0  ;;  %v1809_v14 = vmul.f32 %v1534_v38, %v5166_v56  ;;  %v1081_v62 = vmul.f32 %v894_v7, %v5332_v20 }
 0x1da   : > { %v1167_v51 = vpop.xlane.xlu0 %1166  ;;  %v1538_v63 = vmul.f32 0.5, %v1537_v21  ;;  %1362 = vadd.xlane.f32.xlu0 %v1361_v19  ;;  %1181 = vadd.xlane.f32.xlu1 %v1180_v57 }
 0x1db   : > { %v1242_v10 = vmul.f32 %v5015_v18, %v1167_v51  ;;  %v1842_v5 = vmul.f32 %v5417_v42, %v1809_v14  ;;  %v5632_v54 = vmul.f32 %v5399_v1, %v1081_v62 }
 0x1dc   : > { %v1539_v15 = vsub.f32 1.5, %v1538_v63 }
 0x1dd   : > { %v4450_v11 = vpop.eup %4449  ;;  %v5617_v40 = vsub.f32 %v5219_v32, %v1242_v10  ;;  %v1875_v56 = vadd.f32 %v5437_v43, %v1842_v5  ;;  %v1183_v32 = vsel %vm243_vm0, %v5614_v0, 0.0  ;;  %v1186_v6 = vsel %vm243_vm0, %v5632_v54, 0.0  ;;  %v4229_v10 = vld [vmem:[%s8417_s1 + $0x38] sm:$0xff] }
 0x1de   : > { %v1546_v34 = vmul.f32 %v4450_v11, %v1459_v35  ;;  %v1540_v61 = vmul.f32 %v4448_v44, %v1539_v15  ;;  %4155 = vmatmul.msk.f32.gmra.mxu0 %vm243_vm0, %v231_v55  ;;  %vm1552_vm14 = vweird.f32 %v4450_v11  ;;  %v420_v35 = vpop.f32.mrf.mxu0  ;;  %2237 = vmatpush.msra.mxu2 %v4229_v10  ;;  %v4228_v15 = vld [vmem:[%s8417_s1 + $0x30] sm:$0xff]  ;;  %v4226_v55 = vld [vmem:[%s8417_s1 + $0x20] sm:$0xff] }
 0x1df   : > { %v1306_v58 = vmul.f32 %v5617_v40, %v5617_v40  ;;  %4193 = vmatmul.msk.f32.gmra.mxu1 %vm243_vm0, %v1875_v56  ;;  %vm1553_vm1 = vmor %vm1551_vm15, %vm1552_vm14  ;;  %v5646_v23 = vadd.f32 %v5329_v30, %v420_v35 }
 0x1e0   : > { %v1547_v39 = vmul.f32 %v4450_v11, %v1546_v34  ;;  %v1544_v26 = vsel %vm1543_vm13, %v4448_v44, %v1540_v61  ;;  %2238 = vmatpush.msra.mxu2 %v4228_v15  ;;  %v4227_v61 = vld [vmem:[%s8417_s1 + $0x28] sm:$0xff] }
 0x1e1   : > { %v1364_v8 = vsel %vm243_vm0, %v1306_v58, 0.0  ;;  %v1810_v9 = vmul.f32 %v1544_v26, %v5194_v27  ;;  %v4178_v36 = vmul.f32 -1.442695, %v5646_v23 }
 0x1e2   : > { %v1548_v20 = vmul.f32 0.5, %v1547_v39  ;;  %1365 = vadd.xlane.f32.xlu2 %v1364_v8  ;;  %1184 = vadd.xlane.f32.xlu0 %v1183_v32 }
 0x1e3   : > { %v1843_v50 = vmul.f32 %v5417_v42, %v1810_v9  ;;  %4451 = vpow2.f32 %v4178_v36  ;;  %2239 = vmatpush.msra.mxu2 %v4227_v61 }
 0x1e4   : > { %v1549_v24 = vsub.f32 1.5, %v1548_v20 }
 0x1e5   : > { %v1876_v46 = vadd.f32 %v5437_v43, %v1843_v50  ;;  %2240 = vmatpush.msra.mxu2 %v4226_v55 }
 0x1e6   : > { %v1550_v3 = vmul.f32 %v4450_v11, %v1549_v24  ;;  %4156 = vmatmul.msk.f32.gmra.mxu0 %vm243_vm0, %v232_v49  ;;  %v423_v44 = vpop.f32.mrf.mxu0 }
 0x1e7   : > { %4194 = vmatmul.msk.f32.gmra.mxu1 %vm243_vm0, %v1876_v46  ;;  %v5650_v13 = vadd.f32 %v5329_v30, %v423_v44 }
 0x1e8   : > { %v1554_v12 = vsel %vm1553_vm1, %v4450_v11, %v1550_v3 }
 0x1e9   : > { %v1811_v27 = vmul.f32 %v1554_v12, %v5210_v52  ;;  %v4179_v16 = vmul.f32 -1.442695, %v5650_v13  ;;  %v4452_v25 = vpop.eup %4451 }
 0x1ea   : > { %1187 = vadd.xlane.f32.xlu2 %v1186_v6  ;;  %v570_v38 = vadd.f32 1.0, %v4452_v25 }
 0x1eb   : > { %v1844_v33 = vmul.f32 %v5417_v42, %v1811_v27  ;;  %4453 = vpow2.f32 %v4179_v16 }
 0x1ec   : > { %vm901_vm2 = vweird.f32 %v570_v38  ;;  %v905_v50 = vand.u32 2147483647, %v570_v38  ;;  %v907_v3 = vand.u32 2147483648, %v570_v38 }
 0x1ed   : > { %v1877_v31 = vadd.f32 %v5437_v43, %v1844_v33 }
 0x1ee   : > { %v426_v52 = vpop.f32.mrf.mxu0  ;;  %vm5703_vm5 = vcmp.eq.f32.partialorder %v905_v50, 8.507059e+37  ;;  %v908_v16 = vor.u32 1.1754944e-38, %v907_v3 }
 0x1ef   : > { %4195 = vmatmul.msk.f32.gmra.mxu1 %vm243_vm0, %v1877_v31  ;;  %v5654_v60 = vadd.f32 %v5329_v30, %v426_v52 }
 0x1f1   : > { %v4180_v57 = vmul.f32 -1.442695, %v5654_v60  ;;  %v4454_v41 = vpop.eup %4453 }
 0x1f2   : > { %v5660_v19 = vadd.f32 1.0, %v4454_v41 }
 0x1f3   : > { %4455 = vpow2.f32 %v4180_v57 }
 0x1f4   : > { %4457 = vrcp.f32 %v570_v38  ;;  %v920_v44 = vand.u32 2147483647, %v5660_v19  ;;  %vm916_vm6 = vweird.f32 %v5660_v19  ;;  %v922_v25 = vand.u32 2147483648, %v5660_v19 }
 0x1f5   : > { %4459 = vrcp.f32 %v5660_v19 }
 0x1f6   : > { %v429_v47 = vpop.f32.mrf.mxu0  ;;  %vm5724_vm9 = vcmp.eq.f32.partialorder %v920_v44, 8.507059e+37  ;;  %v923_v15 = vor.u32 1.1754944e-38, %v922_v25 }
 0x1f7   : > { %v5658_v21 = vadd.f32 %v5329_v30, %v429_v47 }
 0x1f9   : > { %v4181_v51 = vmul.f32 -1.442695, %v5658_v21  ;;  %v4456_v14 = vpop.eup %4455 }
 0x1fa   : > { %v4458_v63 = vpop.eup %4457  ;;  %v5667_v7 = vadd.f32 1.0, %v4456_v14 }
 0x1fb   : > { %4461 = vpow2.f32 %v4181_v51  ;;  %v897_v5 = vmul.f32 %v4458_v63, %v570_v38  ;;  %v5672_v34 = vpop.eup %4459  ;;  %vm902_vm3 = vweird.f32 %v4458_v63 }
 0x1fc   : > { %4463 = vrcp.f32 %v5667_v7  ;;  %v912_v39 = vmul.f32 %v5672_v34, %v5660_v19  ;;  %vm5698_vm4 = vmor %vm901_vm2, %vm902_vm3  ;;  %vm917_vm7 = vweird.f32 %v5672_v34  ;;  %vm931_vm10 = vweird.f32 %v5667_v7 }
 0x1fd   : > { %v898_v58 = vsub.f32 1.0, %v897_v5  ;;  %vm5720_vm8 = vmor %vm916_vm6, %vm917_vm7 }
 0x1fe   : > { %v432_v11 = vpop.f32.mrf.mxu0  ;;  %v913_v24 = vsub.f32 1.0, %v912_v39 }
 0x1ff   : > { %v5675_v62 = vadd.f32 %v5329_v30, %v432_v11  ;;  %v899_v8 = vmul.f32 %v4458_v63, %v898_v58 }
 0x200   : > { %v914_v31 = vmul.f32 %v5672_v34, %v913_v24 }
 0x201   : > { %v4462_v56 = vpop.eup %4461  ;;  %v4182_v26 = vmul.f32 -1.442695, %v5675_v62  ;;  %v900_v6 = vadd.f32 %v4458_v63, %v899_v8  ;;  %v935_v8 = vand.u32 2147483647, %v5667_v7 }
 0x202   : > { %v5686_v32 = vadd.f32 1.0, %v4462_v56  ;;  %v5689_v9 = vpop.eup %4463  ;;  %v915_v14 = vadd.f32 %v5672_v34, %v914_v31 }
 0x203   : > { %v927_v12 = vmul.f32 %v5689_v9, %v5667_v7  ;;  %v904_v57 = vsel %vm5698_vm4, %v4458_v63, %v900_v6  ;;  %vm932_vm11 = vweird.f32 %v5689_v9  ;;  %vm5770_vm13 = vcmp.eq.f32.partialorder %v935_v8, 8.507059e+37 }
 0x204   : > { %4465 = vrcp.f32 %v5686_v32  ;;  %v909_v11 = vsel %vm5703_vm5, %v908_v16, %v904_v57  ;;  %vm5766_vm12 = vmor %vm931_vm10, %vm932_vm11  ;;  %v950_v57 = vand.u32 2147483647, %v5686_v32  ;;  %vm946_vm14 = vweird.f32 %v5686_v32 }
 0x205   : > { %4467 = vpow2.f32 %v4182_v26  ;;  %v928_v38 = vsub.f32 1.0, %v927_v12  ;;  %v1082_v31 = vmul.f32 %v909_v11, %v5646_v23 }
 0x206   : > { %v435_v20 = vpop.f32.mrf.mxu0  ;;  %vm5796_vm2 = vcmp.eq.f32.partialorder %v950_v57, 8.507059e+37 }
 0x207   : > { %v5696_v49 = vadd.f32 %v5329_v30, %v435_v20  ;;  %v929_v55 = vmul.f32 %v5689_v9, %v928_v38  ;;  %v937_v20 = vand.u32 2147483648, %v5667_v7  ;;  %v952_v38 = vand.u32 2147483648, %v5686_v32 }
 0x209   : > { %v4183_v41 = vmul.f32 -1.442695, %v5696_v49  ;;  %v938_v44 = vor.u32 1.1754944e-38, %v937_v20  ;;  %v953_v8 = vor.u32 1.1754944e-38, %v952_v38 }
 0x20a   : > { %v5710_v52 = vpop.eup %4465 }
 0x20b   : > { %v4468_v47 = vpop.eup %4467  ;;  %v942_v19 = vmul.f32 %v5710_v52, %v5686_v32  ;;  %vm947_vm15 = vweird.f32 %v5710_v52 }
 0x20c   : > { %v5736_v58 = vadd.f32 1.0, %v4468_v47  ;;  %vm5807_vm3 = vmor %vm946_vm14, %vm947_vm15 }
 0x20d   : > { %v943_v50 = vsub.f32 1.0, %v942_v19 }
 0x20e   : > { %v438_v51 = vpop.f32.mrf.mxu0 }
 0x20f   : > { %v5731_v63 = vadd.f32 %v5329_v30, %v438_v51  ;;  %v919_v30 = vsel %vm5720_vm8, %v5672_v34, %v915_v14  ;;  %v944_v47 = vmul.f32 %v5710_v52, %v943_v50 }
 0x210   : > { %v924_v34 = vsel %vm5724_vm9, %v923_v15, %v919_v30  ;;  %v5789_v15 = vmul.f32 %v5399_v1, %v1082_v31  ;;  %vm961_vm9 = vweird.f32 %v5736_v58 }
 0x211   : > { %v4184_v6 = vmul.f32 -1.442695, %v5731_v63  ;;  %v1083_v7 = vmul.f32 %v924_v34, %v5650_v13 }
 0x225   : > { %v1348_v46 = vpop.xlane.xlu2 %1347 }
 0x226   : > { %v1428_v27 = vmul.f32 %v1348_v46, %v5015_v18 }
 0x228   : > { %v5708_v36 = vadd.f32 1e-05, %v1428_v27  ;;  %v930_v27 = vadd.f32 %v5689_v9, %v929_v55  ;;  %v945_v55 = vadd.f32 %v5710_v52, %v944_v47 }
 0x22a   : > { %4469 = vrsqrt.f32 %v5708_v36  ;;  %v934_v10 = vsel %vm5766_vm12, %v5689_v9, %v930_v27  ;;  %vm1561_vm4 = vweird.f32 %v5708_v36  ;;  %v949_v31 = vsel %vm5807_vm3, %v5710_v52, %v945_v55 }
 0x22b   : > { %4471 = vpow2.f32 %v4183_v41  ;;  %v939_v32 = vsel %vm5770_vm13, %v938_v44, %v934_v10 }
 0x22c   : > { %4473 = vrcp.f32 %v5736_v58 }
 0x22d   : > { %v1351_v56 = vpop.xlane.xlu1 %1350  ;;  %v1170_v61 = vpop.xlane.xlu2 %1169 }
 0x22e   : > { %v1429_v39 = vmul.f32 %v1351_v56, %v5015_v18  ;;  %v1243_v26 = vmul.f32 %v5015_v18, %v1170_v61 }
 0x230   : > { %v4470_v24 = vpop.eup %4469  ;;  %v5747_v3 = vadd.f32 1e-05, %v1429_v39  ;;  %v5750_v46 = vsub.f32 %v5402_v28, %v1243_v26 }
 0x231   : > { %v1556_v12 = vmul.f32 %v4470_v24, %v5708_v36  ;;  %v4472_v25 = vpop.eup %4471  ;;  %vm1562_vm1 = vweird.f32 %v4470_v24 }
 0x232   : > { %4475 = vrsqrt.f32 %v5747_v3  ;;  %v1307_v33 = vmul.f32 %v5750_v46, %v5750_v46  ;;  %v5786_v11 = vpop.eup %4473  ;;  %v5791_v56 = vadd.f32 1.0, %v4472_v25  ;;  %vm1563_vm5 = vmor %vm1561_vm4, %vm1562_vm1  ;;  %vm1571_vm7 = vweird.f32 %v5747_v3 }
 0x233   : > { %v1557_v16 = vmul.f32 %v4470_v24, %v1556_v12  ;;  %4477 = vpow2.f32 %v4184_v6  ;;  %v957_v12 = vmul.f32 %v5786_v11, %v5736_v58  ;;  %vm962_vm10 = vweird.f32 %v5786_v11 }
 0x234   : > { %v1367_v23 = vsel %vm243_vm0, %v1307_v33, 0.0  ;;  %v1189_v33 = vsel %vm243_vm0, %v5789_v15, 0.0  ;;  %vm5897_vm12 = vmor %vm961_vm9, %vm962_vm10  ;;  %vm976_vm1 = vweird.f32 %v5791_v56 }
 0x235   : > { %v1558_v41 = vmul.f32 0.5, %v1557_v16  ;;  %v1173_v51 = vpop.xlane.xlu1 %1172  ;;  %1368 = vadd.xlane.f32.xlu1 %v1367_v23  ;;  %v1354_v14 = vpop.xlane.xlu0 %1353  ;;  %v5837_v16 = vmul.f32 %v5399_v1, %v1083_v7  ;;  %v958_v52 = vsub.f32 1.0, %v957_v12  ;;  %v954_v7 = vsel %vm5796_vm2, %v953_v8, %v949_v31 }
 0x236   : > { %v1244_v5 = vmul.f32 %v5015_v18, %v1173_v51  ;;  %v1430_v19 = vmul.f32 %v1354_v14, %v5015_v18 }
 0x237   : > { %v1559_v13 = vsub.f32 1.5, %v1558_v41 }
 0x238   : > { %v5793_v61 = vpop.eup %4475  ;;  %v5801_v39 = vsub.f32 %v5440_v45, %v1244_v5  ;;  %v5803_v26 = vadd.f32 1e-05, %v1430_v19  ;;  %v5817_v45 = vld [vmem:[%s8419_s3 + $0x4] ss:$0 sm:$0xff] }
 0x239   : > { %v1560_v20 = vmul.f32 %v4470_v24, %v1559_v13  ;;  %v1566_v50 = vmul.f32 %v5793_v61, %v5747_v3  ;;  %v4478_v6 = vpop.eup %4477  ;;  %vm1572_vm6 = vweird.f32 %v5793_v61  ;;  %v1192_v13 = vsel %vm243_vm0, %v5837_v16, 0.0 }
 0x23a   : > { %4479 = vrsqrt.f32 %v5803_v26  ;;  %v1308_v36 = vmul.f32 %v5801_v39, %v5801_v39  ;;  %v5841_v38 = vadd.f32 1.0, %v4478_v6  ;;  %vm1573_vm8 = vmor %vm1571_vm7, %vm1572_vm6  ;;  %v967_v6 = vand.u32 2147483648, %v5736_v58 }
 0x23b   : > { %v1564_v34 = vsel %vm1563_vm5, %v4470_v24, %v1560_v20  ;;  %v1567_v27 = vmul.f32 %v5793_v61, %v1566_v50  ;;  %4481 = vrcp.f32 %v5791_v56  ;;  %v1084_v24 = vmul.f32 %v939_v32, %v5654_v60 }
 0x23c   : > { %v2021_v28 = vpop.f32.mrf.mxu1  ;;  %v1370_v35 = vsel %vm243_vm0, %v1308_v36, 0.0  ;;  %v1812_v44 = vmul.f32 %v1564_v34, %v5361_v22  ;;  %4483 = vrcp.f32 %v5841_v38  ;;  %vm1581_vm13 = vweird.f32 %v5803_v26 }
 0x23d   : > { %v1568_v25 = vmul.f32 0.5, %v1567_v27  ;;  %v2022_v47 = vadd.f32 %v5817_v45, %v2021_v28  ;;  %1371 = vadd.xlane.f32.xlu0 %v1370_v35  ;;  %1190 = vadd.xlane.f32.xlu1 %v1189_v33  ;;  %v1357_v57 = vpop.xlane.xlu2 %1356  ;;  %v1176_v23 = vpop.xlane.xlu0 %1175  ;;  %v5873_v20 = vmul.f32 %v5399_v1, %v1084_v24  ;;  %v1085_v27 = vmul.f32 %v954_v7, %v5658_v21 }
 0x23e   : > { %v1431_v41 = vmul.f32 %v1357_v57, %v5015_v18  ;;  %v1245_v51 = vmul.f32 %v5015_v18, %v1176_v23  ;;  %v1845_v22 = vmul.f32 %v5417_v42, %v1812_v44  ;;  %v965_v35 = vand.u32 2147483647, %v5736_v58 }
 0x23f   : > { %v1569_v60 = vsub.f32 1.5, %v1568_v25  ;;  %4230 = vmatmul.msk.f32.vlgmr.msra.gmra.mxu2 %vm243_vm0, %v2022_v47  ;;  %v1195_v23 = vsel %vm243_vm0, %v5873_v20, 0.0 }
 0x240   : > { %v5850_v14 = vpop.eup %4479  ;;  %v5852_v10 = vadd.f32 1e-05, %v1431_v41  ;;  %v5855_v5 = vsub.f32 %v5496_v53, %v1245_v51  ;;  %v1878_v19 = vadd.f32 %v5437_v43, %v1845_v22  ;;  %v959_v53 = vmul.f32 %v5786_v11, %v958_v52 }
 0x241   : > { %v5860_v55 = vpop.eup %4481  ;;  %v1570_v9 = vmul.f32 %v5793_v61, %v1569_v60  ;;  %v1576_v30 = vmul.f32 %v5850_v14, %v5803_v26  ;;  %vm1582_vm11 = vweird.f32 %v5850_v14  ;;  %v968_v41 = vor.u32 1.1754944e-38, %v967_v6 }
 0x242   : > { %4485 = vrsqrt.f32 %v5852_v10  ;;  %4196 = vmatmul.msk.f32.gmra.mxu1 %vm243_vm0, %v1878_v19  ;;  %v1309_v8 = vmul.f32 %v5855_v5, %v5855_v5  ;;  %v972_v32 = vmul.f32 %v5860_v55, %v5791_v56  ;;  %v960_v28 = vadd.f32 %v5786_v11, %v959_v53  ;;  %v5890_v47 = vpop.eup %4483  ;;  %vm1583_vm14 = vmor %vm1581_vm13, %vm1582_vm11 }
 0x243   : > { %v1574_v3 = vsel %vm1573_vm8, %v5793_v61, %v1570_v9  ;;  %v1577_v50 = vmul.f32 %v5850_v14, %v1576_v30  ;;  %vm966_vm15 = vcmp.eq.f32.partialorder %v965_v35, 8.507059e+37  ;;  %v5929_v53 = vmul.f32 %v5399_v1, %v1085_v27 }
 0x244   : > { %v2024_v12 = vpop.f32.mrf.mxu1  ;;  %v1373_v36 = vsel %vm243_vm0, %v1309_v8, 0.0  ;;  %v1813_v34 = vmul.f32 %v1574_v3, %v5394_v4  ;;  %v973_v51 = vsub.f32 1.0, %v972_v32  ;;  %vm977_vm2 = vweird.f32 %v5860_v55 }
 0x245   : > { %v1578_v33 = vmul.f32 0.5, %v1577_v50  ;;  %v2025_v61 = vadd.f32 %v5817_v45, %v2024_v12  ;;  %1193 = vadd.xlane.f32.xlu0 %v1192_v13  ;;  %v1179_v31 = vpop.xlane.xlu2 %1178  ;;  %1374 = vadd.xlane.f32.xlu2 %v1373_v36  ;;  %v1360_v44 = vpop.xlane.xlu1 %1359  ;;  %v964_v13 = vsel %vm5897_vm12, %v5786_v11, %v960_v28  ;;  %v982_v36 = vand.u32 2147483648, %v5791_v56  ;;  %vm5955_vm5 = vmor %vm976_vm1, %vm977_vm2 }
 0x246   : > { %v1246_v24 = vmul.f32 %v5015_v18, %v1179_v31  ;;  %v1846_v25 = vmul.f32 %v5417_v42, %v1813_v34  ;;  %v1432_v57 = vmul.f32 %v1360_v44, %v5015_v18  ;;  %v974_v11 = vmul.f32 %v5860_v55, %v973_v51 }
 0x247   : > { %v1579_v4 = vsub.f32 1.5, %v1578_v33  ;;  %4231 = vmatmul.msk.f32.gmra.mxu2 %vm243_vm0, %v2025_v61  ;;  %v969_v6 = vsel %vm966_vm15, %v968_v41, %v964_v13  ;;  %vm1591_vm4 = vweird.f32 %v5852_v10  ;;  %v983_v41 = vor.u32 1.1754944e-38, %v982_v36 }
 0x248   : > { %v5905_v52 = vpop.eup %4485  ;;  %v5908_v22 = vsub.f32 %v5522_v48, %v1246_v24  ;;  %v1879_v58 = vadd.f32 %v5437_v43, %v1846_v25  ;;  %v5915_v19 = vadd.f32 1e-05, %v1432_v57  ;;  %v987_v48 = vmul.f32 %v5890_v47, %v5841_v38 }
 0x249   : > { %v1580_v7 = vmul.f32 %v5850_v14, %v1579_v4  ;;  %v1586_v60 = vmul.f32 %v5905_v52, %v5852_v10  ;;  %vm1592_vm3 = vweird.f32 %v5905_v52  ;;  %v1086_v35 = vmul.f32 %v969_v6, %v5675_v62 }
 0x24a   : > { %4197 = vmatmul.msk.f32.gmra.mxu1 %vm243_vm0, %v1879_v58  ;;  %v1310_v9 = vmul.f32 %v5908_v22, %v5908_v22  ;;  %4487 = vrsqrt.f32 %v5915_v19  ;;  %v988_v34 = vsub.f32 1.0, %v987_v48  ;;  %v975_v44 = vadd.f32 %v5860_v55, %v974_v11  ;;  %vm1593_vm6 = vmor %vm1591_vm4, %vm1592_vm3 }
 0x24b   : > { %v1584_v26 = vsel %vm1583_vm14, %v5850_v14, %v1580_v7  ;;  %v1587_v30 = vmul.f32 %v5905_v52, %v1586_v60  ;;  %v980_v14 = vand.u32 2147483647, %v5791_v56  ;;  %v1198_v56 = vsel %vm243_vm0, %v5929_v53, 0.0 }
 0x24c   : > { %v2027_v8 = vpop.f32.mrf.mxu1  ;;  %v1376_v3 = vsel %vm243_vm0, %v1310_v9, 0.0  ;;  %v1814_v50 = vmul.f32 %v1584_v26, %v5453_v2  ;;  %v979_v7 = vsel %vm5955_vm5, %v5860_v55, %v975_v44  ;;  %v5984_v9 = vmul.f32 %v5399_v1, %v1086_v35 }
 0x24d   : > { %v1588_v32 = vmul.f32 0.5, %v1587_v30  ;;  %v2028_v12 = vadd.f32 %v5817_v45, %v2027_v8  ;;  %1377 = vadd.xlane.f32.xlu1 %v1376_v3  ;;  %1196 = vadd.xlane.f32.xlu2 %v1195_v23  ;;  %v1182_v27 = vpop.xlane.xlu1 %1181  ;;  %v1363_v33 = vpop.xlane.xlu0 %1362  ;;  %vm5964_vm7 = vcmp.eq.f32.partialorder %v980_v14, 8.507059e+37  ;;  %vm991_vm8 = vweird.f32 %v5841_v38 }
 0x24e   : > { %v1847_v61 = vmul.f32 %v5417_v42, %v1814_v50  ;;  %v1247_v2 = vmul.f32 %v5015_v18, %v1182_v27  ;;  %v1433_v28 = vmul.f32 %v1363_v33, %v5015_v18  ;;  %vm992_vm9 = vweird.f32 %v5890_v47 }
 0x24f   : > { %v1589_v31 = vsub.f32 1.5, %v1588_v32  ;;  %4232 = vmatmul.msk.f32.gmra.mxu2 %vm243_vm0, %v2028_v12  ;;  %v984_v3 = vsel %vm5964_vm7, %v983_v41, %v979_v7  ;;  %v997_v6 = vand.u32 2147483648, %v5841_v38  ;;  %vm6007_vm11 = vmor %vm991_vm8, %vm992_vm9  ;;  %vm1601_vm12 = vweird.f32 %v5915_v19  ;;  %v6054_v7 = vld [vmem:[%s8419_s3 + $0x3] ss:$0 sm:$0xff] }
 0x250   : > { %v1880_v24 = vadd.f32 %v5437_v43, %v1847_v61  ;;  %v5947_v25 = vpop.eup %4487  ;;  %v5960_v62 = vsub.f32 %v5573_v59, %v1247_v2  ;;  %v5962_v57 = vadd.f32 1e-05, %v1433_v28  ;;  %v989_v59 = vmul.f32 %v5890_v47, %v988_v34 }
 0x251   : > { %v1590_v4 = vmul.f32 %v5905_v52, %v1589_v31  ;;  %v1596_v10 = vmul.f32 %v5947_v25, %v5915_v19  ;;  %vm1602_vm10 = vweird.f32 %v5947_v25  ;;  %v1201_v31 = vsel %vm243_vm0, %v5984_v9, 0.0 }
 0x252   : > { %4198 = vmatmul.msk.f32.gmra.mxu1 %vm243_vm0, %v1880_v24  ;;  %4489 = vrsqrt.f32 %v5962_v57  ;;  %v1311_v58 = vmul.f32 %v5960_v62, %v5960_v62  ;;  %v990_v50 = vadd.f32 %v5890_v47, %v989_v59  ;;  %vm1603_vm13 = vmor %vm1601_vm12, %vm1602_vm10  ;;  %vm1611_vm1 = vweird.f32 %v5962_v57 }
 0x253   : > { %v1594_v51 = vsel %vm1593_vm6, %v5905_v52, %v1590_v4  ;;  %v1597_v60 = vmul.f32 %v5947_v25, %v1596_v10  ;;  %v995_v52 = vand.u32 2147483647, %v5841_v38  ;;  %v998_v38 = vor.u32 1.1754944e-38, %v997_v6  ;;  %v6041_v10 = vld [vmem:[%s8419_s3 + $0x1] ss:$0 sm:$0xff] }
 0x254   : > { %v2030_v13 = vpop.f32.mrf.mxu1  ;;  %v1815_v48 = vmul.f32 %v1594_v51, %v5499_v29  ;;  %v1379_v30 = vsel %vm243_vm0, %v1311_v58, 0.0  ;;  %v994_v19 = vsel %vm6007_vm11, %v5890_v47, %v990_v50  ;;  %v6035_v47 = vld [vmem:[%s8419_s3 + $0x2] ss:$0 sm:$0xff] }
 0x255   : > { %v2031_v26 = vadd.f32 %v5817_v45, %v2030_v13  ;;  %1199 = vadd.xlane.f32.xlu1 %v1198_v56  ;;  %v1366_v11 = vpop.xlane.xlu2 %1365  ;;  %v1598_v8 = vmul.f32 0.5, %v1597_v60  ;;  %1380 = vadd.xlane.f32.xlu0 %v1379_v30  ;;  %v1185_v29 = vpop.xlane.xlu0 %1184  ;;  %vm996_vm14 = vcmp.eq.f32.partialorder %v995_v52, 8.507059e+37 }
 0x256   : > { %v1434_v55 = vmul.f32 %v1366_v11, %v5015_v18  ;;  %v1848_v1 = vmul.f32 %v5417_v42, %v1815_v48  ;;  %v1248_v32 = vmul.f32 %v5015_v18, %v1185_v29 }
 0x257   : > { %4233 = vmatmul.msk.f32.gmra.mxu2 %vm243_vm0, %v2031_v26  ;;  %v1599_v14 = vsub.f32 1.5, %v1598_v8 }
 0x258   : > { %v6000_v12 = vadd.f32 1e-05, %v1434_v55  ;;  %v1881_v36 = vadd.f32 %v5437_v43, %v1848_v1  ;;  %v4490_v34 = vpop.eup %4489  ;;  %v6012_v27 = vsub.f32 %v5614_v0, %v1248_v32  ;;  %v1087_v43 = vmul.f32 %v984_v3, %v5696_v49 }
 0x259   : > { %v1600_v33 = vmul.f32 %v5947_v25, %v1599_v14  ;;  %v1606_v61 = vmul.f32 %v4490_v34, %v5962_v57  ;;  %vm1612_vm15 = vweird.f32 %v4490_v34 }
 0x25a   : > { %4491 = vrsqrt.f32 %v6000_v12  ;;  %4199 = vmatmul.msk.f32.gmra.mxu1 %vm243_vm0, %v1881_v36  ;;  %v1312_v0 = vmul.f32 %v6012_v27, %v6012_v27  ;;  %vm1613_vm2 = vmor %vm1611_vm1, %vm1612_vm15  ;;  %vm1621_vm4 = vweird.f32 %v6000_v12 }
 0x25b   : > { %v1604_v2 = vsel %vm1603_vm13, %v5947_v25, %v1600_v33  ;;  %v1607_v28 = vmul.f32 %v4490_v34, %v1606_v61  ;;  %v999_v25 = vsel %vm996_vm14, %v998_v38, %v994_v19  ;;  %v441_v33 = vpop.f32.mrf.mxu0  ;;  %v4742_v61 = vld [vmem:[%s8419_s3] ss:$0 sm:$0xff] }
 0x25c   : > { %v2033_v35 = vpop.f32.mrf.mxu1  ;;  %v1382_v49 = vsel %vm243_vm0, %v1312_v0, 0.0  ;;  %v1816_v24 = vmul.f32 %v1604_v2, %v5547_v37  ;;  %v6044_v37 = vmul.f32 %v6041_v10, %v1087_v43  ;;  %v1088_v13 = vmul.f32 %v999_v25, %v5731_v63 }
 0x25d   : > { %v1188_v44 = vpop.xlane.xlu2 %1187  ;;  %v1608_v4 = vmul.f32 0.5, %v1607_v28  ;;  %v2034_v21 = vadd.f32 %v5817_v45, %v2033_v35  ;;  %1202 = vadd.xlane.f32.xlu0 %v1201_v31  ;;  %1383 = vadd.xlane.f32.xlu2 %v1382_v49  ;;  %v6086_v43 = vadd.f32 %v4742_v61, %v441_v33 }
 0x25e   : > { %v1249_v23 = vmul.f32 %v5015_v18, %v1188_v44  ;;  %v1849_v41 = vmul.f32 %v6035_v47, %v1816_v24  ;;  %v1204_v26 = vsel %vm243_vm0, %v6044_v37, 0.0  ;;  %v6068_v29 = vmul.f32 %v6041_v10, %v1088_v13 }
 0x25f   : > { %v1609_v51 = vsub.f32 1.5, %v1608_v4  ;;  %4234 = vmatmul.msk.f32.gmra.mxu2 %vm243_vm0, %v2034_v21  ;;  %v4185_v38 = vmul.f32 -1.442695, %v6086_v43 }
 0x260   : > { %v4492_v56 = vpop.eup %4491  ;;  %v6047_v59 = vsub.f32 %v5632_v54, %v1249_v23  ;;  %v1882_v60 = vadd.f32 %v6054_v7, %v1849_v41 }
 0x261   : > { %v1616_v58 = vmul.f32 %v4492_v56, %v6000_v12  ;;  %v1610_v48 = vmul.f32 %v4490_v34, %v1609_v51  ;;  %vm1622_vm3 = vweird.f32 %v4492_v56  ;;  %4493 = vpow2.f32 %v4185_v38 }
 0x262   : > { %v1313_v54 = vmul.f32 %v6047_v59, %v6047_v59  ;;  %4200 = vmatmul.msk.f32.gmra.mxu1 %vm243_vm0, %v1882_v60  ;;  %vm1623_vm5 = vmor %vm1621_vm4, %vm1622_vm3 }
 0x263   : > { %v1617_v52 = vmul.f32 %v4492_v56, %v1616_v58  ;;  %v1614_v30 = vsel %vm1613_vm2, %v4490_v34, %v1610_v48 }
 0x264   : > { %v1385_v11 = vsel %vm243_vm0, %v1313_v54, 0.0  ;;  %v2036_v55 = vpop.f32.mrf.mxu1  ;;  %v1817_v63 = vmul.f32 %v1614_v30, %v5592_v17  ;;  %v1207_v17 = vsel %vm243_vm0, %v6068_v29, 0.0 }
 0x265   : > { %v1618_v8 = vmul.f32 0.5, %v1617_v52  ;;  %1386 = vadd.xlane.f32.xlu1 %v1385_v11  ;;  %v2037_v57 = vadd.f32 %v5817_v45, %v2036_v55  ;;  %1205 = vadd.xlane.f32.xlu2 %v1204_v26 }
 0x266   : > { %v1850_v3 = vmul.f32 %v6035_v47, %v1817_v63 }
 0x267   : > { %v1619_v1 = vsub.f32 1.5, %v1618_v8  ;;  %4235 = vmatmul.msk.f32.gmra.mxu2 %vm243_vm0, %v2037_v57  ;;  %v4494_v19 = vpop.eup %4493 }
 0x268   : > { %v1883_v6 = vadd.f32 %v6054_v7, %v1850_v3  ;;  %v577_v35 = vadd.f32 1.0, %v4494_v19 }
 0x269   : > { %v1620_v50 = vmul.f32 %v4492_v56, %v1619_v1 }
 0x26a   : > { %4201 = vmatmul.msk.f32.gmra.mxu1 %vm243_vm0, %v1883_v6  ;;  %vm1006_vm6 = vweird.f32 %v577_v35  ;;  %v1010_v63 = vand.u32 2147483647, %v577_v35  ;;  %v1012_v57 = vand.u32 2147483648, %v577_v35 }
 0x26b   : > { %v1624_v32 = vsel %vm1623_vm5, %v4492_v56, %v1620_v50 }
 0x26c   : > { %v1818_v14 = vmul.f32 %v1624_v32, %v5617_v40  ;;  %v2039_v36 = vpop.f32.mrf.mxu1  ;;  %v444_v40 = vpop.f32.mrf.mxu0  ;;  %vm6120_vm9 = vcmp.eq.f32.partialorder %v1010_v63, 8.507059e+37  ;;  %v1013_v32 = vor.u32 1.1754944e-38, %v1012_v57 }
 0x26d   : > { %1208 = vadd.xlane.f32.xlu1 %v1207_v17  ;;  %v2040_v34 = vadd.f32 %v5817_v45, %v2039_v36  ;;  %v6089_v31 = vadd.f32 %v4742_v61, %v444_v40 }
 0x26e   : > { %v1851_v42 = vmul.f32 %v6035_v47, %v1818_v14 }
 0x26f   : > { %4236 = vmatmul.msk.f32.gmra.mxu2 %vm243_vm0, %v2040_v34  ;;  %v4186_v0 = vmul.f32 -1.442695, %v6089_v31 }
 0x270   : > { %v1884_v12 = vadd.f32 %v6054_v7, %v1851_v42 }
 0x271   : > { %4495 = vpow2.f32 %v4186_v0 }
 0x272   : > { %4202 = vmatmul.msk.f32.gmra.mxu1 %vm243_vm0, %v1884_v12  ;;  %4497 = vrcp.f32 %v577_v35 }
 0x274   : > { %v447_v2 = vpop.f32.mrf.mxu0 }
 0x275   : > { %v6092_v28 = vadd.f32 %v4742_v61, %v447_v2 }
 0x277   : > { %v4187_v44 = vmul.f32 -1.442695, %v6092_v28  ;;  %v4496_v49 = vpop.eup %4495 }
 0x278   : > { %v578_v4 = vadd.f32 1.0, %v4496_v49  ;;  %v4498_v23 = vpop.eup %4497 }
 0x279   : > { %4499 = vpow2.f32 %v4187_v44  ;;  %v1002_v56 = vmul.f32 %v4498_v23, %v577_v35  ;;  %vm1007_vm7 = vweird.f32 %v4498_v23 }
 0x27a   : > { %4501 = vrcp.f32 %v578_v4  ;;  %vm6112_vm8 = vmor %vm1006_vm6, %vm1007_vm7  ;;  %vm1021_vm10 = vweird.f32 %v578_v4  ;;  %v1025_v33 = vand.u32 2147483647, %v578_v4 }
 0x27b   : > { %v1003_v60 = vsub.f32 1.0, %v1002_v56 }
 0x27c   : > { %v450_v24 = vpop.f32.mrf.mxu0  ;;  %vm6148_vm13 = vcmp.eq.f32.partialorder %v1025_v33, 8.507059e+37 }
 0x27d   : > { %v6095_v21 = vadd.f32 %v4742_v61, %v450_v24  ;;  %v1004_v52 = vmul.f32 %v4498_v23, %v1003_v60  ;;  %v1027_v61 = vand.u32 2147483648, %v578_v4 }
 0x27f   : > { %v4188_v25 = vmul.f32 -1.442695, %v6095_v21  ;;  %v4500_v41 = vpop.eup %4499  ;;  %v1005_v1 = vadd.f32 %v4498_v23, %v1004_v52 }
 0x280   : > { %v6098_v51 = vadd.f32 1.0, %v4500_v41  ;;  %v6100_v58 = vpop.eup %4501 }
 0x281   : > { %4503 = vpow2.f32 %v4188_v25  ;;  %v1017_v13 = vmul.f32 %v6100_v58, %v578_v4  ;;  %v1009_v34 = vsel %vm6112_vm8, %v4498_v23, %v1005_v1  ;;  %vm1022_vm11 = vweird.f32 %v6100_v58 }
 0x282   : > { %4505 = vrcp.f32 %v6098_v51  ;;  %v1014_v35 = vsel %vm6120_vm9, %v1013_v32, %v1009_v34  ;;  %vm6138_vm12 = vmor %vm1021_vm10, %vm1022_vm11  ;;  %v1028_v25 = vor.u32 1.1754944e-38, %v1027_v61  ;;  %vm1036_vm14 = vweird.f32 %v6098_v51 }
 0x283   : > { %v1018_v30 = vsub.f32 1.0, %v1017_v13  ;;  %v1089_v4 = vmul.f32 %v1014_v35, %v6086_v43  ;;  %v1042_v43 = vand.u32 2147483648, %v6098_v51 }
 0x285   : > { %v1019_v50 = vmul.f32 %v6100_v58, %v1018_v30  ;;  %v6177_v32 = vmul.f32 %v6041_v10, %v1089_v4 }
 0x287   : > { %v4504_v48 = vpop.eup %4503  ;;  %v1020_v38 = vadd.f32 %v6100_v58, %v1019_v50  ;;  %v1210_v35 = vsel %vm243_vm0, %v6177_v32, 0.0 }
 0x288   : > { %v6105_v11 = vadd.f32 1.0, %v4504_v48  ;;  %v6109_v55 = vpop.eup %4505  ;;  %v1040_v48 = vand.u32 2147483647, %v6098_v51 }
 0x289   : > { %v1032_v6 = vmul.f32 %v6109_v55, %v6098_v51  ;;  %v1024_v56 = vsel %vm6138_vm12, %v6100_v58, %v1020_v38  ;;  %vm1037_vm15 = vweird.f32 %v6109_v55 }
 0x28a   : > { %v1029_v57 = vsel %vm6148_vm13, %v1028_v25, %v1024_v56  ;;  %vm6181_vm2 = vmor %vm1036_vm14, %vm1037_vm15  ;;  %vm6188_vm4 = vcmp.eq.f32.partialorder %v1040_v48, 8.507059e+37  ;;  %vm1051_vm6 = vweird.f32 %v6105_v11 }
 0x28b   : > { %v1033_v0 = vsub.f32 1.0, %v1032_v6  ;;  %v1090_v33 = vmul.f32 %v1029_v57, %v6089_v31  ;;  %v1055_v31 = vand.u32 2147483647, %v6105_v11 }
 0x28d   : > { %v1034_v60 = vmul.f32 %v6109_v55, %v1033_v0  ;;  %vm1056_vm12 = vcmp.eq.f32.partialorder %v1055_v31, 8.507059e+37 }
 0x28f   : > { %v1035_v50 = vadd.f32 %v6109_v55, %v1034_v60  ;;  %v1057_v60 = vand.u32 2147483648, %v6105_v11 }
 0x291   : > { %v1039_v38 = vsel %vm6181_vm2, %v6109_v55, %v1035_v50 }
 0x2a8   : > { %v1369_v54 = vpop.xlane.xlu1 %1368 }
 0x2a9   : > { %v1435_v26 = vmul.f32 %v1369_v54, %v5015_v18 }
 0x2ab   : > { %v6107_v8 = vadd.f32 1e-05, %v1435_v26 }
 0x2ad   : > { %4507 = vrsqrt.f32 %v6107_v8  ;;  %vm1631_vm3 = vweird.f32 %v6107_v8 }
 0x2ae   : > { %4509 = vrcp.f32 %v6105_v11 }
 0x2b0   : > { %v1191_v14 = vpop.xlane.xlu1 %1190  ;;  %v1372_v36 = vpop.xlane.xlu0 %1371 }
 0x2b1   : > { %v1250_v42 = vmul.f32 %v5015_v18, %v1191_v14  ;;  %v1436_v12 = vmul.f32 %v1372_v36, %v5015_v18 }
 0x2b3   : > { %v4508_v40 = vpop.eup %4507  ;;  %v6131_v2 = vsub.f32 %v5789_v15, %v1250_v42  ;;  %v6133_v19 = vadd.f32 1e-05, %v1436_v12 }
 0x2b4   : > { %v1626_v49 = vmul.f32 %v4508_v40, %v6107_v8  ;;  %v6143_v24 = vpop.eup %4509  ;;  %vm1632_vm1 = vweird.f32 %v4508_v40 }
 0x2b5   : > { %4511 = vrsqrt.f32 %v6133_v19  ;;  %v1314_v15 = vmul.f32 %v6131_v2, %v6131_v2  ;;  %v1047_v54 = vmul.f32 %v6143_v24, %v6105_v11  ;;  %vm1633_vm5 = vmor %vm1631_vm3, %vm1632_vm1  ;;  %vm1052_vm7 = vweird.f32 %v6143_v24 }
 0x2b6   : > { %v1627_v41 = vmul.f32 %v4508_v40, %v1626_v49  ;;  %vm6231_vm9 = vmor %vm1051_vm6, %vm1052_vm7  ;;  %vm1641_vm10 = vweird.f32 %v6133_v19 }
 0x2b7   : > { %v1388_v13 = vsel %vm243_vm0, %v1314_v15, 0.0  ;;  %v1048_v36 = vsub.f32 1.0, %v1047_v54 }
 0x2b8   : > { %v1628_v52 = vmul.f32 0.5, %v1627_v41  ;;  %1389 = vadd.xlane.f32.xlu0 %v1388_v13  ;;  %v1375_v26 = vpop.xlane.xlu2 %1374  ;;  %v1194_v30 = vpop.xlane.xlu0 %1193 }
 0x2b9   : > { %v1437_v58 = vmul.f32 %v1375_v26, %v5015_v18  ;;  %v1251_v63 = vmul.f32 %v5015_v18, %v1194_v30  ;;  %v1049_v15 = vmul.f32 %v6143_v24, %v1048_v36  ;;  %v6224_v30 = vmul.f32 %v6041_v10, %v1090_v33 }
 0x2ba   : > { %v1629_v1 = vsub.f32 1.5, %v1628_v52 }
 0x2bb   : > { %v6168_v3 = vpop.eup %4511  ;;  %v6171_v6 = vadd.f32 1e-05, %v1437_v58  ;;  %v6174_v17 = vsub.f32 %v5837_v16, %v1251_v63  ;;  %v1043_v16 = vor.u32 1.1754944e-38, %v1042_v43  ;;  %v1050_v43 = vadd.f32 %v6143_v24, %v1049_v15 }
 0x2bc   : > { %v1630_v34 = vmul.f32 %v4508_v40, %v1629_v1  ;;  %v1636_v42 = vmul.f32 %v6168_v3, %v6133_v19  ;;  %vm1642_vm8 = vweird.f32 %v6168_v3  ;;  %v1058_v1 = vor.u32 1.1754944e-38, %v1057_v60 }
 0x2bd   : > { %4513 = vrsqrt.f32 %v6171_v6  ;;  %v1315_v51 = vmul.f32 %v6174_v17, %v6174_v17  ;;  %vm1643_vm11 = vmor %vm1641_vm10, %vm1642_vm8  ;;  %v1213_v19 = vsel %vm243_vm0, %v6224_v30, 0.0  ;;  %v1054_v12 = vsel %vm6231_vm9, %v6143_v24, %v1050_v43 }
 0x2be   : > { %v1634_v61 = vsel %vm1633_vm5, %v4508_v40, %v1630_v34  ;;  %v1637_v8 = vmul.f32 %v6168_v3, %v1636_v42  ;;  %v1059_v24 = vsel %vm1056_vm12, %v1058_v1, %v1054_v12  ;;  %vm1651_vm14 = vweird.f32 %v6171_v6 }
 0x2bf   : > { %v2042_v0 = vpop.f32.mrf.mxu1  ;;  %v1391_v44 = vsel %vm243_vm0, %v1315_v51, 0.0  ;;  %v1819_v49 = vmul.f32 %v1634_v61, %v5750_v46  ;;  %v1044_v46 = vsel %vm6188_vm4, %v1043_v16, %v1039_v38 }
 0x2c0   : > { %v1638_v23 = vmul.f32 0.5, %v1637_v8  ;;  %v2043_v40 = vadd.f32 %v5817_v45, %v2042_v0  ;;  %1211 = vadd.xlane.f32.xlu0 %v1210_v35  ;;  %v1378_v25 = vpop.xlane.xlu1 %1377  ;;  %v1197_v41 = vpop.xlane.xlu2 %1196  ;;  %1392 = vadd.xlane.f32.xlu2 %v1391_v44  ;;  %v1091_v14 = vmul.f32 %v1044_v46, %v6092_v28 }
 0x2c1   : > { %v1438_v55 = vmul.f32 %v1378_v25, %v5015_v18  ;;  %v1252_v4 = vmul.f32 %v5015_v18, %v1197_v41  ;;  %v1852_v56 = vmul.f32 %v6035_v47, %v1819_v49  ;;  %v1092_v25 = vmul.f32 %v1059_v24, %v6095_v21 }
 0x2c2   : > { %v1639_v13 = vsub.f32 1.5, %v1638_v23  ;;  %4237 = vmatmul.msk.f32.gmra.mxu2 %vm243_vm0, %v2043_v40  ;;  %v6263_v44 = vmul.f32 %v6041_v10, %v1091_v14 }
 0x2c3   : > { %v4514_v48 = vpop.eup %4513  ;;  %v6217_v54 = vadd.f32 1e-05, %v1438_v55  ;;  %v6220_v52 = vsub.f32 %v5873_v20, %v1252_v4  ;;  %v1885_v26 = vadd.f32 %v6054_v7, %v1852_v56 }
 0x2c4   : > { %v1640_v63 = vmul.f32 %v6168_v3, %v1639_v13  ;;  %v1646_v20 = vmul.f32 %v4514_v48, %v6171_v6  ;;  %vm1652_vm13 = vweird.f32 %v4514_v48  ;;  %v1216_v55 = vsel %vm243_vm0, %v6263_v44, 0.0 }
 0x2c5   : > { %4515 = vrsqrt.f32 %v6217_v54  ;;  %4203 = vmatmul.msk.f32.gmra.mxu1 %vm243_vm0, %v1885_v26  ;;  %v1316_v57 = vmul.f32 %v6220_v52, %v6220_v52  ;;  %vm1653_vm15 = vmor %vm1651_vm14, %vm1652_vm13  ;;  %vm1661_vm2 = vweird.f32 %v6217_v54 }
 0x2c6   : > { %v1644_v11 = vsel %vm1643_vm11, %v6168_v3, %v1640_v63  ;;  %v1647_v50 = vmul.f32 %v4514_v48, %v1646_v20 }
 0x2c7   : > { %v2045_v36 = vpop.f32.mrf.mxu1  ;;  %v1394_v34 = vsel %vm243_vm0, %v1316_v57, 0.0  ;;  %v1820_v42 = vmul.f32 %v1644_v11, %v5801_v39 }
 0x2c8   : > { %v1648_v16 = vmul.f32 0.5, %v1647_v50  ;;  %v2046_v51 = vadd.f32 %v5817_v45, %v2045_v36  ;;  %v1200_v3 = vpop.xlane.xlu1 %1199  ;;  %1395 = vadd.xlane.f32.xlu1 %v1394_v34  ;;  %1214 = vadd.xlane.f32.xlu2 %v1213_v19  ;;  %v1381_v33 = vpop.xlane.xlu0 %1380 }
 0x2c9   : > { %v1253_v28 = vmul.f32 %v5015_v18, %v1200_v3  ;;  %v1853_v61 = vmul.f32 %v6035_v47, %v1820_v42  ;;  %v1439_v39 = vmul.f32 %v1381_v33, %v5015_v18 }
 0x2ca   : > { %v1649_v8 = vsub.f32 1.5, %v1648_v16  ;;  %4238 = vmatmul.msk.f32.gmra.mxu2 %vm243_vm0, %v2046_v51 }
 0x2cb   : > { %v6256_v38 = vpop.eup %4515  ;;  %v6259_v0 = vsub.f32 %v5929_v53, %v1253_v28  ;;  %v1886_v35 = vadd.f32 %v6054_v7, %v1853_v61  ;;  %v6268_v31 = vadd.f32 1e-05, %v1439_v39 }
 0x2cc   : > { %v1650_v49 = vmul.f32 %v4514_v48, %v1649_v8  ;;  %v1656_v15 = vmul.f32 %v6256_v38, %v6217_v54  ;;  %vm1662_vm1 = vweird.f32 %v6256_v38 }
 0x2cd   : > { %4204 = vmatmul.msk.f32.gmra.mxu1 %vm243_vm0, %v1886_v35  ;;  %v1317_v53 = vmul.f32 %v6259_v0, %v6259_v0  ;;  %4517 = vrsqrt.f32 %v6268_v31  ;;  %vm1663_vm3 = vmor %vm1661_vm2, %vm1662_vm1  ;;  %vm1671_vm5 = vweird.f32 %v6268_v31 }
 0x2ce   : > { %v1654_v23 = vsel %vm1653_vm15, %v4514_v48, %v1650_v49  ;;  %v1657_v40 = vmul.f32 %v6256_v38, %v1656_v15 }
 0x2cf   : > { %v2048_v41 = vpop.f32.mrf.mxu1  ;;  %v1397_v6 = vsel %vm243_vm0, %v1317_v53, 0.0  ;;  %v1821_v4 = vmul.f32 %v1654_v23, %v5855_v5  ;;  %v6287_v5 = vmul.f32 %v6041_v10, %v1092_v25 }
 0x2d0   : > { %v1658_v56 = vmul.f32 0.5, %v1657_v40  ;;  %1398 = vadd.xlane.f32.xlu0 %v1397_v6  ;;  %1217 = vadd.xlane.f32.xlu1 %v1216_v55  ;;  %v2049_v46 = vadd.f32 %v5817_v45, %v2048_v41  ;;  %v1384_v60 = vpop.xlane.xlu2 %1383  ;;  %v1203_v13 = vpop.xlane.xlu0 %1202 }
 0x2d1   : > { %v1854_v48 = vmul.f32 %v6035_v47, %v1821_v4  ;;  %v1440_v26 = vmul.f32 %v1384_v60, %v5015_v18  ;;  %v1254_v21 = vmul.f32 %v5015_v18, %v1203_v13  ;;  %v1219_v10 = vsel %vm243_vm0, %v6287_v5, 0.0  ;;  %v2242_v13 = vpop.f32.mrf.mxu2 }
 0x2d2   : > { %v1659_v43 = vsub.f32 1.5, %v1658_v56  ;;  %4239 = vmatmul.msk.f32.gmra.mxu2 %vm243_vm0, %v2049_v46 }
 0x2d3   : > { %v1887_v58 = vadd.f32 %v6054_v7, %v1854_v48  ;;  %v4518_v63 = vpop.eup %4517  ;;  %v1472_v20 = vadd.f32 1e-05, %v1440_v26  ;;  %v6292_v1 = vsub.f32 %v5984_v9, %v1254_v21 }
 0x2d4   : > { %v1666_v57 = vmul.f32 %v4518_v63, %v6268_v31  ;;  %v1660_v11 = vmul.f32 %v6256_v38, %v1659_v43  ;;  %vm1672_vm4 = vweird.f32 %v4518_v63 }
 0x2d5   : > { %4205 = vmatmul.msk.f32.gmra.mxu1 %vm243_vm0, %v1887_v58  ;;  %4519 = vrsqrt.f32 %v1472_v20  ;;  %v1318_v12 = vmul.f32 %v6292_v1, %v6292_v1  ;;  %vm6312_vm6 = vmor %vm1671_vm5, %vm1672_vm4  ;;  %vm1681_vm8 = vweird.f32 %v1472_v20 }
 0x2d6   : > { %v1667_v50 = vmul.f32 %v4518_v63, %v1666_v57  ;;  %v1664_v16 = vsel %vm1663_vm3, %v6256_v38, %v1660_v11 }
 0x2d7   : > { %v2051_v14 = vpop.f32.mrf.mxu1  ;;  %v1400_v54 = vsel %vm243_vm0, %v1318_v12, 0.0  ;;  %v1822_v8 = vmul.f32 %v1664_v16, %v5908_v22 }
 0x2d8   : > { %1220 = vadd.xlane.f32.xlu0 %v1219_v10  ;;  %v1387_v36 = vpop.xlane.xlu1 %1386  ;;  %v1668_v34 = vmul.f32 0.5, %v1667_v50  ;;  %v2052_v19 = vadd.f32 %v5817_v45, %v2051_v14  ;;  %v1206_v9 = vpop.xlane.xlu2 %1205  ;;  %1401 = vadd.xlane.f32.xlu2 %v1400_v54 }
 0x2d9   : > { %v1441_v42 = vmul.f32 %v1387_v36, %v5015_v18  ;;  %v1255_v33 = vmul.f32 %v5015_v18, %v1206_v9  ;;  %v1855_v23 = vmul.f32 %v6035_v47, %v1822_v8  ;;  %v2245_v36 = vpop.f32.mrf.mxu2 }
 0x2da   : > { %v1669_v51 = vsub.f32 1.5, %v1668_v34  ;;  %4240 = vmatmul.msk.f32.gmra.mxu2 %vm243_vm0, %v2052_v19 }
 0x2db   : > { %v1473_v3 = vadd.f32 1e-05, %v1441_v42  ;;  %v4520_v28 = vpop.eup %4519  ;;  %v6309_v35 = vsub.f32 %v6044_v37, %v1255_v33  ;;  %v1888_v6 = vadd.f32 %v6054_v7, %v1855_v23 }
 0x2dc   : > { %v1676_v61 = vmul.f32 %v4520_v28, %v1472_v20  ;;  %v1670_v39 = vmul.f32 %v4518_v63, %v1669_v51  ;;  %vm1682_vm7 = vweird.f32 %v4520_v28  ;;  %v6356_v51 = vld [vmem:[%s8419_s3 + $0x8] ss:$0 sm:$0xff] }
 0x2dd   : > { %4521 = vrsqrt.f32 %v1473_v3  ;;  %v1319_v31 = vmul.f32 %v6309_v35, %v6309_v35  ;;  %4206 = vmatmul.msk.f32.gmra.mxu1 %vm243_vm0, %v1888_v6  ;;  %vm1683_vm9 = vmor %vm1681_vm8, %vm1682_vm7  ;;  %vm1691_vm11 = vweird.f32 %v1473_v3 }
 0x2de   : > { %v1677_v24 = vmul.f32 %v4520_v28, %v1676_v61  ;;  %v1674_v22 = vsel %vm6312_vm6, %v4518_v63, %v1670_v39 }
 0x2df   : > { %v2054_v38 = vpop.f32.mrf.mxu1  ;;  %v1403_v46 = vsel %vm243_vm0, %v1319_v31, 0.0  ;;  %v1823_v60 = vmul.f32 %v1674_v22, %v5960_v62 }
 0x2e0   : > { %v1209_v49 = vpop.xlane.xlu1 %1208  ;;  %v1678_v53 = vmul.f32 0.5, %v1677_v24  ;;  %v2055_v40 = vadd.f32 %v5817_v45, %v2054_v38  ;;  %1404 = vadd.xlane.f32.xlu1 %v1403_v46 }
 0x2e1   : > { %v1256_v25 = vmul.f32 %v5015_v18, %v1209_v49  ;;  %v1856_v21 = vmul.f32 %v6035_v47, %v1823_v60  ;;  %v2248_v16 = vpop.f32.mrf.mxu2 }
 0x2e2   : > { %v1679_v41 = vsub.f32 1.5, %v1678_v53  ;;  %4241 = vmatmul.msk.f32.gmra.mxu2 %vm243_vm0, %v2055_v40  ;;  %v6368_v61 = vadd.f32 %v6356_v51, %v2248_v16 }
 0x2e3   : > { %v4522_v37 = vpop.eup %4521  ;;  %v6327_v56 = vsub.f32 %v6068_v29, %v1256_v25  ;;  %v1889_v63 = vadd.f32 %v6054_v7, %v1856_v21 }
 0x2e4   : > { %v1686_v55 = vmul.f32 %v4522_v37, %v1473_v3  ;;  %v1680_v4 = vmul.f32 %v4520_v28, %v1679_v41  ;;  %vm1692_vm10 = vweird.f32 %v4522_v37  ;;  %v6360_v3 = vadd.f32 %v6356_v51, %v2242_v13 }
 0x2e5   : > { %v1320_v29 = vmul.f32 %v6327_v56, %v6327_v56  ;;  %vm1693_vm12 = vmor %vm1691_vm11, %vm1692_vm10  ;;  %4207 = vmatmul.msk.f32.gmra.mxu1 %vm243_vm0, %v1889_v63  ;;  %v4264_v24 = vmul.f32 -1.442695, %v6368_v61 }
 0x2e6   : > { %v1687_v48 = vmul.f32 %v4522_v37, %v1686_v55  ;;  %v1684_v26 = vsel %vm1683_vm9, %v4520_v28, %v1680_v4  ;;  %v4262_v28 = vmul.f32 -1.442695, %v6360_v3 }
 0x2e7   : > { %v2057_v43 = vpop.f32.mrf.mxu1  ;;  %v1824_v57 = vmul.f32 %v1684_v26, %v6012_v27  ;;  %v1406_v62 = vsel %vm243_vm0, %v1320_v29, 0.0  ;;  %v6345_v27 = vld [vmem:[%s8419_s3 + $0x4] ss:$0 sm:$0xff] }
 0x2e8   : > { %v1688_v58 = vmul.f32 0.5, %v1687_v48  ;;  %v2058_v20 = vadd.f32 %v5817_v45, %v2057_v43  ;;  %1407 = vadd.xlane.f32.xlu2 %v1406_v62  ;;  %4523 = vpow2.f32 %v4262_v28 }
 0x2e9   : > { %v1857_v14 = vmul.f32 %v6035_v47, %v1824_v57  ;;  %v2251_v33 = vpop.f32.mrf.mxu2 }
 0x2ea   : > { %v1689_v11 = vsub.f32 1.5, %v1688_v58  ;;  %4242 = vmatmul.msk.f32.gmra.mxu2 %vm243_vm0, %v2058_v20  ;;  %v6372_v15 = vadd.f32 %v6356_v51, %v2251_v33 }
 0x2eb   : > { %v1890_v34 = vadd.f32 %v6054_v7, %v1857_v14 }
 0x2ec   : > { %v1690_v50 = vmul.f32 %v4522_v37, %v1689_v11  ;;  %v4265_v23 = vmul.f32 -1.442695, %v6372_v15 }
 0x2ed   : > { %4208 = vmatmul.msk.f32.gmra.mxu1 %vm243_vm0, %v1890_v34 }
 0x2ee   : > { %v1694_v45 = vsel %vm1693_vm12, %v4522_v37, %v1690_v50  ;;  %v4524_v8 = vpop.eup %4523 }
 0x2ef   : > { %v2060_v10 = vpop.f32.mrf.mxu1  ;;  %v1825_v42 = vmul.f32 %v1694_v45, %v6047_v59  ;;  %v6363_v59 = vadd.f32 %v6356_v51, %v2245_v36  ;;  %v2434_v49 = vadd.f32 1.0, %v4524_v8 }
 0x2f0   : > { %v2061_v19 = vadd.f32 %v6345_v27, %v2060_v10 }
 0x2f1   : > { %v1858_v9 = vmul.f32 %v6035_v47, %v1825_v42  ;;  %v4263_v54 = vmul.f32 -1.442695, %v6363_v59  ;;  %v2254_v39 = vpop.f32.mrf.mxu2  ;;  %v2477_v45 = vand.u32 2147483648, %v2434_v49  ;;  %vm2471_vm14 = vweird.f32 %v2434_v49 }
 0x2f2   : > { %4243 = vmatmul.msk.f32.gmra.mxu2 %vm243_vm0, %v2061_v19  ;;  %v6381_v41 = vadd.f32 %v6356_v51, %v2254_v39  ;;  %v2475_v34 = vand.u32 2147483647, %v2434_v49 }
 0x2f3   : > { %v1891_v12 = vadd.f32 %v6054_v7, %v1858_v9  ;;  %4525 = vpow2.f32 %v4263_v54  ;;  %v2478_v33 = vor.u32 1.1754944e-38, %v2477_v45 }
 0x2f4   : > { %4527 = vpow2.f32 %v4264_v24  ;;  %v4266_v4 = vmul.f32 -1.442695, %v6381_v41  ;;  %vm2476_vm2 = vcmp.eq.f32.partialorder %v2475_v34, 8.507059e+37 }
 0x2f5   : > { %4209 = vmatmul.msk.f32.gmra.mxu1 %vm243_vm0, %v1891_v12  ;;  %4529 = vrcp.f32 %v2434_v49 }
 0x2f9   : > { %v4526_v38 = vpop.eup %4525  ;;  %v2257_v40 = vpop.f32.mrf.mxu2 }
 0x2fa   : > { %v6374_v53 = vadd.f32 1.0, %v4526_v38  ;;  %v4528_v22 = vpop.eup %4527  ;;  %v6398_v63 = vadd.f32 %v6356_v51, %v2257_v40 }
 0x2fb   : > { %v4530_v25 = vpop.eup %4529  ;;  %v6378_v37 = vadd.f32 1.0, %v4528_v22 }
 0x2fc   : > { %4531 = vrcp.f32 %v6374_v53  ;;  %v2467_v31 = vmul.f32 %v4530_v25, %v2434_v49  ;;  %vm2472_vm13 = vweird.f32 %v4530_v25  ;;  %v4267_v50 = vmul.f32 -1.442695, %v6398_v63 }
 0x2fd   : > { %4533 = vpow2.f32 %v4265_v23  ;;  %vm6408_vm15 = vmor %vm2471_vm14, %vm2472_vm13  ;;  %v2492_v54 = vand.u32 2147483648, %v6374_v53  ;;  %vm2486_vm3 = vweird.f32 %v6374_v53  ;;  %v2490_v39 = vand.u32 2147483647, %v6374_v53 }
 0x2fe   : > { %4535 = vrcp.f32 %v6378_v37  ;;  %v2468_v46 = vsub.f32 1.0, %v2467_v31  ;;  %v2505_v40 = vand.u32 2147483647, %v6378_v37  ;;  %v2507_v22 = vand.u32 2147483648, %v6378_v37 }
 0x2ff   : > { %4537 = vpow2.f32 %v4266_v4  ;;  %vm2491_vm5 = vcmp.eq.f32.partialorder %v2490_v39, 8.507059e+37  ;;  %vm2501_vm6 = vweird.f32 %v6378_v37 }
 0x300   : > { %v2469_v43 = vmul.f32 %v4530_v25, %v2468_v46  ;;  %vm6455_vm8 = vcmp.eq.f32.partialorder %v2505_v40, 8.507059e+37 }
 0x301   : > { %v2260_v48 = vpop.f32.mrf.mxu2 }
 0x302   : > { %v6383_v6 = vpop.eup %4531  ;;  %v6392_v26 = vadd.f32 %v6356_v51, %v2260_v48  ;;  %v2470_v11 = vadd.f32 %v4530_v25, %v2469_v43 }
 0x303   : > { %v4534_v55 = vpop.eup %4533  ;;  %v2482_v60 = vmul.f32 %v6383_v6, %v6374_v53  ;;  %vm2487_vm1 = vweird.f32 %v6383_v6 }
 0x304   : > { %v6389_v13 = vadd.f32 1.0, %v4534_v55  ;;  %v6394_v21 = vpop.eup %4535  ;;  %v4268_v29 = vmul.f32 -1.442695, %v6392_v26  ;;  %v2474_v16 = vsel %vm6408_vm15, %v4530_v25, %v2470_v11  ;;  %vm6426_vm4 = vmor %vm2486_vm3, %vm2487_vm1  ;;  %v2493_v55 = vor.u32 1.1754944e-38, %v2492_v54  ;;  %v6453_v11 = vld [vmem:[%s8419_s3 + $0x9] ss:$0 sm:$0xff] }
 0x305   : > { %v2483_v58 = vsub.f32 1.0, %v2482_v60  ;;  %v2497_v20 = vmul.f32 %v6394_v21, %v6378_v37  ;;  %v4538_v57 = vpop.eup %4537  ;;  %v2479_v24 = vsel %vm2476_vm2, %v2478_v33, %v2474_v16  ;;  %vm2502_vm7 = vweird.f32 %v6394_v21 }
 0x306   : > { %4539 = vrcp.f32 %v6389_v13  ;;  %v6412_v9 = vadd.f32 1.0, %v4538_v57  ;;  %v2946_v43 = vmul.f32 %v2479_v24, %v6360_v3  ;;  %vm6476_vm9 = vmor %vm2501_vm6, %vm2502_vm7  ;;  %v2520_v16 = vand.u32 2147483647, %v6389_v13 }
 0x307   : > { %v2484_v62 = vmul.f32 %v6383_v6, %v2483_v58  ;;  %v2498_v42 = vsub.f32 1.0, %v2497_v20  ;;  %4541 = vpow2.f32 %v4268_v29  ;;  %vm2516_vm10 = vweird.f32 %v6389_v13 }
 0x308   : > { %4543 = vpow2.f32 %v4267_v50  ;;  %v6489_v37 = vmul.f32 %v6453_v11, %v2946_v43  ;;  %vm6499_vm12 = vcmp.eq.f32.partialorder %v2520_v16, 8.507059e+37  ;;  %vm2531_vm2 = vweird.f32 %v6412_v9 }
 0x309   : > { %v2485_v28 = vadd.f32 %v6383_v6, %v2484_v62  ;;  %v2499_v49 = vmul.f32 %v6394_v21, %v2498_v42  ;;  %v2508_v62 = vor.u32 1.1754944e-38, %v2507_v22 }
 0x30b   : > { %v2489_v23 = vsel %vm6426_vm4, %v6383_v6, %v2485_v28  ;;  %v2500_v20 = vadd.f32 %v6394_v21, %v2499_v49  ;;  %v2522_v28 = vand.u32 2147483648, %v6389_v13 }
 0x30c   : > { %v6406_v36 = vpop.eup %4539  ;;  %v2494_v58 = vsel %vm2491_vm5, %v2493_v55, %v2489_v23 }
 0x30d   : > { %v2512_v8 = vmul.f32 %v6406_v36, %v6389_v13  ;;  %v4542_v53 = vpop.eup %4541  ;;  %v2947_v19 = vmul.f32 %v2494_v58, %v6363_v59  ;;  %v2504_v54 = vsel %vm6476_vm9, %v6394_v21, %v2500_v20  ;;  %vm2517_vm11 = vweird.f32 %v6406_v36 }
 0x30e   : > { %v4544_v48 = vpop.eup %4543  ;;  %v6459_v50 = vadd.f32 1.0, %v4542_v53  ;;  %v2523_v22 = vor.u32 1.1754944e-38, %v2522_v28  ;;  %v2509_v53 = vsel %vm6455_vm8, %v2508_v62, %v2504_v54  ;;  %vm6520_vm14 = vmor %vm2516_vm10, %vm2517_vm11  ;;  %v3011_v20 = vsel %vm243_vm0, %v6489_v37, 0.0 }
 0x30f   : > { %v2513_v4 = vsub.f32 1.0, %v2512_v8 }
 0x310   : > { %vm2561_vm11 = vweird.f32 %v6459_v50 }
 0x32b   : > { %v1390_v14 = vpop.xlane.xlu0 %1389 }
 0x32c   : > { %v1442_v10 = vmul.f32 %v1390_v14, %v5015_v18 }
 0x32e   : > { %v6414_v12 = vadd.f32 1e-05, %v1442_v10  ;;  %v6466_v10 = vadd.f32 1.0, %v4544_v48 }
 0x330   : > { %4545 = vrsqrt.f32 %v6414_v12  ;;  %vm1701_vm15 = vweird.f32 %v6414_v12 }
 0x331   : > { %4547 = vrcp.f32 %v6412_v9 }
 0x333   : > { %v1393_v25 = vpop.xlane.xlu2 %1392  ;;  %v1212_v31 = vpop.xlane.xlu0 %1211 }
 0x334   : > { %v1443_v46 = vmul.f32 %v1393_v25, %v5015_v18  ;;  %v1257_v60 = vmul.f32 %v5015_v18, %v1212_v31 }
 0x336   : > { %v6442_v6 = vpop.eup %4545  ;;  %v6445_v29 = vadd.f32 1e-05, %v1443_v46  ;;  %v6448_v57 = vsub.f32 %v6177_v32, %v1257_v60  ;;  %v2514_v32 = vmul.f32 %v6406_v36, %v2513_v4  ;;  %v6514_v46 = vmul.f32 %v6453_v11, %v2947_v19 }
 0x337   : > { %v1696_v14 = vmul.f32 %v6442_v6, %v6414_v12  ;;  %v6463_v45 = vpop.eup %4547  ;;  %vm1702_vm13 = vweird.f32 %v6442_v6  ;;  %v2948_v12 = vmul.f32 %v2509_v53, %v6368_v61 }
 0x338   : > { %4549 = vrsqrt.f32 %v6445_v29  ;;  %v1321_v34 = vmul.f32 %v6448_v57, %v6448_v57  ;;  %v2527_v8 = vmul.f32 %v6463_v45, %v6412_v9  ;;  %v2515_v21 = vadd.f32 %v6406_v36, %v2514_v32  ;;  %vm1703_vm1 = vmor %vm1701_vm15, %vm1702_vm13 }
 0x339   : > { %v1697_v33 = vmul.f32 %v6442_v6, %v1696_v14  ;;  %4551 = vrcp.f32 %v6459_v50  ;;  %v2535_v32 = vand.u32 2147483647, %v6412_v9  ;;  %vm2532_vm3 = vweird.f32 %v6463_v45 }
 0x33a   : > { %v1409_v59 = vsel %vm243_vm0, %v1321_v34, 0.0  ;;  %4553 = vrcp.f32 %v6466_v10  ;;  %v2528_v48 = vsub.f32 1.0, %v2527_v8  ;;  %v2519_v58 = vsel %vm6520_vm14, %v6406_v36, %v2515_v21  ;;  %vm6592_vm8 = vmor %vm2531_vm2, %vm2532_vm3 }
 0x33b   : > { %v1698_v39 = vmul.f32 0.5, %v1697_v33  ;;  %v1396_v24 = vpop.xlane.xlu1 %1395  ;;  %v1215_v38 = vpop.xlane.xlu2 %1214  ;;  %1410 = vadd.xlane.f32.xlu0 %v1409_v59  ;;  %v2537_v34 = vand.u32 2147483648, %v6412_v9  ;;  %v2524_v61 = vsel %vm6499_vm12, %v2523_v22, %v2519_v58  ;;  %vm1711_vm5 = vweird.f32 %v6445_v29 }
 0x33c   : > { %v1444_v49 = vmul.f32 %v1396_v24, %v5015_v18  ;;  %v1258_v23 = vmul.f32 %v5015_v18, %v1215_v38  ;;  %v2529_v28 = vmul.f32 %v6463_v45, %v2528_v48  ;;  %vm6576_vm6 = vcmp.eq.f32.partialorder %v2535_v32, 8.507059e+37 }
 0x33d   : > { %v1699_v25 = vsub.f32 1.5, %v1698_v39  ;;  %v6602_v32 = vmul.f32 %v6453_v11, %v2948_v12  ;;  %v2538_v9 = vor.u32 1.1754944e-38, %v2537_v34  ;;  %v6614_v12 = vld [vmem:[%s8419_s3 + $0x2] ss:$0 sm:$0xff]  ;;  %vm2546_vm15 = vweird.f32 %v6466_v10 }
 0x33e   : > { %v6504_v31 = vpop.eup %4549  ;;  %v6508_v55 = vadd.f32 1e-05, %v1444_v49  ;;  %v6511_v4 = vsub.f32 %v6224_v30, %v1258_v23  ;;  %v2949_v23 = vmul.f32 %v2524_v61, %v6372_v15 }
 0x33f   : > { %v1700_v43 = vmul.f32 %v6442_v6, %v1699_v25  ;;  %v1706_v30 = vmul.f32 %v6504_v31, %v6445_v29  ;;  %v6536_v3 = vpop.eup %4551  ;;  %vm1712_vm4 = vweird.f32 %v6504_v31  ;;  %v2530_v25 = vadd.f32 %v6463_v45, %v2529_v28 }
 0x340   : > { %4555 = vrsqrt.f32 %v6508_v55  ;;  %v1322_v13 = vmul.f32 %v6511_v4, %v6511_v4  ;;  %v6542_v36 = vpop.eup %4553  ;;  %v2557_v8 = vmul.f32 %v6536_v3, %v6459_v50  ;;  %vm1713_vm7 = vmor %vm1711_vm5, %vm1712_vm4  ;;  %v2552_v28 = vand.u32 2147483648, %v6466_v10 }
 0x341   : > { %v1704_v62 = vsel %vm1703_vm1, %v6442_v6, %v1700_v43  ;;  %v1707_v14 = vmul.f32 %v6504_v31, %v1706_v30  ;;  %v2542_v38 = vmul.f32 %v6542_v36, %v6466_v10  ;;  %v3014_v30 = vsel %vm243_vm0, %v6514_v46, 0.0 }
 0x342   : > { %v2063_v19 = vpop.f32.mrf.mxu1  ;;  %v1412_v42 = vsel %vm243_vm0, %v1322_v13, 0.0  ;;  %v1826_v16 = vmul.f32 %v1704_v62, %v6131_v2  ;;  %v2558_v15 = vsub.f32 1.0, %v2557_v8  ;;  %vm2547_vm9 = vweird.f32 %v6542_v36  ;;  %v6629_v8 = vld [vmem:[%s8419_s3 + $0x3] ss:$0 sm:$0xff] }
 0x343   : > { %v1708_v33 = vmul.f32 0.5, %v1707_v14  ;;  %v2064_v6 = vadd.f32 %v6345_v27, %v2063_v19  ;;  %v1218_v54 = vpop.xlane.xlu1 %1217  ;;  %1413 = vadd.xlane.f32.xlu1 %v1412_v42  ;;  %v1399_v59 = vpop.xlane.xlu0 %1398  ;;  %v2534_v19 = vsel %vm6592_vm8, %v6463_v45, %v2530_v25  ;;  %vm1721_vm12 = vweird.f32 %v6508_v55  ;;  %vm6665_vm2 = vmor %vm2546_vm15, %vm2547_vm9 }
 0x344   : > { %v1259_v39 = vmul.f32 %v5015_v18, %v1218_v54  ;;  %v1445_v24 = vmul.f32 %v1399_v59, %v5015_v18  ;;  %v1859_v2 = vmul.f32 %v6035_v47, %v1826_v16  ;;  %v2539_v54 = vsel %vm6576_vm6, %v2538_v9, %v2534_v19 }
 0x345   : > { %v1709_v21 = vsub.f32 1.5, %v1708_v33  ;;  %4244 = vmatmul.msk.f32.gmra.mxu2 %vm243_vm0, %v2064_v6  ;;  %vm2562_vm13 = vweird.f32 %v6536_v3  ;;  %v2950_v48 = vmul.f32 %v2539_v54, %v6381_v41  ;;  %v2553_v58 = vor.u32 1.1754944e-38, %v2552_v28 }
 0x346   : > { %v6562_v49 = vpop.eup %4555  ;;  %v6566_v40 = vsub.f32 %v6263_v44, %v1259_v39  ;;  %v6568_v22 = vadd.f32 1e-05, %v1445_v24  ;;  %v1892_v47 = vadd.f32 %v6054_v7, %v1859_v2  ;;  %v2543_v44 = vsub.f32 1.0, %v2542_v38  ;;  %vm6659_vm1 = vmor %vm2561_vm11, %vm2562_vm13 }
 0x347   : > { %v1710_v53 = vmul.f32 %v6504_v31, %v1709_v21  ;;  %v1716_v60 = vmul.f32 %v6562_v49, %v6508_v55  ;;  %vm1722_vm10 = vweird.f32 %v6562_v49  ;;  %v2567_v21 = vand.u32 2147483648, %v6459_v50 }
 0x348   : > { %4557 = vrsqrt.f32 %v6568_v22  ;;  %4210 = vmatmul.msk.f32.gmra.mxu1 %vm243_vm0, %v1892_v47  ;;  %v1323_v7 = vmul.f32 %v6566_v40, %v6566_v40  ;;  %v2544_v34 = vmul.f32 %v6542_v36, %v2543_v44  ;;  %vm1723_vm14 = vmor %vm1721_vm12, %vm1722_vm10  ;;  %vm1731_vm6 = vweird.f32 %v6568_v22 }
 0x349   : > { %v1714_v43 = vsel %vm1713_vm7, %v6504_v31, %v1710_v53  ;;  %v1717_v29 = vmul.f32 %v6562_v49, %v1716_v60  ;;  %v6599_v31 = vmul.f32 %v6453_v11, %v2949_v23 }
 0x34a   : > { %v2066_v13 = vpop.f32.mrf.mxu1  ;;  %v1415_v62 = vsel %vm243_vm0, %v1323_v7, 0.0  ;;  %v1827_v14 = vmul.f32 %v1714_v43, %v6174_v17  ;;  %v2559_v17 = vmul.f32 %v6536_v3, %v2558_v15  ;;  %v2545_v25 = vadd.f32 %v6542_v36, %v2544_v34 }
 0x34b   : > { %v1718_v42 = vmul.f32 0.5, %v1717_v29  ;;  %v2067_v16 = vadd.f32 %v6345_v27, %v2066_v13  ;;  %3012 = vadd.xlane.f32.xlu1 %v3011_v20  ;;  %1416 = vadd.xlane.f32.xlu2 %v1415_v62  ;;  %v1221_v61 = vpop.xlane.xlu0 %1220  ;;  %v3020_v24 = vsel %vm243_vm0, %v6599_v31, 0.0  ;;  %v1402_v23 = vpop.xlane.xlu2 %1401  ;;  %v2565_v15 = vand.u32 2147483647, %v6459_v50 }
 0x34c   : > { %v1260_v33 = vmul.f32 %v5015_v18, %v1221_v61  ;;  %v1860_v45 = vmul.f32 %v6614_v12, %v1827_v14  ;;  %v1446_v60 = vmul.f32 %v1402_v23, %v5015_v18  ;;  %v2550_v29 = vand.u32 2147483647, %v6466_v10 }
 0x34d   : > { %v1719_v20 = vsub.f32 1.5, %v1718_v42  ;;  %4245 = vmatmul.msk.f32.gmra.mxu2 %vm243_vm0, %v2067_v16  ;;  %v2568_v14 = vor.u32 1.1754944e-38, %v2567_v21  ;;  %vm2566_vm4 = vcmp.eq.f32.partialorder %v2565_v15, 8.507059e+37 }
 0x34e   : > { %v4558_v6 = vpop.eup %4557  ;;  %v6624_v59 = vsub.f32 %v6287_v5, %v1260_v33  ;;  %v1893_v39 = vadd.f32 %v6629_v8, %v1860_v45  ;;  %v2560_v5 = vadd.f32 %v6536_v3, %v2559_v17  ;;  %v1478_v13 = vadd.f32 1e-05, %v1446_v60 }
 0x34f   : > { %v1720_v2 = vmul.f32 %v6562_v49, %v1719_v20  ;;  %v1726_v38 = vmul.f32 %v4558_v6, %v6568_v22  ;;  %vm1732_vm3 = vweird.f32 %v4558_v6  ;;  %vm2551_vm5 = vcmp.eq.f32.partialorder %v2550_v29, 8.507059e+37 }
 0x350   : > { %4211 = vmatmul.msk.f32.gmra.mxu1 %vm243_vm0, %v1893_v39  ;;  %v1324_v47 = vmul.f32 %v6624_v59, %v6624_v59  ;;  %v2564_v10 = vsel %vm6659_vm1, %v6536_v3, %v2560_v5  ;;  %4559 = vrsqrt.f32 %v1478_v13  ;;  %v6680_v3 = vmul.f32 %v6453_v11, %v2950_v48  ;;  %vm1733_vm7 = vmor %vm1731_vm6, %vm1732_vm3 }
 0x351   : > { %v1724_v55 = vsel %vm1723_vm14, %v6562_v49, %v1720_v2  ;;  %v1727_v53 = vmul.f32 %v4558_v6, %v1726_v38  ;;  %v2569_v42 = vsel %vm2566_vm4, %v2568_v14, %v2564_v10  ;;  %v3017_v20 = vsel %vm243_vm0, %v6602_v32, 0.0 }
 0x352   : > { %v2069_v7 = vpop.f32.mrf.mxu1  ;;  %v1418_v44 = vsel %vm243_vm0, %v1324_v47, 0.0  ;;  %v1828_v43 = vmul.f32 %v1724_v55, %v6220_v52  ;;  %v2952_v28 = vmul.f32 %v2569_v42, %v6392_v26  ;;  %v3023_v45 = vsel %vm243_vm0, %v6680_v3, 0.0 }
 0x353   : > { %v1728_v41 = vmul.f32 0.5, %v1727_v53  ;;  %3021 = vadd.xlane.f32.xlu1 %v3020_v24  ;;  %3015 = vadd.xlane.f32.xlu2 %v3014_v30  ;;  %v2070_v50 = vadd.f32 %v6345_v27, %v2069_v7  ;;  %v2549_v30 = vsel %vm6665_vm2, %v6542_v36, %v2545_v25  ;;  %v1405_v33 = vpop.xlane.xlu1 %1404  ;;  %vm1741_vm9 = vweird.f32 %v1478_v13 }
 0x354   : > { %1419 = vadd.xlane.f32.xlu0 %v1418_v44  ;;  %v1861_v62 = vmul.f32 %v6614_v12, %v1828_v43  ;;  %v2554_v61 = vsel %vm2551_vm5, %v2553_v58, %v2549_v30  ;;  %v1447_v54 = vmul.f32 %v1405_v33, %v5015_v18  ;;  %v6695_v24 = vmul.f32 %v6453_v11, %v2952_v28 }
 0x355   : > { %v1729_v19 = vsub.f32 1.5, %v1728_v41  ;;  %4246 = vmatmul.msk.f32.gmra.mxu2 %vm243_vm0, %v2070_v50  ;;  %v2951_v34 = vmul.f32 %v2554_v61, %v6398_v63 }
 0x356   : > { %v1894_v9 = vadd.f32 %v6629_v8, %v1861_v62  ;;  %v4560_v22 = vpop.eup %4559  ;;  %v1479_v26 = vadd.f32 1e-05, %v1447_v54  ;;  %v3029_v23 = vsel %vm243_vm0, %v6695_v24, 0.0 }
 0x357   : > { %v1730_v16 = vmul.f32 %v4558_v6, %v1729_v19  ;;  %v1736_v39 = vmul.f32 %v4560_v22, %v1478_v13  ;;  %v6698_v63 = vmul.f32 %v6453_v11, %v2951_v34  ;;  %vm1742_vm8 = vweird.f32 %v4560_v22 }
 0x358   : > { %4212 = vmatmul.msk.f32.gmra.mxu1 %vm243_vm0, %v1894_v9  ;;  %4561 = vrsqrt.f32 %v1479_v26  ;;  %vm1743_vm10 = vmor %vm1741_vm9, %vm1742_vm8  ;;  %vm1751_vm12 = vweird.f32 %v1479_v26  ;;  %v2263_v9 = vpop.f32.mrf.mxu2 }
 0x359   : > { %v1734_v36 = vsel %vm1733_vm7, %v4558_v6, %v1730_v16  ;;  %v1737_v2 = vmul.f32 %v4560_v22, %v1736_v39  ;;  %v3026_v53 = vsel %vm243_vm0, %v6698_v63, 0.0  ;;  %v6727_v39 = vadd.f32 %v6356_v51, %v2263_v9 }
 0x35a   : > { %v1829_v17 = vmul.f32 %v1734_v36, %v6259_v0  ;;  %v2072_v25 = vpop.f32.mrf.mxu1 }
 0x35b   : > { %3024 = vadd.xlane.f32.xlu2 %v3023_v45  ;;  %v1408_v38 = vpop.xlane.xlu2 %1407  ;;  %v1738_v5 = vmul.f32 0.5, %v1737_v2  ;;  %v2073_v60 = vadd.f32 %v6345_v27, %v2072_v25 }
 0x35c   : > { %3018 = vadd.xlane.f32.xlu0 %v3017_v20  ;;  %v1862_v6 = vmul.f32 %v6614_v12, %v1829_v17  ;;  %v1448_v21 = vmul.f32 %v1408_v38, %v5015_v18 }
 0x35d   : > { %v1739_v47 = vsub.f32 1.5, %v1738_v5  ;;  %4247 = vmatmul.msk.f32.gmra.mxu2 %vm243_vm0, %v2073_v60 }
 0x35e   : > { %v1895_v0 = vadd.f32 %v6629_v8, %v1862_v6  ;;  %v1480_v55 = vadd.f32 1e-05, %v1448_v21  ;;  %v4562_v15 = vpop.eup %4561 }
 0x35f   : > { %v1740_v48 = vmul.f32 %v4560_v22, %v1739_v47  ;;  %v1746_v44 = vmul.f32 %v4562_v15, %v1479_v26  ;;  %vm1752_vm11 = vweird.f32 %v4562_v15 }
 0x360   : > { %4213 = vmatmul.msk.f32.gmra.mxu1 %vm243_vm0, %v1895_v0  ;;  %4563 = vrsqrt.f32 %v1480_v55  ;;  %vm1753_vm13 = vmor %vm1751_vm12, %vm1752_vm11  ;;  %vm1761_vm15 = vweird.f32 %v1480_v55 }
 0x361   : > { %v1744_v7 = vsel %vm1743_vm10, %v4560_v22, %v1740_v48  ;;  %v1747_v29 = vmul.f32 %v4562_v15, %v1746_v44  ;;  %v2266_v22 = vpop.f32.mrf.mxu2 }
 0x362   : > { %v1830_v43 = vmul.f32 %v1744_v7, %v6292_v1  ;;  %v2075_v49 = vpop.f32.mrf.mxu1  ;;  %v6731_v0 = vadd.f32 %v6356_v51, %v2266_v22 }
 0x363   : > { %3030 = vadd.xlane.f32.xlu2 %v3029_v23  ;;  %v1748_v58 = vmul.f32 0.5, %v1747_v29  ;;  %v2076_v10 = vadd.f32 %v6345_v27, %v2075_v49 }
 0x364   : > { %3027 = vadd.xlane.f32.xlu0 %v3026_v53  ;;  %v1863_v41 = vmul.f32 %v6614_v12, %v1830_v43  ;;  %v4270_v2 = vmul.f32 -1.442695, %v6731_v0 }
 0x365   : > { %v1749_v50 = vsub.f32 1.5, %v1748_v58  ;;  %4248 = vmatmul.msk.f32.gmra.mxu2 %vm243_vm0, %v2076_v10 }
 0x366   : > { %v4564_v52 = vpop.eup %4563  ;;  %v1896_v14 = vadd.f32 %v6629_v8, %v1863_v41 }
 0x367   : > { %v1756_v13 = vmul.f32 %v4564_v52, %v1480_v55  ;;  %v1750_v62 = vmul.f32 %v4562_v15, %v1749_v50  ;;  %vm1762_vm14 = vweird.f32 %v4564_v52 }
 0x368   : > { %4214 = vmatmul.msk.f32.gmra.mxu1 %vm243_vm0, %v1896_v14  ;;  %vm1763_vm1 = vmor %vm1761_vm15, %vm1762_vm14 }
 0x369   : > { %v1757_v30 = vmul.f32 %v4564_v52, %v1756_v13  ;;  %v1754_v1 = vsel %vm1753_vm13, %v4562_v15, %v1750_v62  ;;  %v2269_v26 = vpop.f32.mrf.mxu2 }
 0x36a   : > { %v1831_v42 = vmul.f32 %v1754_v1, %v6309_v35  ;;  %v2078_v61 = vpop.f32.mrf.mxu1  ;;  %v6735_v47 = vadd.f32 %v6356_v51, %v2269_v26 }
 0x36b   : > { %v1758_v19 = vmul.f32 0.5, %v1757_v30  ;;  %v2079_v36 = vadd.f32 %v6345_v27, %v2078_v61 }
 0x36c   : > { %v1864_v17 = vmul.f32 %v6614_v12, %v1831_v42  ;;  %v4271_v48 = vmul.f32 -1.442695, %v6735_v47 }
 0x36d   : > { %v1759_v16 = vsub.f32 1.5, %v1758_v19  ;;  %4249 = vmatmul.msk.f32.gmra.mxu2 %vm243_vm0, %v2079_v36 }
 0x36e   : > { %v1897_v45 = vadd.f32 %v6629_v8, %v1864_v17 }
 0x36f   : > { %v1760_v28 = vmul.f32 %v4564_v52, %v1759_v16 }
 0x370   : > { %4215 = vmatmul.msk.f32.gmra.mxu1 %vm243_vm0, %v1897_v45 }
 0x371   : > { %v1764_v33 = vsel %vm1763_vm1, %v4564_v52, %v1760_v28  ;;  %v2272_v38 = vpop.f32.mrf.mxu2 }
 0x372   : > { %v1832_v34 = vmul.f32 %v1764_v33, %v6327_v56  ;;  %v2081_v20 = vpop.f32.mrf.mxu1  ;;  %v4269_v56 = vmul.f32 -1.442695, %v6727_v39  ;;  %v6740_v53 = vadd.f32 %v6356_v51, %v2272_v38 }
 0x373   : > { %v2082_v54 = vadd.f32 %v6345_v27, %v2081_v20 }
 0x374   : > { %v1865_v35 = vmul.f32 %v6614_v12, %v1832_v34  ;;  %4565 = vpow2.f32 %v4269_v56  ;;  %v4272_v15 = vmul.f32 -1.442695, %v6740_v53 }
 0x375   : > { %4250 = vmatmul.msk.f32.gmra.mxu2 %vm243_vm0, %v2082_v54  ;;  %4567 = vpow2.f32 %v4270_v2 }
 0x376   : > { %v1898_v6 = vadd.f32 %v6629_v8, %v1865_v35 }
 0x378   : > { %4216 = vmatmul.msk.f32.gmra.mxu1 %vm243_vm0, %v1898_v6 }
 0x379   : > { %v2275_v25 = vpop.f32.mrf.mxu2 }
 0x37a   : > { %v4566_v5 = vpop.eup %4565  ;;  %v6748_v58 = vadd.f32 %v6356_v51, %v2275_v25 }
 0x37b   : > { %v2441_v21 = vadd.f32 1.0, %v4566_v5  ;;  %v4568_v23 = vpop.eup %4567 }
 0x37c   : > { %v6737_v55 = vadd.f32 1.0, %v4568_v23  ;;  %v4273_v50 = vmul.f32 -1.442695, %v6748_v58 }
 0x37d   : > { %4569 = vrcp.f32 %v2441_v21  ;;  %v2582_v1 = vand.u32 2147483648, %v2441_v21  ;;  %vm2576_vm3 = vweird.f32 %v2441_v21  ;;  %v2580_v42 = vand.u32 2147483647, %v2441_v21 }
 0x37e   : > { %4571 = vrcp.f32 %v6737_v55  ;;  %vm2591_vm7 = vweird.f32 %v6737_v55  ;;  %v2597_v26 = vand.u32 2147483648, %v6737_v55 }
 0x37f   : > { %4573 = vpow2.f32 %v4271_v48  ;;  %v2583_v45 = vor.u32 1.1754944e-38, %v2582_v1  ;;  %vm2581_vm5 = vcmp.eq.f32.partialorder %v2580_v42, 8.507059e+37 }
 0x380   : > { %4575 = vpow2.f32 %v4272_v15 }
 0x381   : > { %v2278_v44 = vpop.f32.mrf.mxu2  ;;  %4577 = vpow2.f32 %v4273_v50 }
 0x382   : > { %v6762_v36 = vadd.f32 %v6356_v51, %v2278_v44 }
 0x383   : > { %v4570_v60 = vpop.eup %4569 }
 0x384   : > { %v2572_v7 = vmul.f32 %v4570_v60, %v2441_v21  ;;  %v6745_v43 = vpop.eup %4571  ;;  %vm2577_vm2 = vweird.f32 %v4570_v60  ;;  %v4274_v22 = vmul.f32 -1.442695, %v6762_v36  ;;  %v2595_v21 = vand.u32 2147483647, %v6737_v55 }
 0x385   : > { %v4574_v49 = vpop.eup %4573  ;;  %v2587_v41 = vmul.f32 %v6745_v43, %v6737_v55  ;;  %vm2578_vm4 = vmor %vm2576_vm3, %vm2577_vm2  ;;  %vm2592_vm6 = vweird.f32 %v6745_v43 }
 0x386   : > { %v2573_v29 = vsub.f32 1.0, %v2572_v7  ;;  %v4576_v52 = vpop.eup %4575  ;;  %v6753_v13 = vadd.f32 1.0, %v4574_v49  ;;  %vm6783_vm8 = vmor %vm2591_vm7, %vm2592_vm6  ;;  %v2598_v7 = vor.u32 1.1754944e-38, %v2597_v26  ;;  %vm2596_vm9 = vcmp.eq.f32.partialorder %v2595_v21, 8.507059e+37 }
 0x387   : > { %v2588_v62 = vsub.f32 1.0, %v2587_v41  ;;  %v6755_v30 = vadd.f32 1.0, %v4576_v52  ;;  %v4578_v34 = vpop.eup %4577 }
 0x388   : > { %v2574_v10 = vmul.f32 %v4570_v60, %v2573_v29  ;;  %4579 = vrcp.f32 %v6753_v13  ;;  %v6780_v56 = vadd.f32 1.0, %v4578_v34  ;;  %v2612_v55 = vand.u32 2147483648, %v6753_v13 }
 0x389   : > { %v2281_v19 = vpop.f32.mrf.mxu2  ;;  %v2589_v61 = vmul.f32 %v6745_v43, %v2588_v62  ;;  %4581 = vrcp.f32 %v6755_v30  ;;  %v2610_v50 = vand.u32 2147483647, %v6753_v13  ;;  %vm2606_vm10 = vweird.f32 %v6753_v13 }
 0x38a   : > { %v2575_v14 = vadd.f32 %v4570_v60, %v2574_v10  ;;  %v6765_v17 = vadd.f32 %v6356_v51, %v2281_v19  ;;  %v6806_v62 = vor.u32 1.1754944e-38, %v2612_v55  ;;  %v2625_v34 = vand.u32 2147483647, %v6755_v30 }
 0x38b   : > { %v2590_v20 = vadd.f32 %v6745_v43, %v2589_v61  ;;  %vm6836_vm14 = vcmp.eq.f32.partialorder %v2610_v50, 8.507059e+37  ;;  %vm2621_vm1 = vweird.f32 %v6755_v30 }
 0x38c   : > { %v2579_v28 = vsel %vm2578_vm4, %v4570_v60, %v2575_v14  ;;  %v4275_v6 = vmul.f32 -1.442695, %v6765_v17  ;;  %vm6852_vm3 = vcmp.eq.f32.partialorder %v2625_v34, 8.507059e+37 }
 0x38d   : > { %v2584_v35 = vsel %vm2581_vm5, %v2583_v45, %v2579_v28  ;;  %v2594_v25 = vsel %vm6783_vm8, %v6745_v43, %v2590_v20 }
 0x38e   : > { %v6773_v54 = vpop.eup %4579  ;;  %v2953_v38 = vmul.f32 %v2584_v35, %v6727_v39  ;;  %v2599_v29 = vsel %vm2596_vm9, %v2598_v7, %v2594_v25  ;;  %vm2636_vm9 = vweird.f32 %v6780_v56 }
 0x38f   : > { %v6776_v51 = vpop.eup %4581  ;;  %v2602_v48 = vmul.f32 %v6773_v54, %v6753_v13  ;;  %v6809_v42 = vmul.f32 %v2599_v29, %v6731_v0  ;;  %vm2607_vm11 = vweird.f32 %v6773_v54 }
 0x390   : > { %v2617_v39 = vmul.f32 %v6776_v51, %v6755_v30  ;;  %v6803_v43 = vmul.f32 %v6453_v11, %v2953_v38  ;;  %vm2622_vm2 = vweird.f32 %v6776_v51  ;;  %vm6868_vm4 = vmor %vm2606_vm10, %vm2607_vm11 }
 0x391   : > { %v2603_v41 = vsub.f32 1.0, %v2602_v48  ;;  %vm6889_vm6 = vmor %vm2621_vm1, %vm2622_vm2 }
 0x392   : > { %v2618_v52 = vsub.f32 1.0, %v2617_v39  ;;  %v6816_v28 = vsel %vm243_vm0, %v6803_v43, 0.0 }
 0x393   : > { %v2604_v20 = vmul.f32 %v6773_v54, %v2603_v41 }
 0x395   : > { %v2605_v7 = vadd.f32 %v6773_v54, %v2604_v20 }
 0x3ae   : > { %v1411_v9 = vpop.xlane.xlu0 %1410 }
 0x3af   : > { %v1449_v16 = vmul.f32 %v1411_v9, %v5015_v18 }
 0x3b1   : > { %v6767_v33 = vadd.f32 1e-05, %v1449_v16 }
 0x3b3   : > { %4583 = vrsqrt.f32 %v6767_v33  ;;  %vm1771_vm13 = vweird.f32 %v6767_v33 }
 0x3b4   : > { %4585 = vpow2.f32 %v4274_v22  ;;  %v2619_v22 = vmul.f32 %v6776_v51, %v2618_v52 }
 0x3b5   : > { %4587 = vpow2.f32 %v4275_v6 }
 0x3b6   : > { %v1414_v2 = vpop.xlane.xlu1 %1413  ;;  %4589 = vrcp.f32 %v6780_v56  ;;  %v2620_v41 = vadd.f32 %v6776_v51, %v2619_v22 }
 0x3b7   : > { %v1450_v23 = vmul.f32 %v1414_v2, %v5015_v18 }
 0x3b9   : > { %v4584_v60 = vpop.eup %4583  ;;  %v6796_v15 = vadd.f32 1e-05, %v1450_v23 }
 0x3ba   : > { %v1766_v44 = vmul.f32 %v4584_v60, %v6767_v33  ;;  %v4586_v10 = vpop.eup %4585  ;;  %vm1772_vm12 = vweird.f32 %v4584_v60  ;;  %v2627_v33 = vand.u32 2147483648, %v6755_v30 }
 0x3bb   : > { %4591 = vrsqrt.f32 %v6796_v15  ;;  %v4588_v9 = vpop.eup %4587  ;;  %v6842_v25 = vadd.f32 1.0, %v4586_v10  ;;  %vm1773_vm15 = vmor %vm1771_vm13, %vm1772_vm12  ;;  %vm1781_vm7 = vweird.f32 %v6796_v15 }
 0x3bc   : > { %v1767_v49 = vmul.f32 %v4584_v60, %v1766_v44  ;;  %v6818_v45 = vpop.eup %4589  ;;  %v6831_v2 = vadd.f32 1.0, %v4588_v9 }
 0x3bd   : > { %v2632_v23 = vmul.f32 %v6818_v45, %v6780_v56  ;;  %vm2637_vm10 = vweird.f32 %v6818_v45 }
 0x3be   : > { %v1768_v14 = vmul.f32 0.5, %v1767_v49  ;;  %v3013_v1 = vpop.xlane.xlu1 %3012  ;;  %v1417_v19 = vpop.xlane.xlu2 %1416  ;;  %vm6960_vm12 = vmor %vm2636_vm9, %vm2637_vm10 }
 0x3bf   : > { %v3107_v16 = vmul.f32 %v3013_v1, %v5015_v18  ;;  %v1451_v61 = vmul.f32 %v1417_v19, %v5015_v18 }
 0x3c0   : > { %v1769_v35 = vsub.f32 1.5, %v1768_v14  ;;  %v2633_v14 = vsub.f32 1.0, %v2632_v23 }
 0x3c1   : > { %v6822_v0 = vpop.eup %4591  ;;  %v6827_v6 = vsub.f32 %v6489_v37, %v3107_v16  ;;  %v6829_v26 = vadd.f32 1e-05, %v1451_v61 }
 0x3c2   : > { %v1770_v38 = vmul.f32 %v4584_v60, %v1769_v35  ;;  %v1776_v5 = vmul.f32 %v6822_v0, %v6796_v15  ;;  %vm1782_vm5 = vweird.f32 %v6822_v0  ;;  %v2609_v35 = vsel %vm6868_vm4, %v6773_v54, %v2605_v7 }
 0x3c3   : > { %4593 = vrsqrt.f32 %v6829_v26  ;;  %v3171_v37 = vmul.f32 %v6827_v6, %v6827_v6  ;;  %vm1783_vm8 = vmor %vm1781_vm7, %vm1782_vm5  ;;  %v6910_v15 = vmul.f32 %v6453_v11, %v6809_v42  ;;  %vm1791_vm13 = vweird.f32 %v6829_v26 }
 0x3c4   : > { %v1774_v48 = vsel %vm1773_vm15, %v4584_v60, %v1770_v38  ;;  %v1777_v39 = vmul.f32 %v6822_v0, %v1776_v5  ;;  %4595 = vrcp.f32 %v6831_v2  ;;  %vm2666_vm5 = vweird.f32 %v6831_v2 }
 0x3c5   : > { %v1833_v44 = vmul.f32 %v1774_v48, %v6448_v57  ;;  %v2084_v29 = vpop.f32.mrf.mxu1  ;;  %v3203_v49 = vsel %vm243_vm0, %v3171_v37, 0.0  ;;  %4597 = vrcp.f32 %v6842_v25  ;;  %v2634_v37 = vmul.f32 %v6818_v45, %v2633_v14 }
 0x3c6   : > { %v1778_v60 = vmul.f32 0.5, %v1777_v39  ;;  %v2085_v52 = vadd.f32 %v6345_v27, %v2084_v29  ;;  %3204 = vadd.xlane.f32.xlu1 %v3203_v49  ;;  %v3022_v10 = vpop.xlane.xlu1 %3021  ;;  %v3016_v50 = vpop.xlane.xlu2 %3015  ;;  %v2628_v27 = vor.u32 1.1754944e-38, %v2627_v33  ;;  %vm2651_vm7 = vweird.f32 %v6842_v25 }
 0x3c7   : > { %v3108_v1 = vmul.f32 %v3016_v50, %v5015_v18  ;;  %v1420_v19 = vpop.xlane.xlu0 %1419  ;;  %v1866_v57 = vmul.f32 %v6614_v12, %v1833_v44  ;;  %v3110_v13 = vmul.f32 %v3022_v10, %v5015_v18 }
 0x3c8   : > { %v1779_v16 = vsub.f32 1.5, %v1778_v60  ;;  %v1452_v61 = vmul.f32 %v1420_v19, %v5015_v18  ;;  %4251 = vmatmul.msk.f32.gmra.mxu2 %vm243_vm0, %v2085_v52 }
 0x3c9   : > { %v6875_v34 = vpop.eup %4593  ;;  %v6882_v20 = vsub.f32 %v6514_v46, %v3108_v1  ;;  %v1899_v22 = vadd.f32 %v6629_v8, %v1866_v57  ;;  %v2624_v46 = vsel %vm6889_vm6, %v6776_v51, %v2620_v41  ;;  %v2614_v51 = vsel %vm6836_vm14, %v6806_v62, %v2609_v35  ;;  %v6934_v41 = vld [vmem:[%s8419_s3 + $0x4] ss:$0 sm:$0xff] }
 0x3ca   : > { %v1780_v5 = vmul.f32 %v6822_v0, %v1779_v16  ;;  %v1786_v54 = vmul.f32 %v6875_v34, %v6829_v26  ;;  %v6897_v23 = vadd.f32 1e-05, %v1452_v61  ;;  %v6912_v33 = vpop.eup %4595  ;;  %v6925_v42 = vsub.f32 %v6599_v31, %v3110_v13 }
 0x3cb   : > { %4217 = vmatmul.msk.f32.gmra.mxu1 %vm243_vm0, %v1899_v22  ;;  %v3172_v30 = vmul.f32 %v6882_v20, %v6882_v20  ;;  %v6920_v7 = vpop.eup %4597  ;;  %v2629_v62 = vsel %vm6852_vm3, %v2628_v27, %v2624_v46  ;;  %v2635_v31 = vadd.f32 %v6818_v45, %v2634_v37  ;;  %v2662_v55 = vmul.f32 %v6912_v33, %v6831_v2 }
 0x3cc   : > { %v1784_v48 = vsel %vm1783_vm8, %v6822_v0, %v1780_v5  ;;  %v1787_v39 = vmul.f32 %v6875_v34, %v1786_v54  ;;  %4599 = vrsqrt.f32 %v6897_v23  ;;  %v2640_v0 = vand.u32 2147483647, %v6780_v56 }
 0x3cd   : > { %v1834_v44 = vmul.f32 %v1784_v48, %v6511_v4  ;;  %v2087_v29 = vpop.f32.mrf.mxu1  ;;  %v3206_v49 = vsel %vm243_vm0, %v3172_v30, 0.0  ;;  %v2647_v50 = vmul.f32 %v6920_v7, %v6842_v25  ;;  %vm1792_vm11 = vweird.f32 %v6875_v34 }
 0x3ce   : > { %v1788_v21 = vmul.f32 0.5, %v1787_v39  ;;  %v2088_v60 = vadd.f32 %v6934_v41, %v2087_v29  ;;  %3033 = vadd.xlane.f32.xlu1 %v6816_v28  ;;  %v3025_v4 = vpop.xlane.xlu2 %3024  ;;  %3207 = vadd.xlane.f32.xlu0 %v3206_v49  ;;  %v2642_v1 = vand.u32 2147483648, %v6780_v56  ;;  %v3174_v9 = vmul.f32 %v6925_v42, %v6925_v42  ;;  %vm1793_vm14 = vmor %vm1791_vm13, %vm1792_vm11 }
 0x3cf   : > { %v3019_v52 = vpop.xlane.xlu0 %3018  ;;  %v1867_v10 = vmul.f32 %v6614_v12, %v1834_v44  ;;  %v3111_v19 = vmul.f32 %v3025_v4, %v5015_v18  ;;  %v2956_v16 = vmul.f32 %v2629_v62, %v6740_v53  ;;  %v2955_v22 = vmul.f32 %v2614_v51, %v6735_v47 }
 0x3d0   : > { %v1789_v14 = vsub.f32 1.5, %v1788_v21  ;;  %v3109_v28 = vmul.f32 %v3019_v52, %v5015_v18  ;;  %4252 = vmatmul.msk.f32.gmra.mxu2 %vm243_vm0, %v2088_v60  ;;  %v2663_v38 = vsub.f32 1.0, %v2662_v55  ;;  %v3035_v56 = vsel %vm243_vm0, %v6910_v15, 0.0 }
 0x3d1   : > { %v1900_v57 = vadd.f32 %v6629_v8, %v1867_v10  ;;  %v2639_v26 = vsel %vm6960_vm12, %v6818_v45, %v2635_v31  ;;  %v6986_v37 = vsub.f32 %v6680_v3, %v3111_v19  ;;  %v3212_v51 = vsel %vm243_vm0, %v3174_v9, 0.0 }
 0x3d2   : > { %v6953_v27 = vpop.eup %4599  ;;  %v1790_v35 = vmul.f32 %v6875_v34, %v1789_v14  ;;  %v6967_v13 = vsub.f32 %v6602_v32, %v3109_v28  ;;  %v2648_v32 = vsub.f32 1.0, %v2647_v50  ;;  %vm2641_vm15 = vcmp.eq.f32.partialorder %v2640_v0, 8.507059e+37 }
 0x3d3   : > { %v1796_v53 = vmul.f32 %v6953_v27, %v6897_v23  ;;  %4218 = vmatmul.msk.f32.gmra.mxu1 %vm243_vm0, %v1900_v57  ;;  %v2643_v48 = vor.u32 1.1754944e-38, %v2642_v1  ;;  %v2664_v39 = vmul.f32 %v6912_v33, %v2663_v38  ;;  %v6998_v21 = vmul.f32 %v6453_v11, %v2955_v22 }
 0x3d4   : > { %v1794_v5 = vsel %vm1793_vm14, %v6875_v34, %v1790_v35  ;;  %v3173_v47 = vmul.f32 %v6967_v13, %v6967_v13  ;;  %v6990_v34 = vmul.f32 %v6453_v11, %v2956_v16  ;;  %v2649_v49 = vmul.f32 %v6920_v7, %v2648_v32 }
 0x3d5   : > { %v1835_v54 = vmul.f32 %v1794_v5, %v6566_v40  ;;  %v1797_v46 = vmul.f32 %v6953_v27, %v1796_v53  ;;  %v2090_v30 = vpop.f32.mrf.mxu1  ;;  %v2644_v3 = vsel %vm2641_vm15, %v2643_v48, %v2639_v26  ;;  %vm1802_vm1 = vweird.f32 %v6953_v27 }
 0x3d6   : > { %3213 = vadd.xlane.f32.xlu1 %v3212_v51  ;;  %v3031_v45 = vpop.xlane.xlu2 %3030  ;;  %3036 = vadd.xlane.f32.xlu0 %v3035_v56  ;;  %v2091_v40 = vadd.f32 %v6934_v41, %v2090_v30  ;;  %v3209_v29 = vsel %vm243_vm0, %v3173_v47, 0.0  ;;  %v3175_v31 = vmul.f32 %v6986_v37, %v6986_v37  ;;  %vm2652_vm2 = vweird.f32 %v6920_v7 }
 0x3d7   : > { %v1798_v44 = vmul.f32 0.5, %v1797_v46  ;;  %3210 = vadd.xlane.f32.xlu2 %v3209_v29  ;;  %v3028_v62 = vpop.xlane.xlu0 %3027  ;;  %v1868_v0 = vmul.f32 %v6614_v12, %v1835_v54  ;;  %v3113_v4 = vmul.f32 %v3031_v45, %v5015_v18  ;;  %vm2667_vm3 = vweird.f32 %v6912_v33  ;;  %vm7048_vm9 = vmor %vm2651_vm7, %vm2652_vm2 }
 0x3d8   : > { %4253 = vmatmul.msk.f32.gmra.mxu2 %vm243_vm0, %v2091_v40  ;;  %v3041_v11 = vsel %vm243_vm0, %v6990_v34, 0.0  ;;  %v2665_v52 = vadd.f32 %v6912_v33, %v2664_v39  ;;  %vm1801_vm4 = vweird.f32 %v6897_v23  ;;  %v3112_v50 = vmul.f32 %v3028_v62, %v5015_v18  ;;  %vm7031_vm8 = vmor %vm2666_vm5, %vm2667_vm3 }
 0x3d9   : > { %v1799_v60 = vsub.f32 1.5, %v1798_v44  ;;  %v1901_v55 = vadd.f32 %v6629_v8, %v1868_v0  ;;  %v2957_v14 = vmul.f32 %v2644_v3, %v6748_v58  ;;  %v2670_v28 = vand.u32 2147483647, %v6831_v2  ;;  %vm1803_vm6 = vmor %vm1801_vm4, %vm1802_vm1  ;;  %v2284_v3 = vpop.f32.mrf.mxu2 }
 0x3da   : > { %v2672_v1 = vand.u32 2147483648, %v6831_v2  ;;  %v2650_v19 = vadd.f32 %v6920_v7, %v2649_v49  ;;  %v7024_v23 = vsub.f32 %v6695_v24, %v3113_v4  ;;  %v3215_v58 = vsel %vm243_vm0, %v3175_v31, 0.0 }
 0x3db   : > { %v1800_v10 = vmul.f32 %v6953_v27, %v1799_v60  ;;  %4219 = vmatmul.msk.f32.gmra.mxu1 %vm243_vm0, %v1901_v55  ;;  %v2657_v16 = vand.u32 2147483648, %v6842_v25  ;;  %v3038_v24 = vsel %vm243_vm0, %v6998_v21, 0.0  ;;  %v2669_v35 = vsel %vm7031_vm8, %v6912_v33, %v2665_v52  ;;  %v7062_v33 = vld [vmem:[%s8419_s3 + $0x9] ss:$0 sm:$0xff]  ;;  %v7096_v60 = vld [vmem:[%s8419_s3 + $0x8] ss:$0 sm:$0xff] }
 0x3dc   : > { %v7043_v22 = vsub.f32 %v6698_v63, %v3112_v50  ;;  %v2673_v53 = vor.u32 1.1754944e-38, %v2672_v1  ;;  %vm2671_vm10 = vcmp.eq.f32.partialorder %v2670_v28, 8.507059e+37  ;;  %v3177_v63 = vmul.f32 %v7024_v23, %v7024_v23 }
 0x3dd   : > { %v1804_v57 = vsel %vm1803_vm6, %v6953_v27, %v1800_v10  ;;  %v2093_v9 = vpop.f32.mrf.mxu1  ;;  %v2655_v27 = vand.u32 2147483647, %v6842_v25  ;;  %v2654_v25 = vsel %vm7048_vm9, %v6920_v7, %v2650_v19  ;;  %v7065_v26 = vmul.f32 %v7062_v33, %v2957_v14 }
 0x3de   : > { %v1836_v61 = vmul.f32 %v1804_v57, %v6624_v59  ;;  %3042 = vadd.xlane.f32.xlu1 %v3041_v11  ;;  %3216 = vadd.xlane.f32.xlu0 %v3215_v58  ;;  %v2094_v38 = vadd.f32 %v6934_v41, %v2093_v9  ;;  %v2658_v32 = vor.u32 1.1754944e-38, %v2657_v16  ;;  %v3176_v7 = vmul.f32 %v7043_v22, %v7043_v22 }
 0x3df   : > { %3039 = vadd.xlane.f32.xlu2 %v3038_v24  ;;  %vm2656_vm11 = vcmp.eq.f32.partialorder %v2655_v27, 8.507059e+37  ;;  %v3221_v46 = vsel %vm243_vm0, %v3177_v63, 0.0  ;;  %v3044_v30 = vsel %vm243_vm0, %v7065_v26, 0.0  ;;  %v7099_v4 = vadd.f32 %v7096_v60, %v2284_v3 }
 0x3e0   : > { %v1869_v56 = vmul.f32 %v6614_v12, %v1836_v61  ;;  %4254 = vmatmul.msk.f32.gmra.mxu2 %vm243_vm0, %v2094_v38  ;;  %v2674_v12 = vsel %vm2671_vm10, %v2673_v53, %v2669_v35  ;;  %v2659_v47 = vsel %vm2656_vm11, %v2658_v32, %v2654_v25 }
 0x3e1   : > { %v2959_v54 = vmul.f32 %v2674_v12, %v6765_v17  ;;  %v2958_v51 = vmul.f32 %v2659_v47, %v6762_v36  ;;  %v2287_v0 = vpop.f32.mrf.mxu2  ;;  %v4276_v55 = vmul.f32 -1.442695, %v7099_v4 }
 0x3e2   : > { %v1902_v5 = vadd.f32 %v6629_v8, %v1869_v56  ;;  %v3218_v8 = vsel %vm243_vm0, %v3176_v7, 0.0  ;;  %v7103_v11 = vadd.f32 %v7096_v60, %v2287_v0 }
 0x3e3   : > { %v7078_v48 = vmul.f32 %v7062_v33, %v2959_v54  ;;  %v7081_v45 = vmul.f32 %v7062_v33, %v2958_v51  ;;  %4601 = vpow2.f32 %v4276_v55  ;;  %v4296_v55 = vld [vmem:[%s8418_s2 + $0x30] sm:$0xff] }
 0x3e4   : > { %4220 = vmatmul.msk.f32.gmra.mxu1 %vm243_vm0, %v1902_v5  ;;  %v4277_v52 = vmul.f32 -1.442695, %v7103_v11 }
 0x3e5   : > { %v3050_v17 = vsel %vm243_vm0, %v7078_v48, 0.0  ;;  %v2096_v39 = vpop.f32.mrf.mxu1  ;;  %v3047_v40 = vsel %vm243_vm0, %v7081_v45, 0.0 }
 0x3e6   : > { %3222 = vadd.xlane.f32.xlu1 %v3221_v46  ;;  %3045 = vadd.xlane.f32.xlu0 %v3044_v30  ;;  %v2097_v44 = vadd.f32 %v6934_v41, %v2096_v39  ;;  %4603 = vpow2.f32 %v4277_v52 }
 0x3e7   : > { %3219 = vadd.xlane.f32.xlu2 %v3218_v8 }
 0x3e8   : > { %4255 = vmatmul.msk.f32.gmra.mxu2 %vm243_vm0, %v2097_v44 }
 0x3e9   : > { %v2290_v31 = vpop.f32.mrf.mxu2  ;;  %v4602_v14 = vpop.eup %4601 }
 0x3ea   : > { %v7107_v10 = vadd.f32 %v7096_v60, %v2290_v31  ;;  %v2448_v1 = vadd.f32 1.0, %v4602_v14 }
 0x3ec   : > { %v4278_v28 = vmul.f32 -1.442695, %v7107_v10  ;;  %v4604_v19 = vpop.eup %4603  ;;  %v2687_v30 = vand.u32 2147483648, %v2448_v1  ;;  %vm2681_vm13 = vweird.f32 %v2448_v1  ;;  %v2685_v8 = vand.u32 2147483647, %v2448_v1 }
 0x3ed   : > { %v2099_v36 = vpop.f32.mrf.mxu1  ;;  %v7110_v57 = vadd.f32 1.0, %v4604_v19 }
 0x3ee   : > { %3051 = vadd.xlane.f32.xlu1 %v3050_v17  ;;  %v2100_v29 = vadd.f32 %v6934_v41, %v2099_v36  ;;  %4605 = vpow2.f32 %v4278_v28  ;;  %vm2686_vm1 = vcmp.eq.f32.partialorder %v2685_v8, 8.507059e+37 }
 0x3ef   : > { %3048 = vadd.xlane.f32.xlu2 %v3047_v40  ;;  %4607 = vrcp.f32 %v2448_v1  ;;  %v2700_v31 = vand.u32 2147483647, %v7110_v57  ;;  %v2702_v52 = vand.u32 2147483648, %v7110_v57  ;;  %vm2696_vm2 = vweird.f32 %v7110_v57 }
 0x3f0   : > { %4256 = vmatmul.msk.f32.gmra.mxu2 %vm243_vm0, %v2100_v29  ;;  %4609 = vrcp.f32 %v7110_v57  ;;  %v4297_v29 = vld [vmem:[%s8418_s2 + $0x38] sm:$0xff] }
 0x3f1   : > { %v2293_v50 = vpop.f32.mrf.mxu2  ;;  %3895 = vmatpush.msra.mxu3 %v4297_v29  ;;  %vm2701_vm4 = vcmp.eq.f32.partialorder %v2700_v31, 8.507059e+37 }
 0x3f2   : > { %v7113_v9 = vadd.f32 %v7096_v60, %v2293_v50 }
 0x3f3   : > { %3896 = vmatpush.msra.mxu3 %v4296_v55 }
 0x3f4   : > { %v4606_v16 = vpop.eup %4605  ;;  %v4279_v2 = vmul.f32 -1.442695, %v7113_v9 }
 0x3f5   : > { %v2102_v49 = vpop.f32.mrf.mxu1  ;;  %v4608_v61 = vpop.eup %4607  ;;  %v7117_v24 = vadd.f32 1.0, %v4606_v16  ;;  %v4295_v16 = vld [vmem:[%s8418_s2 + $0x28] sm:$0xff] }
 0x3f6   : > { %v2103_v62 = vadd.f32 %v6934_v41, %v2102_v49  ;;  %v2677_v27 = vmul.f32 %v4608_v61, %v2448_v1  ;;  %4611 = vpow2.f32 %v4279_v2  ;;  %v7119_v35 = vpop.eup %4609  ;;  %vm2682_vm12 = vweird.f32 %v4608_v61  ;;  %3897 = vmatpush.msra.mxu3 %v4295_v16 }
 0x3f7   : > { %4613 = vrcp.f32 %v7117_v24  ;;  %v2692_v53 = vmul.f32 %v7119_v35, %v7110_v57  ;;  %vm7139_vm14 = vmor %vm2681_vm13, %vm2682_vm12  ;;  %vm2697_vm15 = vweird.f32 %v7119_v35  ;;  %vm2711_vm6 = vweird.f32 %v7117_v24 }
 0x3f8   : > { %4257 = vmatmul.msk.f32.gmra.mxu2 %vm243_vm0, %v2103_v62  ;;  %v2678_v59 = vsub.f32 1.0, %v2677_v27  ;;  %v2688_v62 = vor.u32 1.1754944e-38, %v2687_v30  ;;  %vm7172_vm3 = vmor %vm2696_vm2, %vm2697_vm15  ;;  %v4294_v27 = vld [vmem:[%s8418_s2 + $0x20] sm:$0xff] }
 0x3f9   : > { %v2296_v58 = vpop.f32.mrf.mxu2  ;;  %v2693_v12 = vsub.f32 1.0, %v2692_v53  ;;  %3898 = vmatpush.msra.mxu3 %v4294_v27 }
 0x3fa   : > { %v7125_v25 = vadd.f32 %v7096_v60, %v2296_v58  ;;  %v2679_v32 = vmul.f32 %v4608_v61, %v2678_v59  ;;  %v2703_v59 = vor.u32 1.1754944e-38, %v2702_v52 }
 0x3fb   : > { %v2694_v51 = vmul.f32 %v7119_v35, %v2693_v12 }
 0x3fc   : > { %v4612_v56 = vpop.eup %4611  ;;  %v4280_v7 = vmul.f32 -1.442695, %v7125_v25  ;;  %v2680_v54 = vadd.f32 %v4608_v61, %v2679_v32 }
 0x3fd   : > { %v7127_v63 = vpop.eup %4613  ;;  %v7129_v5 = vadd.f32 1.0, %v4612_v56  ;;  %v2695_v0 = vadd.f32 %v7119_v35, %v2694_v51 }
 0x3fe   : > { %v2707_v47 = vmul.f32 %v7127_v63, %v7117_v24  ;;  %v2684_v3 = vsel %vm7139_vm14, %v4608_v61, %v2680_v54  ;;  %vm2712_vm5 = vweird.f32 %v7127_v63 }
 0x3ff   : > { %4615 = vrcp.f32 %v7129_v5  ;;  %v2689_v1 = vsel %vm2686_vm1, %v2688_v62, %v2684_v3  ;;  %v2699_v57 = vsel %vm7172_vm3, %v7119_v35, %v2695_v0  ;;  %vm7197_vm7 = vmor %vm2711_vm6, %vm2712_vm5  ;;  %vm2726_vm9 = vweird.f32 %v7129_v5 }
 0x400   : > { %4617 = vpow2.f32 %v4280_v7  ;;  %v2708_v44 = vsub.f32 1.0, %v2707_v47  ;;  %v2704_v7 = vsel %vm2701_vm4, %v2703_v59, %v2699_v57  ;;  %v2717_v47 = vand.u32 2147483648, %v7117_v24 }
 0x401   : > { %v2299_v38 = vpop.f32.mrf.mxu2  ;;  %v2961_v29 = vmul.f32 %v2704_v7, %v7103_v11  ;;  %v2732_v51 = vand.u32 2147483648, %v7129_v5 }
 0x402   : > { %v7137_v17 = vadd.f32 %v7096_v60, %v2299_v38  ;;  %v2709_v19 = vmul.f32 %v7127_v63, %v2708_v44  ;;  %v2960_v38 = vmul.f32 %v2689_v1, %v7099_v4  ;;  %v2718_v62 = vor.u32 1.1754944e-38, %v2717_v47 }
 0x403   : > { %v7228_v61 = vmul.f32 %v7062_v33, %v2961_v29  ;;  %v7266_v29 = vld [vmem:[%s8419_s3 + $0xa] ss:$0 sm:$0xff] }
 0x404   : > { %v4281_v50 = vmul.f32 -1.442695, %v7137_v17  ;;  %v2710_v56 = vadd.f32 %v7127_v63, %v2709_v19 }
 0x405   : > { %v7162_v28 = vpop.eup %4615 }
 0x406   : > { %v4618_v2 = vpop.eup %4617  ;;  %v2722_v53 = vmul.f32 %v7162_v28, %v7129_v5  ;;  %vm2727_vm10 = vweird.f32 %v7162_v28 }
 0x407   : > { %v7188_v32 = vadd.f32 1.0, %v4618_v2  ;;  %vm7277_vm14 = vmor %vm2726_vm9, %vm2727_vm10 }
 0x408   : > { %v2723_v8 = vsub.f32 1.0, %v2722_v53 }
 0x409   : > { %v2302_v46 = vpop.f32.mrf.mxu2  ;;  %vm2741_vm1 = vweird.f32 %v7188_v32 }
 0x40a   : > { %v7144_v40 = vadd.f32 %v7096_v60, %v2302_v46  ;;  %v2715_v46 = vand.u32 2147483647, %v7117_v24  ;;  %v2714_v24 = vsel %vm7197_vm7, %v7127_v63, %v2710_v56  ;;  %v2724_v55 = vmul.f32 %v7162_v28, %v2723_v8 }
 0x40c   : > { %v4282_v58 = vmul.f32 -1.442695, %v7144_v40  ;;  %vm2716_vm8 = vcmp.eq.f32.partialorder %v2715_v46, 8.507059e+37  ;;  %v2725_v7 = vadd.f32 %v7162_v28, %v2724_v55 }
 0x40d   : > { %v2719_v31 = vsel %vm2716_vm8, %v2718_v62, %v2714_v24  ;;  %v2730_v62 = vand.u32 2147483647, %v7129_v5 }
 0x40e   : > { %v2962_v53 = vmul.f32 %v2719_v31, %v7107_v10 }
 0x40f   : > { %vm2731_vm15 = vcmp.eq.f32.partialorder %v2730_v62, 8.507059e+37  ;;  %v2747_v62 = vand.u32 2147483648, %v7188_v32 }
 0x439   : > { %v3205_v36 = vpop.xlane.xlu1 %3204 }
 0x43a   : > { %v3299_v49 = vmul.f32 %v3205_v36, %v5015_v18  ;;  %v7207_v36 = vmul.f32 %v7062_v33, %v2960_v38 }
 0x43c   : > { %v7160_v14 = vadd.f32 1e-05, %v3299_v49 }
 0x43e   : > { %4619 = vrsqrt.f32 %v7160_v14  ;;  %vm3369_vm12 = vweird.f32 %v7160_v14 }
 0x43f   : > { %4621 = vpow2.f32 %v4281_v50  ;;  %v3053_v50 = vsel %vm243_vm0, %v7207_v36, 0.0 }
 0x440   : > { %4623 = vpow2.f32 %v4282_v58 }
 0x441   : > { %v3034_v35 = vpop.xlane.xlu1 %3033  ;;  %v3208_v12 = vpop.xlane.xlu0 %3207  ;;  %4625 = vrcp.f32 %v7188_v32 }
 0x442   : > { %v3114_v4 = vmul.f32 %v3034_v35, %v5015_v18  ;;  %v3300_v54 = vmul.f32 %v3208_v12, %v5015_v18 }
 0x444   : > { %v7195_v30 = vpop.eup %4619  ;;  %v7202_v39 = vsub.f32 %v6803_v43, %v3114_v4  ;;  %v7204_v44 = vadd.f32 1e-05, %v3300_v54 }
 0x445   : > { %v3364_v3 = vmul.f32 %v7195_v30, %v7160_v14  ;;  %v4622_v49 = vpop.eup %4621  ;;  %vm3370_vm11 = vweird.f32 %v7195_v30 }
 0x446   : > { %4627 = vrsqrt.f32 %v7204_v44  ;;  %v3178_v43 = vmul.f32 %v7202_v39, %v7202_v39  ;;  %v4624_v0 = vpop.eup %4623  ;;  %v7224_v1 = vadd.f32 1.0, %v4622_v49  ;;  %vm3371_vm13 = vmor %vm3369_vm12, %vm3370_vm11  ;;  %vm3379_vm5 = vweird.f32 %v7204_v44 }
 0x447   : > { %v3365_v11 = vmul.f32 %v7195_v30, %v3364_v3  ;;  %v7231_v57 = vadd.f32 1.0, %v4624_v0  ;;  %v7235_v59 = vpop.eup %4625  ;;  %v7285_v0 = vmul.f32 %v7062_v33, %v2962_v53 }
 0x448   : > { %v2105_v63 = vpop.f32.mrf.mxu1  ;;  %v3224_v52 = vsel %vm243_vm0, %v3178_v43, 0.0  ;;  %4629 = vrcp.f32 %v7224_v1  ;;  %v2737_v8 = vmul.f32 %v7235_v59, %v7188_v32  ;;  %vm2742_vm3 = vweird.f32 %v7235_v59 }
 0x449   : > { %v3366_v19 = vmul.f32 0.5, %v3365_v11  ;;  %v2106_v58 = vadd.f32 %v6934_v41, %v2105_v63  ;;  %v3214_v16 = vpop.xlane.xlu1 %3213  ;;  %3225 = vadd.xlane.f32.xlu0 %v3224_v52  ;;  %v3037_v2 = vpop.xlane.xlu0 %3036  ;;  %4631 = vrcp.f32 %v7231_v57  ;;  %v2729_v11 = vsel %vm7277_vm14, %v7162_v28, %v2725_v7  ;;  %vm7371_vm7 = vmor %vm2741_vm1, %vm2742_vm3 }
 0x44a   : > { %v3302_v27 = vmul.f32 %v3214_v16, %v5015_v18  ;;  %v3115_v38 = vmul.f32 %v3037_v2, %v5015_v18  ;;  %v3211_v35 = vpop.xlane.xlu2 %3210  ;;  %vm2756_vm8 = vweird.f32 %v7224_v1  ;;  %vm2771_vm10 = vweird.f32 %v7231_v57 }
 0x44b   : > { %v3367_v56 = vsub.f32 1.5, %v3366_v19  ;;  %4258 = vmatmul.msk.f32.gmra.mxu2 %vm243_vm0, %v2106_v58  ;;  %v3301_v4 = vmul.f32 %v3211_v35, %v5015_v18  ;;  %v7295_v19 = vld [vmem:[%s8419_s3 + $0xb] ss:$0 sm:$0xff] }
 0x44c   : > { %v7241_v12 = vpop.eup %4627  ;;  %v7244_v47 = vadd.f32 1e-05, %v3302_v27  ;;  %v7248_v54 = vsub.f32 %v6910_v15, %v3115_v38  ;;  %v2733_v27 = vor.u32 1.1754944e-38, %v2732_v51  ;;  %v3056_v38 = vsel %vm243_vm0, %v7228_v61, 0.0 }
 0x44d   : > { %v3368_v10 = vmul.f32 %v7195_v30, %v3367_v56  ;;  %v3374_v46 = vmul.f32 %v7241_v12, %v7204_v44  ;;  %v7261_v15 = vadd.f32 1e-05, %v3301_v4  ;;  %vm3380_vm2 = vweird.f32 %v7241_v12 }
 0x44e   : > { %4633 = vrsqrt.f32 %v7244_v47  ;;  %v3179_v3 = vmul.f32 %v7248_v54, %v7248_v54  ;;  %v7300_v2 = vpop.eup %4629  ;;  %vm7358_vm6 = vmor %vm3379_vm5, %vm3380_vm2  ;;  %vm3399_vm5 = vweird.f32 %v7244_v47 }
 0x44f   : > { %v3372_v14 = vsel %vm3371_vm13, %v7195_v30, %v3368_v10  ;;  %v3375_v24 = vmul.f32 %v7241_v12, %v3374_v46  ;;  %4635 = vrsqrt.f32 %v7261_v15  ;;  %v7305_v53 = vpop.eup %4631  ;;  %v2734_v10 = vsel %vm2731_vm15, %v2733_v27, %v2729_v11 }
 0x450   : > { %v2108_v30 = vpop.f32.mrf.mxu1  ;;  %v3683_v43 = vmul.f32 %v3372_v14, %v6827_v6  ;;  %v3227_v52 = vsel %vm243_vm0, %v3179_v3, 0.0  ;;  %v2738_v6 = vsub.f32 1.0, %v2737_v8  ;;  %v7318_v8 = vsel %vm243_vm0, %v7285_v0, 0.0 }
 0x451   : > { %v3376_v31 = vmul.f32 0.5, %v3375_v24  ;;  %v2109_v55 = vadd.f32 %v6934_v41, %v2108_v30  ;;  %v3043_v63 = vpop.xlane.xlu1 %3042  ;;  %3054 = vadd.xlane.f32.xlu0 %v3053_v50  ;;  %v3217_v5 = vpop.xlane.xlu0 %3216  ;;  %3228 = vadd.xlane.f32.xlu2 %v3227_v52  ;;  %v2752_v3 = vmul.f32 %v7300_v2, %v7224_v1  ;;  %v2767_v30 = vmul.f32 %v7305_v53, %v7231_v57 }
 0x452   : > { %v3117_v58 = vmul.f32 %v3043_v63, %v5015_v18  ;;  %v3303_v16 = vmul.f32 %v3217_v5, %v5015_v18  ;;  %v3716_v28 = vmul.f32 %v7266_v29, %v3683_v43  ;;  %v3040_v50 = vpop.xlane.xlu2 %3039  ;;  %v2739_v24 = vmul.f32 %v7235_v59, %v2738_v6 }
 0x453   : > { %4259 = vmatmul.msk.f32.gmra.mxu2 %vm243_vm0, %v2109_v55  ;;  %v3116_v35 = vmul.f32 %v3040_v50, %v5015_v18  ;;  %v3377_v46 = vsub.f32 1.5, %v3376_v31  ;;  %v2963_v11 = vmul.f32 %v2734_v10, %v7113_v9  ;;  %v2768_v27 = vsub.f32 1.0, %v2767_v30 }
 0x454   : > { %v7308_v56 = vsub.f32 %v6990_v34, %v3117_v58  ;;  %v7311_v7 = vadd.f32 1e-05, %v3303_v16  ;;  %v7313_v4 = vpop.eup %4633  ;;  %v3749_v51 = vadd.f32 %v7295_v19, %v3716_v28  ;;  %v2745_v34 = vand.u32 2147483647, %v7188_v32 }
 0x455   : > { %v7320_v14 = vpop.eup %4635  ;;  %v7327_v49 = vsub.f32 %v6998_v21, %v3116_v35  ;;  %v3378_v55 = vmul.f32 %v7241_v12, %v3377_v46  ;;  %v3394_v63 = vmul.f32 %v7313_v4, %v7244_v47  ;;  %v2740_v9 = vadd.f32 %v7235_v59, %v2739_v24 }
 0x456   : > { %v3384_v43 = vmul.f32 %v7320_v14, %v7261_v15  ;;  %4298 = vmatmul.msk.f32.vlgmr.msra.gmra.mxu3 %vm243_vm0, %v3749_v51  ;;  %4637 = vrsqrt.f32 %v7311_v7  ;;  %v3181_v21 = vmul.f32 %v7308_v56, %v7308_v56  ;;  %vm7349_vm4 = vcmp.eq.f32.partialorder %v2745_v34, 8.507059e+37 }
 0x457   : > { %v3180_v31 = vmul.f32 %v7327_v49, %v7327_v49  ;;  %v2753_v16 = vsub.f32 1.0, %v2752_v3  ;;  %v2762_v28 = vand.u32 2147483648, %v7224_v1  ;;  %v7365_v34 = vmul.f32 %v7062_v33, %v2963_v11 }
 0x458   : > { %v3385_v52 = vmul.f32 %v7320_v14, %v3384_v43  ;;  %v2111_v5 = vpop.f32.mrf.mxu1  ;;  %v3233_v24 = vsel %vm243_vm0, %v3181_v21, 0.0  ;;  %v2748_v3 = vor.u32 1.1754944e-38, %v2747_v62  ;;  %v3382_v30 = vsel %vm7358_vm6, %v7241_v12, %v3378_v55 }
 0x459   : > { %v3223_v6 = vpop.xlane.xlu1 %3222  ;;  %3057 = vadd.xlane.f32.xlu2 %v3056_v38  ;;  %v2112_v50 = vadd.f32 %v6934_v41, %v2111_v5  ;;  %v3046_v10 = vpop.xlane.xlu0 %3045  ;;  %v3230_v38 = vsel %vm243_vm0, %v3180_v31, 0.0  ;;  %v3395_v43 = vmul.f32 %v7313_v4, %v3394_v63  ;;  %3234 = vadd.xlane.f32.xlu0 %v3233_v24  ;;  %v2744_v32 = vsel %vm7371_vm7, %v7235_v59, %v2740_v9 }
 0x45a   : > { %v3220_v35 = vpop.xlane.xlu2 %3219  ;;  %v3386_v51 = vmul.f32 0.5, %v3385_v52  ;;  %3231 = vadd.xlane.f32.xlu1 %v3230_v38  ;;  %v2754_v21 = vmul.f32 %v7300_v2, %v2753_v16  ;;  %v3118_v31 = vmul.f32 %v3046_v10, %v5015_v18  ;;  %v2760_v12 = vand.u32 2147483647, %v7224_v1 }
 0x45b   : > { %v3304_v62 = vmul.f32 %v3220_v35, %v5015_v18  ;;  %4260 = vmatmul.msk.f32.gmra.mxu2 %vm243_vm0, %v2112_v50  ;;  %v2763_v55 = vor.u32 1.1754944e-38, %v2762_v28  ;;  %v2769_v63 = vmul.f32 %v7305_v53, %v2768_v27  ;;  %v3305_v52 = vmul.f32 %v3223_v6, %v5015_v18 }
 0x45c   : > { %v7380_v11 = vpop.eup %4637  ;;  %v3387_v5 = vsub.f32 1.5, %v3386_v51  ;;  %v3684_v59 = vmul.f32 %v3382_v30, %v6882_v20  ;;  %v3062_v9 = vsel %vm243_vm0, %v7365_v34, 0.0  ;;  %v2749_v16 = vsel %vm7349_vm4, %v2748_v3, %v2744_v32 }
 0x45d   : > { %v7392_v46 = vadd.f32 1e-05, %v3304_v62  ;;  %vm2757_vm9 = vweird.f32 %v7300_v2  ;;  %v3396_v50 = vmul.f32 0.5, %v3395_v43  ;;  %v3404_v28 = vmul.f32 %v7380_v11, %v7311_v7 }
 0x45e   : > { %v2755_v27 = vadd.f32 %v7300_v2, %v2754_v21  ;;  %v2775_v6 = vand.u32 2147483647, %v7231_v57  ;;  %v7406_v20 = vsub.f32 %v7065_v26, %v3118_v31  ;;  %v2770_v58 = vadd.f32 %v7305_v53, %v2769_v63  ;;  %vm7421_vm13 = vmor %vm2756_vm8, %vm2757_vm9 }
 0x45f   : > { %vm2772_vm11 = vweird.f32 %v7305_v53  ;;  %v7410_v51 = vadd.f32 1e-05, %v3305_v52  ;;  %4639 = vrsqrt.f32 %v7392_v46  ;;  %v2777_v38 = vand.u32 2147483648, %v7231_v57 }
 0x460   : > { %v3388_v44 = vmul.f32 %v7320_v14, %v3387_v5  ;;  %vm3390_vm12 = vweird.f32 %v7320_v14  ;;  %v3717_v26 = vmul.f32 %v7266_v29, %v3684_v59  ;;  %v3397_v30 = vsub.f32 1.5, %v3396_v50  ;;  %vm7430_vm14 = vmor %vm2771_vm10, %vm2772_vm11 }
 0x461   : > { %v2114_v35 = vpop.f32.mrf.mxu1  ;;  %v3052_v10 = vpop.xlane.xlu1 %3051  ;;  %v3405_v43 = vmul.f32 %v7380_v11, %v3404_v28  ;;  %3063 = vadd.xlane.f32.xlu0 %v3062_v9  ;;  %vm3389_vm15 = vweird.f32 %v7261_v15  ;;  %v2964_v63 = vmul.f32 %v2749_v16, %v7125_v25  ;;  %v2759_v57 = vsel %vm7421_vm13, %v7300_v2, %v2755_v27 }
 0x462   : > { %v3049_v24 = vpop.xlane.xlu2 %3048  ;;  %v2115_v32 = vadd.f32 %v6934_v41, %v2114_v35  ;;  %v3120_v21 = vmul.f32 %v3052_v10, %v5015_v18  ;;  %v3750_v1 = vadd.f32 %v7295_v19, %v3717_v26  ;;  %3060 = vadd.xlane.f32.xlu1 %v7318_v8  ;;  %v3182_v41 = vmul.f32 %v7406_v20, %v7406_v20  ;;  %vm7449_vm1 = vmor %vm3389_vm15, %vm3390_vm12 }
 0x463   : > { %v3119_v31 = vmul.f32 %v3049_v24, %v5015_v18  ;;  %v2774_v52 = vsel %vm7430_vm14, %v7305_v53, %v2770_v58  ;;  %4641 = vrsqrt.f32 %v7410_v51  ;;  %v3392_v25 = vsel %vm7449_vm1, %v7320_v14, %v3388_v44 }
 0x464   : > { %4261 = vmatmul.msk.f32.gmra.mxu2 %vm243_vm0, %v2115_v32  ;;  %4299 = vmatmul.msk.f32.gmra.mxu3 %vm243_vm0, %v3750_v1  ;;  %v7460_v2 = vsub.f32 %v7078_v48, %v3120_v21  ;;  %v3236_v8 = vsel %vm243_vm0, %v3182_v41, 0.0  ;;  %v2778_v59 = vor.u32 1.1754944e-38, %v2777_v38  ;;  %v3398_v9 = vmul.f32 %v7313_v4, %v3397_v30 }
 0x465   : > { %v7463_v53 = vsub.f32 %v7081_v45, %v3119_v31  ;;  %v7466_v5 = vpop.eup %4639  ;;  %vm3400_vm2 = vweird.f32 %v7313_v4  ;;  %v3406_v16 = vmul.f32 0.5, %v3405_v43  ;;  %3237 = vadd.xlane.f32.xlu2 %v3236_v8  ;;  %vm2761_vm3 = vcmp.eq.f32.partialorder %v2760_v12, 8.507059e+37  ;;  %v2305_v8 = vpop.f32.mrf.mxu2 }
 0x466   : > { %vm2776_vm4 = vcmp.eq.f32.partialorder %v2775_v6, 8.507059e+37  ;;  %v3414_v48 = vmul.f32 %v7466_v5, %v7392_v46  ;;  %v2764_v14 = vsel %vm2761_vm3, %v2763_v55, %v2759_v57  ;;  %v3685_v45 = vmul.f32 %v3392_v25, %v6967_v13  ;;  %vm7474_vm6 = vmor %vm3399_vm5, %vm3400_vm2 }
 0x467   : > { %v2779_v50 = vsel %vm2776_vm4, %v2778_v59, %v2774_v52  ;;  %v3184_v27 = vmul.f32 %v7460_v2, %v7460_v2  ;;  %v3183_v12 = vmul.f32 %v7463_v53, %v7463_v53  ;;  %v7483_v6 = vmul.f32 %v7062_v33, %v2964_v63 }
 0x468   : > { %v3402_v47 = vsel %vm7474_vm6, %v7313_v4, %v3398_v9  ;;  %v3407_v55 = vsub.f32 1.5, %v3406_v16  ;;  %v3415_v13 = vmul.f32 %v7466_v5, %v3414_v48  ;;  %v3718_v10 = vmul.f32 %v7266_v29, %v3685_v45 }
 0x469   : > { %v4642_v35 = vpop.eup %4641  ;;  %v2965_v58 = vmul.f32 %v2764_v14, %v7137_v17  ;;  %v2966_v24 = vmul.f32 %v2779_v50, %v7144_v40  ;;  %v3242_v38 = vsel %vm243_vm0, %v3184_v27, 0.0  ;;  %v3239_v44 = vsel %vm243_vm0, %v3183_v12, 0.0 }
 0x46a   : > { %3243 = vadd.xlane.f32.xlu0 %v3242_v38  ;;  %3240 = vadd.xlane.f32.xlu1 %v3239_v44  ;;  %v3751_v26 = vadd.f32 %v7295_v19, %v3718_v10  ;;  %v3065_v4 = vsel %vm243_vm0, %v7483_v6, 0.0  ;;  %v3686_v3 = vmul.f32 %v3402_v47, %v6925_v42  ;;  %v3408_v30 = vmul.f32 %v7380_v11, %v3407_v55 }
 0x46b   : > { %vm3410_vm7 = vweird.f32 %v7380_v11  ;;  %v3424_v17 = vmul.f32 %v4642_v35, %v7410_v51  ;;  %v3416_v40 = vmul.f32 0.5, %v3415_v13  ;;  %v7503_v43 = vmul.f32 %v7062_v33, %v2966_v24 }
 0x46c   : > { %4300 = vmatmul.msk.f32.gmra.mxu3 %vm243_vm0, %v3751_v26  ;;  %v7506_v32 = vmul.f32 %v7062_v33, %v2965_v58  ;;  %vm3409_vm8 = vweird.f32 %v7311_v7  ;;  %v3719_v42 = vmul.f32 %v7266_v29, %v3686_v3  ;;  %vm3420_vm10 = vweird.f32 %v7466_v5 }
 0x46d   : > { %3066 = vadd.xlane.f32.xlu2 %v3065_v4  ;;  %vm3411_vm9 = vmor %vm3409_vm8, %vm3410_vm7  ;;  %v3425_v62 = vmul.f32 %v4642_v35, %v3424_v17  ;;  %v3417_v1 = vsub.f32 1.5, %v3416_v40  ;;  %v3071_v31 = vsel %vm243_vm0, %v7503_v43, 0.0  ;;  %vm3419_vm11 = vweird.f32 %v7392_v46 }
 0x46e   : > { %v3412_v21 = vsel %vm3411_vm9, %v7380_v11, %v3408_v30  ;;  %v3068_v41 = vsel %vm243_vm0, %v7506_v32, 0.0  ;;  %v3752_v63 = vadd.f32 %v7295_v19, %v3719_v42  ;;  %vm3421_vm12 = vmor %vm3419_vm11, %vm3420_vm10  ;;  %vm3430_vm13 = vweird.f32 %v4642_v35 }
 0x46f   : > { %v3687_v57 = vmul.f32 %v3412_v21, %v6986_v37  ;;  %v3426_v7 = vmul.f32 0.5, %v3425_v62  ;;  %v3418_v52 = vmul.f32 %v7466_v5, %v3417_v1  ;;  %vm3429_vm14 = vweird.f32 %v7410_v51 }
 0x470   : > { %vm3431_vm15 = vmor %vm3429_vm14, %vm3430_vm13  ;;  %v7535_v45 = vadd.f32 %v7096_v60, %v2305_v8 }
 0x471   : > { %v3720_v11 = vmul.f32 %v7266_v29, %v3687_v57  ;;  %v3427_v15 = vsub.f32 1.5, %v3426_v7  ;;  %v3422_v25 = vsel %vm3421_vm12, %v7466_v5, %v3418_v52  ;;  %v2308_v5 = vpop.f32.mrf.mxu2 }
 0x472   : > { %3072 = vadd.xlane.f32.xlu0 %v3071_v31  ;;  %3069 = vadd.xlane.f32.xlu1 %v3068_v41  ;;  %v3688_v37 = vmul.f32 %v3422_v25, %v7043_v22  ;;  %v4283_v28 = vmul.f32 -1.442695, %v7535_v45  ;;  %v7539_v27 = vadd.f32 %v7096_v60, %v2308_v5 }
 0x473   : > { %v3753_v59 = vadd.f32 %v7295_v19, %v3720_v11  ;;  %v3428_v9 = vmul.f32 %v4642_v35, %v3427_v15 }
 0x474   : > { %4301 = vmatmul.msk.f32.gmra.mxu3 %vm243_vm0, %v3752_v63  ;;  %v3721_v46 = vmul.f32 %v7266_v29, %v3688_v37  ;;  %4643 = vpow2.f32 %v4283_v28 }
 0x475   : > { %v3432_v16 = vsel %vm3431_vm15, %v4642_v35, %v3428_v9 }
 0x476   : > { %v3754_v48 = vadd.f32 %v7295_v19, %v3721_v46  ;;  %v3689_v14 = vmul.f32 %v3432_v16, %v7024_v23  ;;  %v4284_v23 = vmul.f32 -1.442695, %v7539_v27 }
 0x478   : > { %v3722_v50 = vmul.f32 %v7266_v29, %v3689_v14  ;;  %4645 = vpow2.f32 %v4284_v23 }
 0x479   : > { %v2311_v51 = vpop.f32.mrf.mxu2 }
 0x47a   : > { %v3755_v22 = vadd.f32 %v7295_v19, %v3722_v50  ;;  %v4644_v35 = vpop.eup %4643  ;;  %v7543_v47 = vadd.f32 %v7096_v60, %v2311_v51 }
 0x47b   : > { %v2455_v55 = vadd.f32 1.0, %v4644_v35 }
 0x47c   : > { %4302 = vmatmul.msk.f32.gmra.mxu3 %vm243_vm0, %v3753_v59  ;;  %v4285_v58 = vmul.f32 -1.442695, %v7543_v47 }
 0x47d   : > { %4647 = vrcp.f32 %v2455_v55  ;;  %vm2786_vm2 = vweird.f32 %v2455_v55  ;;  %v2792_v8 = vand.u32 2147483648, %v2455_v55  ;;  %v2790_v9 = vand.u32 2147483647, %v2455_v55 }
 0x47e   : > { %v4646_v10 = vpop.eup %4645  ;;  %4649 = vpow2.f32 %v4285_v58 }
 0x47f   : > { %v7550_v44 = vadd.f32 1.0, %v4646_v10  ;;  %vm2791_vm4 = vcmp.eq.f32.partialorder %v2790_v9, 8.507059e+37 }
 0x481   : > { %v2314_v12 = vpop.f32.mrf.mxu2  ;;  %vm2801_vm6 = vweird.f32 %v7550_v44  ;;  %v2807_v35 = vand.u32 2147483648, %v7550_v44  ;;  %v2805_v10 = vand.u32 2147483647, %v7550_v44 }
 0x482   : > { %v7546_v13 = vadd.f32 %v7096_v60, %v2314_v12 }
 0x483   : > { %v4648_v26 = vpop.eup %4647  ;;  %vm2806_vm8 = vcmp.eq.f32.partialorder %v2805_v10, 8.507059e+37 }
 0x484   : > { %4303 = vmatmul.msk.f32.gmra.mxu3 %vm243_vm0, %v3754_v48  ;;  %v4286_v24 = vmul.f32 -1.442695, %v7546_v13  ;;  %v4650_v4 = vpop.eup %4649  ;;  %v2782_v3 = vmul.f32 %v4648_v26, %v2455_v55  ;;  %vm2787_vm1 = vweird.f32 %v4648_v26 }
 0x485   : > { %v7555_v42 = vadd.f32 1.0, %v4650_v4  ;;  %vm2788_vm3 = vmor %vm2786_vm2, %vm2787_vm1 }
 0x486   : > { %4651 = vpow2.f32 %v4286_v24  ;;  %v2783_v62 = vsub.f32 1.0, %v2782_v3 }
 0x487   : > { %4653 = vrcp.f32 %v7550_v44  ;;  %vm2816_vm9 = vweird.f32 %v7555_v42 }
 0x488   : > { %4655 = vrcp.f32 %v7555_v42  ;;  %v2784_v63 = vmul.f32 %v4648_v26, %v2783_v62 }
 0x489   : > { %v2317_v38 = vpop.f32.mrf.mxu2 }
 0x48a   : > { %v7558_v21 = vadd.f32 %v7096_v60, %v2317_v38  ;;  %v2785_v11 = vadd.f32 %v4648_v26, %v2784_v63  ;;  %v2822_v63 = vand.u32 2147483648, %v7555_v42 }
 0x48c   : > { %4304 = vmatmul.msk.f32.gmra.mxu3 %vm243_vm0, %v3755_v22  ;;  %v4652_v30 = vpop.eup %4651  ;;  %v4287_v41 = vmul.f32 -1.442695, %v7558_v21  ;;  %v2789_v14 = vsel %vm2788_vm3, %v4648_v26, %v2785_v11  ;;  %v2793_v22 = vor.u32 1.1754944e-38, %v2792_v8 }
 0x48d   : > { %v7553_v40 = vpop.eup %4653  ;;  %v7560_v1 = vadd.f32 1.0, %v4652_v30 }
 0x48e   : > { %v2797_v31 = vmul.f32 %v7553_v40, %v7550_v44  ;;  %v7568_v25 = vpop.eup %4655  ;;  %vm2802_vm5 = vweird.f32 %v7553_v40  ;;  %v2794_v12 = vsel %vm2791_vm4, %v2793_v22, %v2789_v14  ;;  %v2823_v14 = vor.u32 1.1754944e-38, %v2822_v63 }
 0x48f   : > { %4657 = vrcp.f32 %v7560_v1  ;;  %v2812_v5 = vmul.f32 %v7568_v25, %v7555_v42  ;;  %vm7596_vm7 = vmor %vm2801_vm6, %vm2802_vm5  ;;  %v2967_v62 = vmul.f32 %v2794_v12, %v7535_v45  ;;  %vm2817_vm10 = vweird.f32 %v7568_v25 }
 0x490   : > { %v2798_v57 = vsub.f32 1.0, %v2797_v31  ;;  %4659 = vpow2.f32 %v4287_v41  ;;  %v2808_v41 = vor.u32 1.1754944e-38, %v2807_v35  ;;  %vm2831_vm11 = vweird.f32 %v7560_v1  ;;  %vm7642_vm14 = vmor %vm2816_vm9, %vm2817_vm10 }
 0x491   : > { %v2320_v17 = vpop.f32.mrf.mxu2  ;;  %v2813_v58 = vsub.f32 1.0, %v2812_v5  ;;  %v7625_v8 = vmul.f32 %v7062_v33, %v2967_v62  ;;  %v2835_v35 = vand.u32 2147483647, %v7560_v1 }
 0x492   : > { %v7571_v59 = vadd.f32 %v7096_v60, %v2320_v17  ;;  %v2799_v46 = vmul.f32 %v7553_v40, %v2798_v57 }
 0x493   : > { %vm2836_vm4 = vcmp.eq.f32.partialorder %v2835_v35, 8.507059e+37 }
 0x494   : > { %v4288_v28 = vmul.f32 -1.442695, %v7571_v59 }
 0x495   : > { %v7573_v37 = vpop.eup %4657 }
 0x496   : > { %v4660_v50 = vpop.eup %4659  ;;  %v2827_v51 = vmul.f32 %v7573_v37, %v7560_v1  ;;  %vm2832_vm12 = vweird.f32 %v7573_v37 }
 0x497   : > { %v7593_v24 = vadd.f32 1.0, %v4660_v50  ;;  %vm7654_vm15 = vmor %vm2831_vm11, %vm2832_vm12 }
 0x498   : > { %v2828_v3 = vsub.f32 1.0, %v2827_v51 }
 0x499   : > { %v2323_v7 = vpop.f32.mrf.mxu2  ;;  %vm2846_vm9 = vweird.f32 %v7593_v24 }
 0x49a   : > { %v7577_v16 = vadd.f32 %v7096_v60, %v2323_v7  ;;  %v2800_v60 = vadd.f32 %v7553_v40, %v2799_v46  ;;  %v2820_v46 = vand.u32 2147483647, %v7555_v42 }
 0x49c   : > { %v4289_v23 = vmul.f32 -1.442695, %v7577_v16  ;;  %v2804_v44 = vsel %vm7596_vm7, %v7553_v40, %v2800_v60  ;;  %vm2821_vm3 = vcmp.eq.f32.partialorder %v2820_v46, 8.507059e+37 }
 0x49d   : > { %v2809_v40 = vsel %vm2806_vm8, %v2808_v41, %v2804_v44 }
 0x49e   : > { %v2968_v22 = vmul.f32 %v2809_v40, %v7539_v27 }
 0x4bc   : > { %v3226_v52 = vpop.xlane.xlu0 %3225 }
 0x4bd   : > { %v3306_v15 = vmul.f32 %v3226_v52, %v5015_v18  ;;  %v2814_v52 = vmul.f32 %v7568_v25, %v2813_v58  ;;  %v3074_v58 = vsel %vm243_vm0, %v7625_v8, 0.0 }
 0x4bf   : > { %v7579_v48 = vadd.f32 1e-05, %v3306_v15  ;;  %v2815_v51 = vadd.f32 %v7568_v25, %v2814_v52 }
 0x4c1   : > { %4661 = vrsqrt.f32 %v7579_v48  ;;  %vm3439_vm1 = vweird.f32 %v7579_v48  ;;  %v2819_v62 = vsel %vm7642_vm14, %v7568_v25, %v2815_v51 }
 0x4c2   : > { %4663 = vpow2.f32 %v4288_v28 }
 0x4c3   : > { %4665 = vpow2.f32 %v4289_v23 }
 0x4c4   : > { %v3055_v55 = vpop.xlane.xlu0 %3054  ;;  %v3229_v38 = vpop.xlane.xlu2 %3228  ;;  %4667 = vrcp.f32 %v7593_v24 }
 0x4c5   : > { %v3121_v26 = vmul.f32 %v3055_v55, %v5015_v18  ;;  %v3307_v30 = vmul.f32 %v3229_v38, %v5015_v18  ;;  %v2837_v55 = vand.u32 2147483648, %v7560_v1 }
 0x4c7   : > { %v7601_v17 = vpop.eup %4661  ;;  %v7608_v31 = vsub.f32 %v7207_v36, %v3121_v26  ;;  %v7613_v7 = vadd.f32 1e-05, %v3307_v30  ;;  %v2829_v36 = vmul.f32 %v7573_v37, %v2828_v3 }
 0x4c8   : > { %v3434_v57 = vmul.f32 %v7601_v17, %v7579_v48  ;;  %v4664_v9 = vpop.eup %4663  ;;  %vm3440_vm13 = vweird.f32 %v7601_v17 }
 0x4c9   : > { %v3185_v45 = vmul.f32 %v7608_v31, %v7608_v31  ;;  %4669 = vrsqrt.f32 %v7613_v7  ;;  %v4666_v50 = vpop.eup %4665  ;;  %v2830_v33 = vadd.f32 %v7573_v37, %v2829_v36  ;;  %v7648_v10 = vadd.f32 1.0, %v4664_v9  ;;  %vm3441_vm2 = vmor %vm3439_vm1, %vm3440_vm13 }
 0x4ca   : > { %v3435_v11 = vmul.f32 %v7601_v17, %v3434_v57  ;;  %v7636_v12 = vpop.eup %4667  ;;  %v7658_v42 = vadd.f32 1.0, %v4666_v50  ;;  %v2838_v36 = vor.u32 1.1754944e-38, %v2837_v55  ;;  %vm3449_vm7 = vweird.f32 %v7613_v7 }
 0x4cb   : > { %v3245_v15 = vsel %vm243_vm0, %v3185_v45, 0.0  ;;  %v2842_v48 = vmul.f32 %v7636_v12, %v7593_v24  ;;  %4671 = vrcp.f32 %v7648_v10  ;;  %vm2847_vm6 = vweird.f32 %v7636_v12 }
 0x4cc   : > { %v3436_v5 = vmul.f32 0.5, %v3435_v11  ;;  %3246 = vadd.xlane.f32.xlu2 %v3245_v15  ;;  %v3058_v28 = vpop.xlane.xlu2 %3057  ;;  %v3235_v30 = vpop.xlane.xlu0 %3234  ;;  %4673 = vrcp.f32 %v7658_v42  ;;  %vm7786_vm10 = vmor %vm2846_vm9, %vm2847_vm6  ;;  %vm2861_vm12 = vweird.f32 %v7648_v10  ;;  %vm2876_vm14 = vweird.f32 %v7658_v42 }
 0x4cd   : > { %v3122_v23 = vmul.f32 %v3058_v28, %v5015_v18  ;;  %v3232_v3 = vpop.xlane.xlu1 %3231  ;;  %v3309_v63 = vmul.f32 %v3235_v30, %v5015_v18 }
 0x4ce   : > { %v3437_v60 = vsub.f32 1.5, %v3436_v5  ;;  %v3308_v41 = vmul.f32 %v3232_v3, %v5015_v18  ;;  %v2843_v5 = vsub.f32 1.0, %v2842_v48 }
 0x4cf   : > { %v7652_v38 = vpop.eup %4669  ;;  %v7663_v1 = vsub.f32 %v7228_v61, %v3122_v23  ;;  %v2834_v61 = vsel %vm7654_vm15, %v7573_v37, %v2830_v33  ;;  %v7688_v37 = vadd.f32 1e-05, %v3309_v63 }
 0x4d0   : > { %v3438_v4 = vmul.f32 %v7601_v17, %v3437_v60  ;;  %v3444_v44 = vmul.f32 %v7652_v38, %v7613_v7  ;;  %v7684_v45 = vadd.f32 1e-05, %v3308_v41  ;;  %v2839_v15 = vsel %vm2836_vm4, %v2838_v36, %v2834_v61 }
 0x4d1   : > { %v3186_v25 = vmul.f32 %v7663_v1, %v7663_v1  ;;  %v7708_v33 = vpop.eup %4671  ;;  %v2970_v23 = vmul.f32 %v2839_v15, %v7546_v13  ;;  %v2852_v61 = vand.u32 2147483648, %v7593_v24  ;;  %vm3450_vm5 = vweird.f32 %v7652_v38 }
 0x4d2   : > { %v3442_v57 = vsel %vm3441_vm2, %v7601_v17, %v3438_v4  ;;  %v3445_v52 = vmul.f32 %v7652_v38, %v3444_v44  ;;  %4675 = vrsqrt.f32 %v7684_v45  ;;  %v2824_v17 = vsel %vm2821_vm3, %v2823_v14, %v2819_v62  ;;  %v7705_v14 = vld [vmem:[%s8419_s3 + $0xc] ss:$0 sm:$0xff]  ;;  %v7713_v35 = vpop.eup %4673  ;;  %vm7774_vm8 = vmor %vm3449_vm7, %vm3450_vm5 }
 0x4d3   : > { %v3690_v40 = vmul.f32 %v3442_v57, %v7202_v39  ;;  %v3248_v11 = vsel %vm243_vm0, %v3186_v25, 0.0  ;;  %v7696_v39 = vld [vmem:[%s8419_s3 + $0x9] ss:$0 sm:$0xff]  ;;  %4677 = vrsqrt.f32 %v7688_v37  ;;  %v2969_v60 = vmul.f32 %v2824_v17, %v7543_v47 }
 0x4d4   : > { %3075 = vadd.xlane.f32.xlu2 %v3074_v58  ;;  %3249 = vadd.xlane.f32.xlu1 %v3248_v11  ;;  %v3446_v50 = vmul.f32 0.5, %v3445_v52  ;;  %v7699_v51 = vmul.f32 %v7696_v39, %v2968_v22  ;;  %v3064_v46 = vpop.xlane.xlu0 %3063  ;;  %v2844_v4 = vmul.f32 %v7636_v12, %v2843_v5  ;;  %v2857_v13 = vmul.f32 %v7708_v33, %v7648_v10  ;;  %v4750_v11 = vld [vmem:[%s4850_s29] sm:$0xff] }
 0x4d5   : > { %v3723_v9 = vmul.f32 %v7266_v29, %v3690_v40  ;;  %v3061_v27 = vpop.xlane.xlu1 %3060  ;;  %v3124_v22 = vmul.f32 %v3064_v46, %v5015_v18  ;;  %v7736_v48 = vmul.f32 %v7696_v39, %v2969_v60  ;;  %v7739_v57 = vmul.f32 %v7696_v39, %v2970_v23 }
 0x4d6   : > { %v3123_v55 = vmul.f32 %v3061_v27, %v5015_v18  ;;  %v3447_v3 = vsub.f32 1.5, %v3446_v50  ;;  %v3077_v47 = vsel %vm243_vm0, %v7699_v51, 0.0  ;;  %v2845_v5 = vadd.f32 %v7636_v12, %v2844_v4 }
 0x4d7   : > { %v3756_v28 = vadd.f32 %v7295_v19, %v3723_v9  ;;  %v7721_v30 = vsub.f32 %v7365_v34, %v3124_v22  ;;  %v2850_v34 = vand.u32 2147483647, %v7593_v24  ;;  %v2858_v50 = vsub.f32 1.0, %v2857_v13 }
 0x4d8   : > { %v7717_v26 = vpop.eup %4675  ;;  %v7730_v44 = vsub.f32 %v7285_v0, %v3123_v55  ;;  %v3238_v41 = vpop.xlane.xlu2 %3237  ;;  %v2872_v0 = vmul.f32 %v7713_v35, %v7658_v42  ;;  %v3448_v36 = vmul.f32 %v7652_v38, %v3447_v3  ;;  %v3080_v24 = vsel %vm243_vm0, %v7736_v48, 0.0 }
 0x4d9   : > { %v3900_v58 = vpop.f32.mrf.mxu3  ;;  %4305 = vmatmul.msk.f32.gmra.mxu3 %vm243_vm0, %v3756_v28  ;;  %v3454_v62 = vmul.f32 %v7717_v26, %v7684_v45  ;;  %v7741_v25 = vpop.eup %4677  ;;  %v3310_v40 = vmul.f32 %v3238_v41, %v5015_v18  ;;  %v3188_v9 = vmul.f32 %v7721_v30, %v7721_v30  ;;  %vm7790_vm11 = vcmp.eq.f32.partialorder %v2850_v34, 8.507059e+37 }
 0x4da   : > { %v3901_v63 = vadd.f32 %v7705_v14, %v3900_v58  ;;  %v3187_v15 = vmul.f32 %v7730_v44, %v7730_v44  ;;  %v3464_v28 = vmul.f32 %v7741_v25, %v7688_v37  ;;  %v2873_v58 = vsub.f32 1.0, %v2872_v0 }
 0x4db   : > { %v3455_v52 = vmul.f32 %v7717_v26, %v3454_v62  ;;  %v7763_v46 = vadd.f32 1e-05, %v3310_v40  ;;  %v3254_v23 = vsel %vm243_vm0, %v3188_v9, 0.0  ;;  %v3452_v4 = vsel %vm7774_vm8, %v7652_v38, %v3448_v36 }
 0x4dc   : > { %3078 = vadd.xlane.f32.xlu1 %v3077_v47  ;;  %v3996_v17 = vadd.f32 %v4750_v11, %v3901_v63  ;;  %v3251_v60 = vsel %vm243_vm0, %v3187_v15, 0.0  ;;  %3255 = vadd.xlane.f32.xlu2 %v3254_v23  ;;  %v2853_v62 = vor.u32 1.1754944e-38, %v2852_v61  ;;  %v3083_v38 = vsel %vm243_vm0, %v7739_v57, 0.0 }
 0x4dd   : > { %v3456_v22 = vmul.f32 0.5, %v3455_v52  ;;  %4679 = vrsqrt.f32 %v7763_v46  ;;  %3252 = vadd.xlane.f32.xlu0 %v3251_v60  ;;  %v3241_v7 = vpop.xlane.xlu1 %3240  ;;  %v3244_v55 = vpop.xlane.xlu0 %3243  ;;  %v2849_v63 = vsel %vm7786_vm10, %v7636_v12, %v2845_v5  ;;  %v2859_v0 = vmul.f32 %v7708_v33, %v2858_v50 }
 0x4de   : > { %4028 = vst.msk [vmem:[%s7753_s10] sm:$0xff] %vm243_vm0, %v3996_v17  ;;  %v3311_v3 = vmul.f32 %v3241_v7, %v5015_v18  ;;  %v3465_v34 = vmul.f32 %v7741_v25, %v3464_v28  ;;  %v3691_v36 = vmul.f32 %v3452_v4, %v7248_v54  ;;  %v2865_v11 = vand.u32 2147483647, %v7648_v10 }
 0x4df   : > { %v3457_v52 = vsub.f32 1.5, %v3456_v22  ;;  %v2867_v17 = vand.u32 2147483648, %v7648_v10  ;;  %v2874_v15 = vmul.f32 %v7713_v35, %v2873_v58  ;;  %v3312_v12 = vmul.f32 %v3244_v55, %v5015_v18 }
 0x4e0   : > { %v3067_v41 = vpop.xlane.xlu2 %3066  ;;  %v7804_v40 = vadd.f32 1e-05, %v3311_v3  ;;  %v2854_v5 = vsel %vm7790_vm11, %v2853_v62, %v2849_v63  ;;  %vm2862_vm13 = vweird.f32 %v7708_v33  ;;  %v2860_v54 = vadd.f32 %v7708_v33, %v2859_v0  ;;  %v4752_v63 = vld [vmem:[%s4850_s29 + $0x10] sm:$0xff] }
 0x4e1   : > { %v3125_v61 = vmul.f32 %v3067_v41, %v5015_v18  ;;  %v3466_v28 = vmul.f32 0.5, %v3465_v34  ;;  %v3458_v23 = vmul.f32 %v7717_v26, %v3457_v52  ;;  %vm3460_vm15 = vweird.f32 %v7717_v26  ;;  %vm7854_vm4 = vmor %vm2861_vm12, %vm2862_vm13  ;;  %v4751_v52 = vld [vmem:[%s4850_s29 + $0x8] sm:$0xff] }
 0x4e2   : > { %4681 = vrsqrt.f32 %v7804_v40  ;;  %v3724_v27 = vmul.f32 %v7266_v29, %v3691_v36  ;;  %v2875_v7 = vadd.f32 %v7713_v35, %v2874_v15  ;;  %vm2877_vm1 = vweird.f32 %v7713_v35 }
 0x4e3   : > { %v7812_v9 = vpop.eup %4679  ;;  %v7819_v50 = vsub.f32 %v7483_v6, %v3125_v61  ;;  %v7832_v55 = vadd.f32 1e-05, %v3312_v12  ;;  %vm3459_vm2 = vweird.f32 %v7684_v45  ;;  %v2971_v41 = vmul.f32 %v2854_v5, %v7558_v21  ;;  %vm7872_vm5 = vmor %vm2876_vm14, %vm2877_vm1 }
 0x4e4   : > { %v3474_v60 = vmul.f32 %v7812_v9, %v7763_v46  ;;  %3084 = vadd.xlane.f32.xlu2 %v3083_v38  ;;  %v3757_v62 = vadd.f32 %v7295_v19, %v3724_v27  ;;  %v2882_v38 = vand.u32 2147483648, %v7658_v42  ;;  %vm7844_vm3 = vmor %vm3459_vm2, %vm3460_vm15  ;;  %v3467_v0 = vsub.f32 1.5, %v3466_v28 }
 0x4e5   : > { %3081 = vadd.xlane.f32.xlu0 %v3080_v24  ;;  %v3070_v22 = vpop.xlane.xlu1 %3069  ;;  %v3189_v6 = vmul.f32 %v7819_v50, %v7819_v50  ;;  %v3073_v3 = vpop.xlane.xlu0 %3072  ;;  %v2880_v24 = vand.u32 2147483647, %v7658_v42  ;;  %v3462_v34 = vsel %vm7844_vm3, %v7717_v26, %v3458_v23  ;;  %v2864_v10 = vsel %vm7854_vm4, %v7708_v33, %v2860_v54 }
 0x4e6   : > { %v3126_v4 = vmul.f32 %v3070_v22, %v5015_v18  ;;  %v3475_v47 = vmul.f32 %v7812_v9, %v3474_v60  ;;  %4306 = vmatmul.msk.f32.gmra.mxu3 %vm243_vm0, %v3757_v62  ;;  %v3127_v15 = vmul.f32 %v3073_v3, %v5015_v18  ;;  %4683 = vrsqrt.f32 %v7832_v55 }
 0x4e7   : > { %v3903_v58 = vpop.f32.mrf.mxu3  ;;  %v3257_v36 = vsel %vm243_vm0, %v3189_v6, 0.0  ;;  %v2879_v5 = vsel %vm7872_vm5, %v7713_v35, %v2875_v7  ;;  %v2868_v54 = vor.u32 1.1754944e-38, %v2867_v17  ;;  %v2883_v60 = vor.u32 1.1754944e-38, %v2882_v38 }
 0x4e8   : > { %v3904_v13 = vadd.f32 %v7705_v14, %v3903_v58  ;;  %v7848_v45 = vpop.eup %4681  ;;  %v7878_v26 = vsub.f32 %v7506_v32, %v3126_v4  ;;  %3258 = vadd.xlane.f32.xlu1 %v3257_v36  ;;  %v3476_v28 = vmul.f32 0.5, %v3475_v47  ;;  %v7888_v42 = vsub.f32 %v7503_v43, %v3127_v15 }
 0x4e9   : > { %v3484_v33 = vmul.f32 %v7848_v45, %v7804_v40  ;;  %v3692_v23 = vmul.f32 %v3462_v34, %v7327_v49  ;;  %v7892_v32 = vmul.f32 %v7696_v39, %v2971_v41  ;;  %vm2866_vm6 = vcmp.eq.f32.partialorder %v2865_v11, 8.507059e+37 }
 0x4ea   : > { %v3997_v61 = vadd.f32 %v4751_v52, %v3904_v13  ;;  %vm2881_vm7 = vcmp.eq.f32.partialorder %v2880_v24, 8.507059e+37  ;;  %v3468_v35 = vmul.f32 %v7741_v25, %v3467_v0  ;;  %vm3470_vm8 = vweird.f32 %v7741_v25 }
 0x4eb   : > { %v2869_v27 = vsel %vm2866_vm6, %v2868_v54, %v2864_v10  ;;  %v2884_v22 = vsel %vm2881_vm7, %v2883_v60, %v2879_v5  ;;  %v3190_v6 = vmul.f32 %v7878_v26, %v7878_v26  ;;  %v3191_v43 = vmul.f32 %v7888_v42, %v7888_v42  ;;  %v7950_v10 = vld [vmem:[%s8419_s3 + $0xb] ss:$0 sm:$0xff]  ;;  %v4755_v60 = vld [vmem:[%s4850_s29 + $0x18] sm:$0xff] }
 0x4ec   : > { %4029 = vst.msk [vmem:[%s7753_s10 + $0x8] sm:$0xff] %vm243_vm0, %v3997_v61  ;;  %vm3469_vm9 = vweird.f32 %v7688_v37  ;;  %v3477_v49 = vsub.f32 1.5, %v3476_v28  ;;  %v3485_v17 = vmul.f32 %v7848_v45, %v3484_v33  ;;  %v3725_v11 = vmul.f32 %v7266_v29, %v3692_v23  ;;  %v7903_v7 = vpop.eup %4683 }
 0x4ed   : > { %vm7905_vm10 = vmor %vm3469_vm9, %vm3470_vm8  ;;  %v3086_v3 = vsel %vm243_vm0, %v7892_v32, 0.0  ;;  %v2972_v47 = vmul.f32 %v2869_v27, %v7571_v59  ;;  %v2973_v37 = vmul.f32 %v2884_v22, %v7577_v16  ;;  %vm3480_vm11 = vweird.f32 %v7812_v9 }
 0x4ee   : > { %v3472_v13 = vsel %vm7905_vm10, %v7741_v25, %v3468_v35  ;;  %v3758_v62 = vadd.f32 %v7295_v19, %v3725_v11  ;;  %v3260_v41 = vsel %vm243_vm0, %v3190_v6, 0.0  ;;  %v3263_v24 = vsel %vm243_vm0, %v3191_v43, 0.0  ;;  %v7935_v19 = vld [vmem:[%s8419_s3 + $0xa] ss:$0 sm:$0xff] }
 0x4ef   : > { %v3906_v4 = vpop.f32.mrf.mxu3  ;;  %v3478_v59 = vmul.f32 %v7812_v9, %v3477_v49  ;;  %v3486_v38 = vmul.f32 0.5, %v3485_v17  ;;  %v3494_v16 = vmul.f32 %v7903_v7, %v7832_v55  ;;  %3261 = vadd.xlane.f32.xlu0 %v3260_v41  ;;  %3264 = vadd.xlane.f32.xlu2 %v3263_v24  ;;  %v3693_v0 = vmul.f32 %v3472_v13, %v7308_v56  ;;  %v4757_v13 = vld [vmem:[%s4850_s29 + $0x28] sm:$0xff] }
 0x4f0   : > { %v3907_v29 = vadd.f32 %v7705_v14, %v3906_v4  ;;  %3087 = vadd.xlane.f32.xlu1 %v3086_v3  ;;  %4307 = vmatmul.msk.f32.gmra.mxu3 %vm243_vm0, %v3758_v62  ;;  %vm3479_vm12 = vweird.f32 %v7763_v46  ;;  %v7939_v34 = vmul.f32 %v7696_v39, %v2972_v47  ;;  %v7942_v56 = vmul.f32 %v7696_v39, %v2973_v37 }
 0x4f1   : > { %vm3481_vm13 = vmor %vm3479_vm12, %vm3480_vm11  ;;  %v3726_v21 = vmul.f32 %v7935_v19, %v3693_v0  ;;  %v3487_v52 = vsub.f32 1.5, %v3486_v38  ;;  %v3495_v61 = vmul.f32 %v7903_v7, %v3494_v16  ;;  %vm3490_vm14 = vweird.f32 %v7848_v45 }
 0x4f2   : > { %v3998_v25 = vadd.f32 %v4752_v63, %v3907_v29  ;;  %v3482_v46 = vsel %vm3481_vm13, %v7812_v9, %v3478_v59  ;;  %v3089_v5 = vsel %vm243_vm0, %v7939_v34, 0.0  ;;  %v3092_v9 = vsel %vm243_vm0, %v7942_v56, 0.0  ;;  %v4758_v59 = vld [vmem:[%s8419_s3 + $0x8] ss:$0 sm:$0xff] }
 0x4f3   : > { %v3759_v12 = vadd.f32 %v7950_v10, %v3726_v21  ;;  %v3694_v28 = vmul.f32 %v3482_v46, %v7406_v20  ;;  %v3488_v33 = vmul.f32 %v7848_v45, %v3487_v52  ;;  %v3496_v54 = vmul.f32 0.5, %v3495_v61 }
 0x4f4   : > { %4030 = vst.msk [vmem:[%s7753_s10 + $0x10] sm:$0xff] %vm243_vm0, %v3998_v25  ;;  %vm3489_vm15 = vweird.f32 %v7804_v40  ;;  %vm3500_vm2 = vweird.f32 %v7903_v7  ;;  %v4756_v40 = vld [vmem:[%s4850_s29 + $0x20] sm:$0xff]  ;;  %vm3499_vm3 = vweird.f32 %v7832_v55 }
 0x4f5   : > { %vm3491_vm1 = vmor %vm3489_vm15, %vm3490_vm14  ;;  %v3727_v20 = vmul.f32 %v7935_v19, %v3694_v28  ;;  %v3497_v27 = vsub.f32 1.5, %v3496_v54 }
 0x4f6   : > { %v3492_v35 = vsel %vm3491_vm1, %v7848_v45, %v3488_v33  ;;  %vm3501_vm4 = vmor %vm3499_vm3, %vm3500_vm2 }
 0x4f7   : > { %v3909_v36 = vpop.f32.mrf.mxu3  ;;  %3090 = vadd.xlane.f32.xlu0 %v3089_v5  ;;  %3093 = vadd.xlane.f32.xlu2 %v3092_v9  ;;  %v3760_v43 = vadd.f32 %v7950_v10, %v3727_v20  ;;  %v3695_v49 = vmul.f32 %v3492_v35, %v7463_v53  ;;  %v3498_v17 = vmul.f32 %v7903_v7, %v3497_v27  ;;  %v2326_v53 = vpop.f32.mrf.mxu2 }
 0x4f8   : > { %v3910_v15 = vadd.f32 %v7705_v14, %v3909_v36  ;;  %4308 = vmatmul.msk.f32.gmra.mxu3 %vm243_vm0, %v3759_v12  ;;  %v7992_v38 = vadd.f32 %v4758_v59, %v2326_v53 }
 0x4f9   : > { %v3728_v45 = vmul.f32 %v7935_v19, %v3695_v49  ;;  %v3502_v58 = vsel %vm3501_vm4, %v7903_v7, %v3498_v17 }
 0x4fa   : > { %v3999_v23 = vadd.f32 %v4755_v60, %v3910_v15  ;;  %v3696_v37 = vmul.f32 %v3502_v58, %v7460_v2  ;;  %v4759_v2 = vld [vmem:[%s4850_s29 + $0x30] sm:$0xff]  ;;  %v4290_v63 = vmul.f32 -1.442695, %v7992_v38 }
 0x4fb   : > { %v3761_v47 = vadd.f32 %v7950_v10, %v3728_v45 }
 0x4fc   : > { %4031 = vst.msk [vmem:[%s7753_s10 + $0x18] sm:$0xff] %vm243_vm0, %v3999_v23  ;;  %v3729_v55 = vmul.f32 %v7935_v19, %v3696_v37  ;;  %4685 = vpow2.f32 %v4290_v63 }
 0x4fe   : > { %v3762_v24 = vadd.f32 %v7950_v10, %v3729_v55 }
 0x4ff   : > { %v3912_v22 = vpop.f32.mrf.mxu3  ;;  %v2329_v41 = vpop.f32.mrf.mxu2 }
 0x500   : > { %v3913_v6 = vadd.f32 %v7705_v14, %v3912_v22  ;;  %4309 = vmatmul.msk.f32.gmra.mxu3 %vm243_vm0, %v3760_v43  ;;  %v7999_v25 = vadd.f32 %v4758_v59, %v2329_v41 }
 0x502   : > { %v4000_v11 = vadd.f32 %v4756_v40, %v3913_v6  ;;  %v4291_v21 = vmul.f32 -1.442695, %v7999_v25  ;;  %v4686_v46 = vpop.eup %4685 }
 0x503   : > { %v2462_v52 = vadd.f32 1.0, %v4686_v46 }
 0x504   : > { %4032 = vst.msk [vmem:[%s7753_s10 + $0x20] sm:$0xff] %vm243_vm0, %v4000_v11  ;;  %4687 = vpow2.f32 %v4291_v21 }
 0x505   : > { %4689 = vrcp.f32 %v2462_v52  ;;  %v2897_v58 = vand.u32 2147483648, %v2462_v52  ;;  %vm2891_vm6 = vweird.f32 %v2462_v52  ;;  %v2895_v53 = vand.u32 2147483647, %v2462_v52 }
 0x507   : > { %v3915_v4 = vpop.f32.mrf.mxu3  ;;  %v2332_v0 = vpop.f32.mrf.mxu2  ;;  %vm2896_vm8 = vcmp.eq.f32.partialorder %v2895_v53, 8.507059e+37 }
 0x508   : > { %v3916_v3 = vadd.f32 %v7705_v14, %v3915_v4  ;;  %4310 = vmatmul.msk.f32.gmra.mxu3 %vm243_vm0, %v3761_v47  ;;  %v8002_v15 = vadd.f32 %v4758_v59, %v2332_v0  ;;  %v2898_v47 = vor.u32 1.1754944e-38, %v2897_v58 }
 0x50a   : > { %v4001_v29 = vadd.f32 %v4757_v13, %v3916_v3  ;;  %v4688_v36 = vpop.eup %4687  ;;  %v4292_v9 = vmul.f32 -1.442695, %v8002_v15 }
 0x50b   : > { %v2463_v5 = vadd.f32 1.0, %v4688_v36  ;;  %v4690_v33 = vpop.eup %4689 }
 0x50c   : > { %4033 = vst.msk [vmem:[%s7753_s10 + $0x28] sm:$0xff] %vm243_vm0, %v4001_v29  ;;  %v2887_v54 = vmul.f32 %v4690_v33, %v2462_v52  ;;  %vm2892_vm5 = vweird.f32 %v4690_v33 }
 0x50d   : > { %4691 = vrcp.f32 %v2463_v5  ;;  %vm2893_vm7 = vmor %vm2891_vm6, %vm2892_vm5  ;;  %vm2906_vm10 = vweird.f32 %v2463_v5  ;;  %v2910_v63 = vand.u32 2147483647, %v2463_v5 }
 0x50e   : > { %4693 = vpow2.f32 %v4292_v9  ;;  %v2888_v23 = vsub.f32 1.0, %v2887_v54 }
 0x50f   : > { %v3918_v62 = vpop.f32.mrf.mxu3  ;;  %v2335_v61 = vpop.f32.mrf.mxu2  ;;  %vm2911_vm12 = vcmp.eq.f32.partialorder %v2910_v63, 8.507059e+37 }
 0x510   : > { %v3919_v7 = vadd.f32 %v7705_v14, %v3918_v62  ;;  %4311 = vmatmul.msk.f32.gmra.mxu3 %vm243_vm0, %v3762_v24  ;;  %v8004_v12 = vadd.f32 %v4758_v59, %v2335_v61  ;;  %v2889_v22 = vmul.f32 %v4690_v33, %v2888_v23 }
 0x512   : > { %v4002_v16 = vadd.f32 %v4759_v2, %v3919_v7  ;;  %v4293_v28 = vmul.f32 -1.442695, %v8004_v12  ;;  %v2890_v11 = vadd.f32 %v4690_v33, %v2889_v22  ;;  %v2912_v2 = vand.u32 2147483648, %v2463_v5 }
 0x513   : > { %v4692_v60 = vpop.eup %4691 }
 0x514   : > { %4034 = vst.msk [vmem:[%s7753_s10 + $0x30] sm:$0xff] %vm243_vm0, %v4002_v16  ;;  %4695 = vpow2.f32 %v4293_v28  ;;  %v4694_v20 = vpop.eup %4693  ;;  %v2902_v27 = vmul.f32 %v4692_v60, %v2463_v5  ;;  %v2894_v3 = vsel %vm2893_vm7, %v4690_v33, %v2890_v11  ;;  %vm2907_vm9 = vweird.f32 %v4692_v60 }
 0x515   : > { %v8008_v6 = vadd.f32 1.0, %v4694_v20  ;;  %v2899_v7 = vsel %vm2896_vm8, %v2898_v47, %v2894_v3  ;;  %vm2908_vm11 = vmor %vm2906_vm10, %vm2907_vm9 }
 0x516   : > { %v2903_v40 = vsub.f32 1.0, %v2902_v27  ;;  %v2974_v52 = vmul.f32 %v2899_v7, %v7992_v38 }
 0x517   : > { %4697 = vrcp.f32 %v8008_v6  ;;  %vm2921_vm15 = vweird.f32 %v8008_v6 }
 0x518   : > { %v2904_v4 = vmul.f32 %v4692_v60, %v2903_v40  ;;  %v8036_v20 = vmul.f32 %v7696_v39, %v2974_v52 }
 0x51a   : > { %v4696_v35 = vpop.eup %4695  ;;  %v2905_v41 = vadd.f32 %v4692_v60, %v2904_v4 }
 0x51b   : > { %v8010_v43 = vadd.f32 1.0, %v4696_v35 }
 0x51c   : > { %v2909_v36 = vsel %vm2908_vm11, %v4692_v60, %v2905_v41  ;;  %v2925_v41 = vand.u32 2147483647, %v8008_v6 }
 0x51d   : > { %4699 = vrcp.f32 %v8010_v43  ;;  %v8015_v13 = vpop.eup %4697  ;;  %v2940_v52 = vand.u32 2147483647, %v8010_v43  ;;  %vm2936_vm6 = vweird.f32 %v8010_v43 }
 0x51e   : > { %v2917_v0 = vmul.f32 %v8015_v13, %v8008_v6  ;;  %vm2922_vm2 = vweird.f32 %v8015_v13  ;;  %vm2926_vm9 = vcmp.eq.f32.partialorder %v2925_v41, 8.507059e+37 }
 0x51f   : > { %vm8078_vm5 = vmor %vm2921_vm15, %vm2922_vm2  ;;  %vm2941_vm10 = vcmp.eq.f32.partialorder %v2940_v52, 8.507059e+37 }
 0x520   : > { %v2918_v33 = vsub.f32 1.0, %v2917_v0 }
 0x523   : > { %v8018_v62 = vpop.eup %4699 }
 0x524   : > { %v2932_v9 = vmul.f32 %v8018_v62, %v8010_v43  ;;  %vm2937_vm3 = vweird.f32 %v8018_v62 }
 0x525   : > { %vm8091_vm7 = vmor %vm2936_vm6, %vm2937_vm3 }
 0x526   : > { %v2933_v35 = vsub.f32 1.0, %v2932_v9 }
 0x528   : > { %v2934_v53 = vmul.f32 %v8018_v62, %v2933_v35 }
 0x53f   : > { %v3247_v49 = vpop.xlane.xlu2 %3246 }
 0x540   : > { %v3313_v17 = vmul.f32 %v3247_v49, %v5015_v18  ;;  %v2919_v49 = vmul.f32 %v8015_v13, %v2918_v33 }
 0x542   : > { %v3345_v45 = vadd.f32 1e-05, %v3313_v17  ;;  %v2920_v7 = vadd.f32 %v8015_v13, %v2919_v49 }
 0x544   : > { %4701 = vrsqrt.f32 %v3345_v45  ;;  %vm3509_vm14 = vweird.f32 %v3345_v45 }
 0x547   : > { %v3076_v37 = vpop.xlane.xlu2 %3075  ;;  %v3250_v29 = vpop.xlane.xlu1 %3249 }
 0x548   : > { %v3128_v55 = vmul.f32 %v3076_v37, %v5015_v18  ;;  %v3314_v24 = vmul.f32 %v3250_v29, %v5015_v18 }
 0x54a   : > { %v4702_v59 = vpop.eup %4701  ;;  %v8022_v16 = vsub.f32 %v7625_v8, %v3128_v55  ;;  %v8026_v46 = vadd.f32 1e-05, %v3314_v24  ;;  %v2913_v8 = vor.u32 1.1754944e-38, %v2912_v2 }
 0x54b   : > { %v3504_v21 = vmul.f32 %v4702_v59, %v3345_v45  ;;  %vm3510_vm13 = vweird.f32 %v4702_v59 }
 0x54c   : > { %v3192_v61 = vmul.f32 %v8022_v16, %v8022_v16  ;;  %4703 = vrsqrt.f32 %v8026_v46  ;;  %v2914_v23 = vsel %vm2911_vm12, %v2913_v8, %v2909_v36  ;;  %vm3511_vm1 = vmor %vm3509_vm14, %vm3510_vm13  ;;  %vm3519_vm8 = vweird.f32 %v8026_v46 }
 0x54d   : > { %v3505_v28 = vmul.f32 %v4702_v59, %v3504_v21  ;;  %v2975_v11 = vmul.f32 %v2914_v23, %v7999_v25  ;;  %v2927_v21 = vand.u32 2147483648, %v8008_v6 }
 0x54e   : > { %v3266_v5 = vsel %vm243_vm0, %v3192_v61, 0.0  ;;  %v2942_v61 = vand.u32 2147483648, %v8010_v43 }
 0x54f   : > { %v3506_v54 = vmul.f32 0.5, %v3505_v28  ;;  %3267 = vadd.xlane.f32.xlu1 %v3266_v5  ;;  %v3079_v38 = vpop.xlane.xlu1 %3078  ;;  %v3256_v3 = vpop.xlane.xlu2 %3255  ;;  %v8086_v8 = vmul.f32 %v7696_v39, %v2975_v11  ;;  %v2924_v5 = vsel %vm8078_vm5, %v8015_v13, %v2920_v7  ;;  %v2928_v43 = vor.u32 1.1754944e-38, %v2927_v21 }
 0x550   : > { %v3129_v27 = vmul.f32 %v3079_v38, %v5015_v18  ;;  %v3253_v47 = vpop.xlane.xlu0 %3252  ;;  %v3316_v25 = vmul.f32 %v3256_v3, %v5015_v18  ;;  %v2943_v38 = vor.u32 1.1754944e-38, %v2942_v61 }
 0x551   : > { %v3507_v60 = vsub.f32 1.5, %v3506_v54  ;;  %v3315_v29 = vmul.f32 %v3253_v47, %v5015_v18  ;;  %v2929_v49 = vsel %vm2926_vm9, %v2928_v43, %v2924_v5 }
 0x552   : > { %v8039_v22 = vpop.eup %4703  ;;  %v8043_v40 = vsub.f32 %v7699_v51, %v3129_v27  ;;  %v3095_v51 = vsel %vm243_vm0, %v8036_v20, 0.0  ;;  %v8062_v2 = vadd.f32 1e-05, %v3316_v25 }
 0x553   : > { %v3508_v17 = vmul.f32 %v4702_v59, %v3507_v60  ;;  %v3514_v58 = vmul.f32 %v8039_v22, %v8026_v46  ;;  %v8064_v63 = vadd.f32 1e-05, %v3315_v29  ;;  %vm3520_vm4 = vweird.f32 %v8039_v22 }
 0x554   : > { %v3193_v37 = vmul.f32 %v8043_v40, %v8043_v40  ;;  %4705 = vrsqrt.f32 %v8062_v2  ;;  %vm3521_vm11 = vmor %vm3519_vm8, %vm3520_vm4 }
 0x555   : > { %v3512_v4 = vsel %vm3511_vm1, %v4702_v59, %v3508_v17  ;;  %v3515_v45 = vmul.f32 %v8039_v22, %v3514_v58  ;;  %4707 = vrsqrt.f32 %v8064_v63  ;;  %v3098_v17 = vsel %vm243_vm0, %v8086_v8, 0.0 }
 0x556   : > { %v3697_v55 = vmul.f32 %v3512_v4, %v7608_v31  ;;  %v3269_v24 = vsel %vm243_vm0, %v3193_v37, 0.0  ;;  %v2935_v31 = vadd.f32 %v8018_v62, %v2934_v53  ;;  %v4760_v37 = vld [vmem:[%s4850_s29 + $0x38] sm:$0xff]  ;;  %vm3529_vm14 = vweird.f32 %v8064_v63 }
 0x557   : > { %3096 = vadd.xlane.f32.xlu1 %v3095_v51  ;;  %v3516_v59 = vmul.f32 0.5, %v3515_v45  ;;  %3270 = vadd.xlane.f32.xlu0 %v3269_v24  ;;  %v3085_v23 = vpop.xlane.xlu2 %3084  ;;  %vm3539_vm1 = vweird.f32 %v8062_v2 }
 0x558   : > { %v3730_v0 = vmul.f32 %v7935_v19, %v3697_v55  ;;  %v2939_v54 = vsel %vm8091_vm7, %v8018_v62, %v2935_v31  ;;  %v3082_v13 = vpop.xlane.xlu0 %3081  ;;  %v3131_v46 = vmul.f32 %v3085_v23, %v5015_v18 }
 0x559   : > { %v3517_v36 = vsub.f32 1.5, %v3516_v59  ;;  %v3130_v60 = vmul.f32 %v3082_v13, %v5015_v18  ;;  %v2944_v53 = vsel %vm2941_vm10, %v2943_v38, %v2939_v54 }
 0x55a   : > { %v3763_v28 = vadd.f32 %v7950_v10, %v3730_v0  ;;  %v8110_v58 = vpop.eup %4705  ;;  %v8113_v4 = vsub.f32 %v7739_v57, %v3131_v46  ;;  %v2977_v55 = vmul.f32 %v2944_v53, %v8004_v12 }
 0x55b   : > { %v3518_v6 = vmul.f32 %v8039_v22, %v3517_v36  ;;  %v4708_v3 = vpop.eup %4707  ;;  %v3534_v47 = vmul.f32 %v8110_v58, %v8062_v2  ;;  %v3259_v29 = vpop.xlane.xlu1 %3258  ;;  %vm3540_vm13 = vweird.f32 %v8110_v58 }
 0x55c   : > { %4312 = vmatmul.msk.f32.gmra.mxu3 %vm243_vm0, %v3763_v28  ;;  %v3921_v27 = vpop.f32.mrf.mxu3  ;;  %v3524_v25 = vmul.f32 %v4708_v3, %v8064_v63  ;;  %v3195_v57 = vmul.f32 %v8113_v4, %v8113_v4  ;;  %v3317_v41 = vmul.f32 %v3259_v29, %v5015_v18  ;;  %v8141_v61 = vmul.f32 %v7696_v39, %v2977_v55  ;;  %vm8159_vm2 = vmor %vm3539_vm1, %vm3540_vm13  ;;  %v4761_v29 = vld [vmem:[%s4850_s29 + $0x40] sm:$0xff] }
 0x55d   : > { %v3522_v35 = vsel %vm3521_vm11, %v8039_v22, %v3518_v6  ;;  %v3922_v62 = vadd.f32 %v7705_v14, %v3921_v27  ;;  %v8116_v22 = vsub.f32 %v7736_v48, %v3130_v60  ;;  %v3535_v7 = vmul.f32 %v8110_v58, %v3534_v47 }
 0x55e   : > { %v3698_v11 = vmul.f32 %v3522_v35, %v7663_v1  ;;  %v2976_v1 = vmul.f32 %v2929_v49, %v8002_v15  ;;  %v3525_v15 = vmul.f32 %v4708_v3, %v3524_v25  ;;  %v3275_v59 = vsel %vm243_vm0, %v3195_v57, 0.0 }
 0x55f   : > { %3099 = vadd.xlane.f32.xlu0 %v3098_v17  ;;  %v4003_v51 = vadd.f32 %v4760_v37, %v3922_v62  ;;  %v3194_v48 = vmul.f32 %v8116_v22, %v8116_v22  ;;  %v3536_v21 = vmul.f32 0.5, %v3535_v7  ;;  %v8136_v31 = vadd.f32 1e-05, %v3317_v41  ;;  %3276 = vadd.xlane.f32.xlu1 %v3275_v59 }
 0x560   : > { %v3731_v45 = vmul.f32 %v7935_v19, %v3698_v11  ;;  %v3526_v52 = vmul.f32 0.5, %v3525_v15  ;;  %v8144_v36 = vmul.f32 %v7696_v39, %v2976_v1  ;;  %vm3530_vm12 = vweird.f32 %v4708_v3 }
 0x561   : > { %4035 = vst.msk [vmem:[%s7753_s10 + $0x38] sm:$0xff] %vm243_vm0, %v4003_v51  ;;  %v3272_v0 = vsel %vm243_vm0, %v3194_v48, 0.0  ;;  %v3537_v12 = vsub.f32 1.5, %v3536_v21  ;;  %4709 = vrsqrt.f32 %v8136_v31  ;;  %vm3531_vm15 = vmor %vm3529_vm14, %vm3530_vm12  ;;  %v3104_v23 = vsel %vm243_vm0, %v8141_v61, 0.0 }
 0x562   : > { %v3764_v24 = vadd.f32 %v7950_v10, %v3731_v45  ;;  %3273 = vadd.xlane.f32.xlu2 %v3272_v0  ;;  %v3527_v9 = vsub.f32 1.5, %v3526_v52  ;;  %v3265_v43 = vpop.xlane.xlu2 %3264  ;;  %v3262_v54 = vpop.xlane.xlu0 %3261  ;;  %v3101_v39 = vsel %vm243_vm0, %v8144_v36, 0.0  ;;  %vm3549_vm4 = vweird.f32 %v8136_v31 }
 0x563   : > { %v3538_v28 = vmul.f32 %v8110_v58, %v3537_v12  ;;  %v3088_v33 = vpop.xlane.xlu1 %3087  ;;  %v3319_v38 = vmul.f32 %v3265_v43, %v5015_v18  ;;  %v3318_v35 = vmul.f32 %v3262_v54, %v5015_v18 }
 0x564   : > { %4313 = vmatmul.msk.f32.gmra.mxu3 %vm243_vm0, %v3764_v24  ;;  %v3528_v5 = vmul.f32 %v4708_v3, %v3527_v9  ;;  %v3132_v6 = vmul.f32 %v3088_v33, %v5015_v18 }
 0x565   : > { %v3542_v2 = vsel %vm8159_vm2, %v8110_v58, %v3538_v28  ;;  %v8171_v62 = vadd.f32 1e-05, %v3319_v38  ;;  %v3350_v17 = vadd.f32 1e-05, %v3318_v35 }
 0x566   : > { %v3532_v13 = vsel %vm3531_vm15, %v4708_v3, %v3528_v5  ;;  %v8164_v60 = vsub.f32 %v7892_v32, %v3132_v6  ;;  %v3700_v47 = vmul.f32 %v3542_v2, %v7721_v30 }
 0x567   : > { %v4710_v63 = vpop.eup %4709  ;;  %3105 = vadd.xlane.f32.xlu1 %v3104_v23  ;;  %v3699_v27 = vmul.f32 %v3532_v13, %v7730_v44  ;;  %4711 = vrsqrt.f32 %v8171_v62  ;;  %vm3559_vm7 = vweird.f32 %v3350_v17  ;;  %vm3569_vm10 = vweird.f32 %v8171_v62 }
 0x568   : > { %v3544_v49 = vmul.f32 %v4710_v63, %v8136_v31  ;;  %v3196_v11 = vmul.f32 %v8164_v60, %v8164_v60  ;;  %4713 = vrsqrt.f32 %v3350_v17  ;;  %vm3550_vm3 = vweird.f32 %v4710_v63 }
 0x569   : > { %v3732_v53 = vmul.f32 %v7935_v19, %v3699_v27  ;;  %v3924_v44 = vpop.f32.mrf.mxu3  ;;  %v3733_v7 = vmul.f32 %v7935_v19, %v3700_v47  ;;  %vm3551_vm5 = vmor %vm3549_vm4, %vm3550_vm3 }
 0x56a   : > { %3102 = vadd.xlane.f32.xlu2 %v3101_v39  ;;  %v3545_v32 = vmul.f32 %v4710_v63, %v3544_v49  ;;  %v3278_v3 = vsel %vm243_vm0, %v3196_v11, 0.0  ;;  %v3925_v51 = vadd.f32 %v7705_v14, %v3924_v44  ;;  %v3094_v45 = vpop.xlane.xlu2 %3093  ;;  %v3091_v1 = vpop.xlane.xlu0 %3090  ;;  %v4763_v44 = vld [vmem:[%s4850_s29 + $0x50] sm:$0xff] }
 0x56b   : > { %v3765_v58 = vadd.f32 %v7950_v10, %v3732_v53  ;;  %3279 = vadd.xlane.f32.xlu0 %v3278_v3  ;;  %v3134_v48 = vmul.f32 %v3094_v45, %v5015_v18  ;;  %v3133_v55 = vmul.f32 %v3091_v1, %v5015_v18 }
 0x56c   : > { %v3546_v37 = vmul.f32 0.5, %v3545_v32  ;;  %v4004_v57 = vadd.f32 %v4761_v29, %v3925_v51  ;;  %v4764_v51 = vld [vmem:[%s4850_s29 + $0x58] sm:$0xff]  ;;  %v4765_v29 = vld [vmem:[%s4850_s29 + $0x60] sm:$0xff] }
 0x56d   : > { %4314 = vmatmul.msk.f32.gmra.mxu3 %vm243_vm0, %v3765_v58  ;;  %v4712_v30 = vpop.eup %4711  ;;  %v8190_v24 = vsub.f32 %v7942_v56, %v3134_v48  ;;  %v8193_v15 = vsub.f32 %v7939_v34, %v3133_v55  ;;  %v3766_v56 = vadd.f32 %v7950_v10, %v3733_v7  ;;  %v4766_v7 = vld [vmem:[%s4850_s29 + $0x68] sm:$0xff] }
 0x56e   : > { %v3547_v25 = vsub.f32 1.5, %v3546_v37  ;;  %4036 = vst.msk [vmem:[%s7753_s10 + $0x40] sm:$0xff] %vm243_vm0, %v4004_v57  ;;  %v4714_v59 = vpop.eup %4713  ;;  %v3564_v0 = vmul.f32 %v4712_v30, %v8171_v62  ;;  %vm3570_vm9 = vweird.f32 %v4712_v30 }
 0x56f   : > { %v3554_v52 = vmul.f32 %v4714_v59, %v3350_v17  ;;  %v3198_v12 = vmul.f32 %v8190_v24, %v8190_v24  ;;  %v3197_v31 = vmul.f32 %v8193_v15, %v8193_v15  ;;  %vm3560_vm6 = vweird.f32 %v4714_v59  ;;  %vm3571_vm11 = vmor %vm3569_vm10, %vm3570_vm9 }
 0x570   : > { %v3548_v41 = vmul.f32 %v4710_v63, %v3547_v25  ;;  %v3565_v9 = vmul.f32 %v4712_v30, %v3564_v0  ;;  %vm3561_vm8 = vmor %vm3559_vm7, %vm3560_vm6 }
 0x571   : > { %v3555_v28 = vmul.f32 %v4714_v59, %v3554_v52  ;;  %v3284_v5 = vsel %vm243_vm0, %v3198_v12, 0.0  ;;  %v3281_v6 = vsel %vm243_vm0, %v3197_v31, 0.0 }
 0x572   : > { %v3552_v21 = vsel %vm3551_vm5, %v4710_v63, %v3548_v41  ;;  %v3566_v33 = vmul.f32 0.5, %v3565_v9  ;;  %3282 = vadd.xlane.f32.xlu2 %v3281_v6 }
 0x573   : > { %v3701_v34 = vmul.f32 %v3552_v21, %v7819_v50  ;;  %3285 = vadd.xlane.f32.xlu0 %v3284_v5  ;;  %v3556_v43 = vmul.f32 0.5, %v3555_v28  ;;  %v3927_v54 = vpop.f32.mrf.mxu3  ;;  %v4762_v50 = vld [vmem:[%s4850_s29 + $0x48] sm:$0xff] }
 0x574   : > { %v3928_v23 = vadd.f32 %v7705_v14, %v3927_v54  ;;  %v3567_v13 = vsub.f32 1.5, %v3566_v33 }
 0x575   : > { %4315 = vmatmul.msk.f32.gmra.mxu3 %vm243_vm0, %v3766_v56  ;;  %v3734_v39 = vmul.f32 %v7935_v19, %v3701_v34  ;;  %v3557_v38 = vsub.f32 1.5, %v3556_v43 }
 0x576   : > { %v4005_v35 = vadd.f32 %v4762_v50, %v3928_v23  ;;  %v3568_v27 = vmul.f32 %v4712_v30, %v3567_v13 }
 0x577   : > { %v3558_v63 = vmul.f32 %v4714_v59, %v3557_v38  ;;  %v3767_v46 = vadd.f32 %v7950_v10, %v3734_v39 }
 0x578   : > { %4037 = vst.msk [vmem:[%s7753_s10 + $0x48] sm:$0xff] %vm243_vm0, %v4005_v35  ;;  %v3572_v32 = vsel %vm3571_vm11, %v4712_v30, %v3568_v27 }
 0x579   : > { %v3562_v2 = vsel %vm3561_vm8, %v4714_v59, %v3558_v63 }
 0x57a   : > { %v3702_v49 = vmul.f32 %v3562_v2, %v7878_v26  ;;  %v3703_v26 = vmul.f32 %v3572_v32, %v7888_v42 }
 0x57b   : > { %v3930_v11 = vpop.f32.mrf.mxu3 }
 0x57c   : > { %v3931_v17 = vadd.f32 %v7705_v14, %v3930_v11  ;;  %v3735_v53 = vmul.f32 %v7935_v19, %v3702_v49  ;;  %v3736_v37 = vmul.f32 %v7935_v19, %v3703_v26 }
 0x57d   : > { %4316 = vmatmul.msk.f32.gmra.mxu3 %vm243_vm0, %v3767_v46 }
 0x57e   : > { %v4006_v3 = vadd.f32 %v4763_v44, %v3931_v17  ;;  %v3768_v58 = vadd.f32 %v7950_v10, %v3735_v53  ;;  %v3769_v1 = vadd.f32 %v7950_v10, %v3736_v37 }
 0x580   : > { %4038 = vst.msk [vmem:[%s7753_s10 + $0x50] sm:$0xff] %vm243_vm0, %v4006_v3 }
 0x583   : > { %v3933_v62 = vpop.f32.mrf.mxu3 }
 0x584   : > { %v3934_v47 = vadd.f32 %v7705_v14, %v3933_v62 }
 0x585   : > { %4317 = vmatmul.msk.f32.gmra.mxu3 %vm243_vm0, %v3768_v58 }
 0x586   : > { %v4007_v45 = vadd.f32 %v4764_v51, %v3934_v47 }
 0x588   : > { %4039 = vst.msk [vmem:[%s7753_s10 + $0x58] sm:$0xff] %vm243_vm0, %v4007_v45 }
 0x58b   : > { %v3936_v25 = vpop.f32.mrf.mxu3 }
 0x58c   : > { %v3937_v42 = vadd.f32 %v7705_v14, %v3936_v25 }
 0x58d   : > { %4318 = vmatmul.msk.f32.gmra.mxu3 %vm243_vm0, %v3769_v1  ;;  %v8268_v1 = vld [vmem:[%s8419_s3 + $0xc] ss:$0 sm:$0xff] }
 0x58e   : > { %v4008_v57 = vadd.f32 %v4765_v29, %v3937_v42 }
 0x590   : > { %4040 = vst.msk [vmem:[%s7753_s10 + $0x60] sm:$0xff] %vm243_vm0, %v4008_v57 }
 0x593   : > { %v3939_v48 = vpop.f32.mrf.mxu3 }
 0x594   : > { %v3940_v55 = vadd.f32 %v7705_v14, %v3939_v48 }
 0x596   : > { %v4009_v30 = vadd.f32 %v4766_v7, %v3940_v55 }
 0x598   : > { %4041 = vst.msk [vmem:[%s7753_s10 + $0x68] sm:$0xff] %vm243_vm0, %v4009_v30  ;;  %v4768_v30 = vld [vmem:[%s4850_s29 + $0x70] sm:$0xff] }
 0x5c2   : > { %v3268_v41 = vpop.xlane.xlu1 %3267 }
 0x5c3   : > { %v3320_v59 = vmul.f32 %v3268_v41, %v5015_v18 }
 0x5c5   : > { %v3352_v0 = vadd.f32 1e-05, %v3320_v59 }
 0x5c7   : > { %4715 = vrsqrt.f32 %v3352_v0  ;;  %vm3579_vm13 = vweird.f32 %v3352_v0 }
 0x5ca   : > { %v3097_v21 = vpop.xlane.xlu1 %3096  ;;  %v3271_v12 = vpop.xlane.xlu0 %3270 }
 0x5cb   : > { %v3135_v52 = vmul.f32 %v3097_v21, %v5015_v18  ;;  %v3321_v9 = vmul.f32 %v3271_v12, %v5015_v18 }
 0x5cd   : > { %v4716_v31 = vpop.eup %4715  ;;  %v8242_v56 = vsub.f32 %v8036_v20, %v3135_v52  ;;  %v3353_v34 = vadd.f32 1e-05, %v3321_v9 }
 0x5ce   : > { %v3574_v14 = vmul.f32 %v4716_v31, %v3352_v0  ;;  %vm3580_vm12 = vweird.f32 %v4716_v31 }
 0x5cf   : > { %v3199_v28 = vmul.f32 %v8242_v56, %v8242_v56  ;;  %4717 = vrsqrt.f32 %v3353_v34  ;;  %vm3581_vm14 = vmor %vm3579_vm13, %vm3580_vm12  ;;  %vm3589_vm1 = vweird.f32 %v3353_v34 }
 0x5d0   : > { %v3575_v5 = vmul.f32 %v4716_v31, %v3574_v14 }
 0x5d1   : > { %v3287_v33 = vsel %vm243_vm0, %v3199_v28, 0.0 }
 0x5d2   : > { %v3576_v6 = vmul.f32 0.5, %v3575_v5  ;;  %3288 = vadd.xlane.f32.xlu1 %v3287_v33  ;;  %v3100_v43 = vpop.xlane.xlu0 %3099  ;;  %v3277_v35 = vpop.xlane.xlu1 %3276 }
 0x5d3   : > { %v3136_v23 = vmul.f32 %v3100_v43, %v5015_v18  ;;  %v3323_v2 = vmul.f32 %v3277_v35, %v5015_v18 }
 0x5d4   : > { %v3577_v54 = vsub.f32 1.5, %v3576_v6 }
 0x5d5   : > { %v4718_v39 = vpop.eup %4717  ;;  %v8249_v20 = vsub.f32 %v8086_v8, %v3136_v23  ;;  %v3274_v63 = vpop.xlane.xlu2 %3273  ;;  %v8257_v8 = vadd.f32 1e-05, %v3323_v2  ;;  %v4769_v23 = vld [vmem:[%s4850_s29 + $0x78] sm:$0xff] }
 0x5d6   : > { %v3578_v13 = vmul.f32 %v4716_v31, %v3577_v54  ;;  %v3584_v38 = vmul.f32 %v4718_v39, %v3353_v34  ;;  %v3322_v49 = vmul.f32 %v3274_v63, %v5015_v18  ;;  %vm3590_vm15 = vweird.f32 %v4718_v39 }
 0x5d7   : > { %v3200_v46 = vmul.f32 %v8249_v20, %v8249_v20  ;;  %4719 = vrsqrt.f32 %v8257_v8  ;;  %vm3591_vm2 = vmor %vm3589_vm1, %vm3590_vm15  ;;  %vm3609_vm7 = vweird.f32 %v8257_v8 }
 0x5d8   : > { %v3582_v50 = vsel %vm3581_vm14, %v4716_v31, %v3578_v13  ;;  %v3585_v27 = vmul.f32 %v4718_v39, %v3584_v38  ;;  %v3354_v32 = vadd.f32 1e-05, %v3322_v49 }
 0x5d9   : > { %v3704_v11 = vmul.f32 %v3582_v50, %v8022_v16  ;;  %v3290_v17 = vsel %vm243_vm0, %v3200_v46, 0.0 }
 0x5da   : > { %v3586_v53 = vmul.f32 0.5, %v3585_v27  ;;  %3291 = vadd.xlane.f32.xlu2 %v3290_v17  ;;  %4721 = vrsqrt.f32 %v3354_v32  ;;  %v3106_v16 = vpop.xlane.xlu1 %3105  ;;  %vm3599_vm5 = vweird.f32 %v3354_v32 }
 0x5db   : > { %v3737_v44 = vmul.f32 %v7935_v19, %v3704_v11  ;;  %v3138_v37 = vmul.f32 %v3106_v16, %v5015_v18 }
 0x5dc   : > { %v3587_v3 = vsub.f32 1.5, %v3586_v53 }
 0x5dd   : > { %v3770_v58 = vadd.f32 %v7950_v10, %v3737_v44  ;;  %v3103_v62 = vpop.xlane.xlu2 %3102  ;;  %v4720_v29 = vpop.eup %4719  ;;  %v8273_v57 = vsub.f32 %v8141_v61, %v3138_v37 }
 0x5de   : > { %v3588_v26 = vmul.f32 %v4718_v39, %v3587_v3  ;;  %v3137_v51 = vmul.f32 %v3103_v62, %v5015_v18  ;;  %v3604_v7 = vmul.f32 %v4720_v29, %v8257_v8  ;;  %v3280_v21 = vpop.xlane.xlu0 %3279  ;;  %vm3610_vm4 = vweird.f32 %v4720_v29 }
 0x5df   : > { %4319 = vmatmul.msk.f32.gmra.mxu3 %vm243_vm0, %v3770_v58  ;;  %v3942_v45 = vpop.f32.mrf.mxu3  ;;  %v3202_v52 = vmul.f32 %v8273_v57, %v8273_v57  ;;  %v3324_v12 = vmul.f32 %v3280_v21, %v5015_v18  ;;  %vm3611_vm8 = vmor %vm3609_vm7, %vm3610_vm4 }
 0x5e0   : > { %v3592_v47 = vsel %vm3591_vm2, %v4718_v39, %v3588_v26  ;;  %v3943_v25 = vadd.f32 %v8268_v1, %v3942_v45  ;;  %v8276_v48 = vsub.f32 %v8144_v36, %v3137_v51  ;;  %v4722_v55 = vpop.eup %4721  ;;  %v3605_v61 = vmul.f32 %v4720_v29, %v3604_v7  ;;  %v4770_v45 = vld [vmem:[%s4850_s29 + $0x80] sm:$0xff] }
 0x5e1   : > { %v3705_v42 = vmul.f32 %v3592_v47, %v8043_v40  ;;  %v3594_v0 = vmul.f32 %v4722_v55, %v3354_v32  ;;  %v3296_v31 = vsel %vm243_vm0, %v3202_v52, 0.0  ;;  %v3356_v28 = vadd.f32 1e-05, %v3324_v12 }
 0x5e2   : > { %v4010_v41 = vadd.f32 %v4768_v30, %v3943_v25  ;;  %v3201_v40 = vmul.f32 %v8276_v48, %v8276_v48  ;;  %v3606_v34 = vmul.f32 0.5, %v3605_v61  ;;  %3297 = vadd.xlane.f32.xlu1 %v3296_v31  ;;  %vm3600_vm3 = vweird.f32 %v4722_v55 }
 0x5e3   : > { %v3738_v59 = vmul.f32 %v7935_v19, %v3705_v42  ;;  %v3595_v9 = vmul.f32 %v4722_v55, %v3594_v0  ;;  %4723 = vrsqrt.f32 %v3356_v28  ;;  %vm3601_vm6 = vmor %vm3599_vm5, %vm3600_vm3  ;;  %vm3619_vm10 = vweird.f32 %v3356_v28 }
 0x5e4   : > { %4042 = vst.msk [vmem:[%s7753_s10 + $0x70] sm:$0xff] %vm243_vm0, %v4010_v41  ;;  %v3293_v14 = vsel %vm243_vm0, %v3201_v40, 0.0  ;;  %v3607_v6 = vsub.f32 1.5, %v3606_v34 }
 0x5e5   : > { %v3771_v36 = vadd.f32 %v7950_v10, %v3738_v59  ;;  %3294 = vadd.xlane.f32.xlu0 %v3293_v14  ;;  %v3596_v5 = vmul.f32 0.5, %v3595_v9  ;;  %v3283_v63 = vpop.xlane.xlu2 %3282  ;;  %v4771_v9 = vld [vmem:[%s4850_s29 + $0x88] sm:$0xff] }
 0x5e6   : > { %v3608_v13 = vmul.f32 %v4720_v29, %v3607_v6  ;;  %v3286_v50 = vpop.xlane.xlu0 %3285  ;;  %v3325_v2 = vmul.f32 %v3283_v63, %v5015_v18  ;;  %v4774_v63 = vld [vmem:[%s4850_s29 + $0x98] sm:$0xff] }
 0x5e7   : > { %v3945_v33 = vpop.f32.mrf.mxu3  ;;  %4320 = vmatmul.msk.f32.gmra.mxu3 %vm243_vm0, %v3771_v36  ;;  %v3597_v54 = vsub.f32 1.5, %v3596_v5  ;;  %v3326_v46 = vmul.f32 %v3286_v50, %v5015_v18 }
 0x5e8   : > { %v3946_v43 = vadd.f32 %v8268_v1, %v3945_v33  ;;  %v3612_v11 = vsel %vm3611_vm8, %v4720_v29, %v3608_v13  ;;  %v3357_v32 = vadd.f32 1e-05, %v3325_v2 }
 0x5e9   : > { %v3598_v38 = vmul.f32 %v4722_v55, %v3597_v54  ;;  %v4724_v27 = vpop.eup %4723  ;;  %v3358_v53 = vadd.f32 1e-05, %v3326_v46  ;;  %v3707_v8 = vmul.f32 %v3612_v11, %v8113_v4 }
 0x5ea   : > { %v4011_v39 = vadd.f32 %v4769_v23, %v3946_v43  ;;  %v3614_v17 = vmul.f32 %v4724_v27, %v3356_v28  ;;  %vm3620_vm9 = vweird.f32 %v4724_v27  ;;  %vm3629_vm13 = vweird.f32 %v3357_v32  ;;  %v4772_v23 = vld [vmem:[%s4850_s29 + $0x90] sm:$0xff] }
 0x5eb   : > { %v3602_v35 = vsel %vm3601_vm6, %v4722_v55, %v3598_v38  ;;  %4725 = vrsqrt.f32 %v3358_v53  ;;  %v3740_v47 = vmul.f32 %v7935_v19, %v3707_v8  ;;  %vm3621_vm11 = vmor %vm3619_vm10, %vm3620_vm9  ;;  %vm3639_vm1 = vweird.f32 %v3358_v53 }
 0x5ec   : > { %4043 = vst.msk [vmem:[%s7753_s10 + $0x78] sm:$0xff] %vm243_vm0, %v4011_v39  ;;  %v3706_v49 = vmul.f32 %v3602_v35, %v8116_v22  ;;  %v3615_v3 = vmul.f32 %v4724_v27, %v3614_v17  ;;  %4727 = vrsqrt.f32 %v3357_v32 }
 0x5ed   : > { %v3773_v41 = vadd.f32 %v7950_v10, %v3740_v47 }
 0x5ee   : > { %v3739_v44 = vmul.f32 %v7935_v19, %v3706_v49  ;;  %v3616_v26 = vmul.f32 0.5, %v3615_v3  ;;  %v4776_v49 = vld [vmem:[%s4850_s29 + $0xa0] sm:$0xff] }
 0x5f0   : > { %v3772_v58 = vadd.f32 %v7950_v10, %v3739_v44  ;;  %v3948_v16 = vpop.f32.mrf.mxu3  ;;  %v3617_v22 = vsub.f32 1.5, %v3616_v26 }
 0x5f1   : > { %v3949_v62 = vadd.f32 %v8268_v1, %v3948_v16  ;;  %v4726_v37 = vpop.eup %4725 }
 0x5f2   : > { %4321 = vmatmul.msk.f32.gmra.mxu3 %vm243_vm0, %v3772_v58  ;;  %v3618_v51 = vmul.f32 %v4724_v27, %v3617_v22  ;;  %v4728_v4 = vpop.eup %4727  ;;  %v3634_v42 = vmul.f32 %v4726_v37, %v3358_v53  ;;  %vm3640_vm15 = vweird.f32 %v4726_v37 }
 0x5f3   : > { %v4012_v25 = vadd.f32 %v4770_v45, %v3949_v62  ;;  %v3624_v55 = vmul.f32 %v4728_v4, %v3357_v32  ;;  %vm3630_vm12 = vweird.f32 %v4728_v4  ;;  %vm3641_vm2 = vmor %vm3639_vm1, %vm3640_vm15 }
 0x5f4   : > { %v3622_v29 = vsel %vm3621_vm11, %v4724_v27, %v3618_v51  ;;  %v3635_v30 = vmul.f32 %v4726_v37, %v3634_v42  ;;  %vm3631_vm14 = vmor %vm3629_vm13, %vm3630_vm12 }
 0x5f5   : > { %4044 = vst.msk [vmem:[%s7753_s10 + $0x80] sm:$0xff] %vm243_vm0, %v4012_v25  ;;  %v3708_v7 = vmul.f32 %v3622_v29, %v8164_v60  ;;  %v3625_v59 = vmul.f32 %v4728_v4, %v3624_v55 }
 0x5f6   : > { %v3636_v0 = vmul.f32 0.5, %v3635_v30 }
 0x5f7   : > { %v3626_v52 = vmul.f32 0.5, %v3625_v59  ;;  %v3741_v61 = vmul.f32 %v7935_v19, %v3708_v7 }
 0x5f8   : > { %v3951_v21 = vpop.f32.mrf.mxu3  ;;  %v3637_v36 = vsub.f32 1.5, %v3636_v0 }
 0x5f9   : > { %v3952_v40 = vadd.f32 %v8268_v1, %v3951_v21  ;;  %v3627_v12 = vsub.f32 1.5, %v3626_v52  ;;  %v3774_v14 = vadd.f32 %v7950_v10, %v3741_v61 }
 0x5fa   : > { %4322 = vmatmul.msk.f32.gmra.mxu3 %vm243_vm0, %v3773_v41  ;;  %v3638_v28 = vmul.f32 %v4726_v37, %v3637_v36 }
 0x5fb   : > { %v4013_v31 = vadd.f32 %v4771_v9, %v3952_v40  ;;  %v3628_v60 = vmul.f32 %v4728_v4, %v3627_v12  ;;  %v4777_v9 = vld [vmem:[%s4850_s29 + $0xa8] sm:$0xff] }
 0x5fc   : > { %v3642_v54 = vsel %vm3641_vm2, %v4726_v37, %v3638_v28 }
 0x5fd   : > { %4045 = vst.msk [vmem:[%s7753_s10 + $0x88] sm:$0xff] %vm243_vm0, %v4013_v31  ;;  %v3632_v34 = vsel %vm3631_vm14, %v4728_v4, %v3628_v60  ;;  %v3710_v13 = vmul.f32 %v3642_v54, %v8190_v24 }
 0x5fe   : > { %v3709_v5 = vmul.f32 %v3632_v34, %v8193_v15 }
 0x600   : > { %v3954_v33 = vpop.f32.mrf.mxu3  ;;  %v3742_v43 = vmul.f32 %v7935_v19, %v3709_v5  ;;  %v8332_v19 = vld [vmem:[%s8419_s3 + $0xa] ss:$0 sm:$0xff] }
 0x601   : > { %v3955_v6 = vadd.f32 %v8268_v1, %v3954_v33  ;;  %v3743_v35 = vmul.f32 %v8332_v19, %v3710_v13 }
 0x602   : > { %4323 = vmatmul.msk.f32.gmra.mxu3 %vm243_vm0, %v3774_v14  ;;  %v3775_v15 = vadd.f32 %v7950_v10, %v3742_v43  ;;  %v8341_v10 = vld [vmem:[%s8419_s3 + $0xb] ss:$0 sm:$0xff] }
 0x603   : > { %v4014_v39 = vadd.f32 %v4772_v23, %v3955_v6  ;;  %v3776_v24 = vadd.f32 %v8341_v10, %v3743_v35 }
 0x605   : > { %4046 = vst.msk [vmem:[%s7753_s10 + $0x90] sm:$0xff] %vm243_vm0, %v4014_v39 }
 0x608   : > { %v3957_v38 = vpop.f32.mrf.mxu3 }
 0x609   : > { %v3958_v50 = vadd.f32 %v8268_v1, %v3957_v38 }
 0x60a   : > { %4324 = vmatmul.msk.f32.gmra.mxu3 %vm243_vm0, %v3775_v15  ;;  %v4778_v15 = vld [vmem:[%s4850_s29 + $0xb0] sm:$0xff] }
 0x60b   : > { %v4015_v46 = vadd.f32 %v4774_v63, %v3958_v50 }
 0x60d   : > { %4047 = vst.msk [vmem:[%s7753_s10 + $0x98] sm:$0xff] %vm243_vm0, %v4015_v46 }
 0x610   : > { %v3960_v27 = vpop.f32.mrf.mxu3 }
 0x611   : > { %v3961_v2 = vadd.f32 %v8268_v1, %v3960_v27 }
 0x612   : > { %4325 = vmatmul.msk.f32.gmra.mxu3 %vm243_vm0, %v3776_v24 }
 0x613   : > { %v4016_v11 = vadd.f32 %v4776_v49, %v3961_v2 }
 0x615   : > { %4048 = vst.msk [vmem:[%s7753_s10 + $0xa0] sm:$0xff] %vm243_vm0, %v4016_v11 }
 0x645   : > { %v3289_v17 = vpop.xlane.xlu1 %3288 }
 0x646   : > { %v3327_v53 = vmul.f32 %v3289_v17, %v5015_v18 }
 0x648   : > { %v3359_v32 = vadd.f32 1e-05, %v3327_v53 }
 0x64a   : > { %4729 = vrsqrt.f32 %v3359_v32  ;;  %vm3649_vm4 = vweird.f32 %v3359_v32 }
 0x64d   : > { %v3292_v44 = vpop.xlane.xlu2 %3291 }
 0x64e   : > { %v3328_v3 = vmul.f32 %v3292_v44, %v5015_v18 }
 0x650   : > { %v4730_v8 = vpop.eup %4729  ;;  %v3360_v26 = vadd.f32 1e-05, %v3328_v3 }
 0x651   : > { %v3644_v58 = vmul.f32 %v4730_v8, %v3359_v32  ;;  %vm3650_vm3 = vweird.f32 %v4730_v8  ;;  %v4779_v32 = vld [vmem:[%s4850_s29 + $0xb8] sm:$0xff] }
 0x652   : > { %4731 = vrsqrt.f32 %v3360_v26  ;;  %vm3651_vm5 = vmor %vm3649_vm4, %vm3650_vm3  ;;  %vm3659_vm7 = vweird.f32 %v3360_v26 }
 0x653   : > { %v3645_v16 = vmul.f32 %v4730_v8, %v3644_v58 }
 0x655   : > { %v3646_v22 = vmul.f32 0.5, %v3645_v16  ;;  %v3298_v25 = vpop.xlane.xlu1 %3297  ;;  %v4781_v16 = vld [vmem:[%s4850_s29 + $0xc8] sm:$0xff] }
 0x656   : > { %v3330_v55 = vmul.f32 %v3298_v25, %v5015_v18  ;;  %v4783_v25 = vld [vmem:[%s4850_s29 + $0xd8] sm:$0xff] }
 0x657   : > { %v3647_v62 = vsub.f32 1.5, %v3646_v22 }
 0x658   : > { %v4732_v47 = vpop.eup %4731  ;;  %v3295_v4 = vpop.xlane.xlu0 %3294  ;;  %v3362_v41 = vadd.f32 1e-05, %v3330_v55  ;;  %v4784_v55 = vld [vmem:[%s4850_s29 + $0xe0] sm:$0xff] }
 0x659   : > { %v3648_v37 = vmul.f32 %v4730_v8, %v3647_v62  ;;  %v3654_v51 = vmul.f32 %v4732_v47, %v3360_v26  ;;  %v3329_v7 = vmul.f32 %v3295_v4, %v5015_v18  ;;  %vm3660_vm6 = vweird.f32 %v4732_v47 }
 0x65a   : > { %4733 = vrsqrt.f32 %v3362_v41  ;;  %vm3661_vm8 = vmor %vm3659_vm7, %vm3660_vm6  ;;  %vm3679_vm13 = vweird.f32 %v3362_v41 }
 0x65b   : > { %v3652_v45 = vsel %vm3651_vm5, %v4730_v8, %v3648_v37  ;;  %v3655_v29 = vmul.f32 %v4732_v47, %v3654_v51  ;;  %v3361_v59 = vadd.f32 1e-05, %v3329_v7  ;;  %v4780_v8 = vld [vmem:[%s4850_s29 + $0xc0] sm:$0xff] }
 0x65c   : > { %v3711_v42 = vmul.f32 %v3652_v45, %v8242_v56 }
 0x65d   : > { %v3656_v30 = vmul.f32 0.5, %v3655_v29  ;;  %4735 = vrsqrt.f32 %v3361_v59  ;;  %vm3669_vm11 = vweird.f32 %v3361_v59 }
 0x65e   : > { %v3744_v0 = vmul.f32 %v8332_v19, %v3711_v42 }
 0x65f   : > { %v3657_v21 = vsub.f32 1.5, %v3656_v30 }
 0x660   : > { %v3777_v52 = vadd.f32 %v8341_v10, %v3744_v0  ;;  %v4734_v36 = vpop.eup %4733 }
 0x661   : > { %v3658_v40 = vmul.f32 %v4732_v47, %v3657_v21  ;;  %v3674_v14 = vmul.f32 %v4734_v36, %v3362_v41  ;;  %vm3680_vm10 = vweird.f32 %v4734_v36 }
 0x662   : > { %v3963_v56 = vpop.f32.mrf.mxu3  ;;  %4326 = vmatmul.msk.f32.gmra.mxu3 %vm243_vm0, %v3777_v52  ;;  %vm3681_vm14 = vmor %vm3679_vm13, %vm3680_vm10 }
 0x663   : > { %v3662_v18 = vsel %vm3661_vm8, %v4732_v47, %v3658_v40  ;;  %v3964_v61 = vadd.f32 %v8268_v1, %v3963_v56  ;;  %v4736_v60 = vpop.eup %4735  ;;  %v3675_v5 = vmul.f32 %v4734_v36, %v3674_v14  ;;  %v4782_v47 = vld [vmem:[%s4850_s29 + $0xd0] sm:$0xff] }
 0x664   : > { %v3712_v12 = vmul.f32 %v3662_v18, %v8249_v20  ;;  %v3664_v28 = vmul.f32 %v4736_v60, %v3361_v59  ;;  %vm3670_vm9 = vweird.f32 %v4736_v60  ;;  %v4785_v59 = vld [vmem:[%s4850_s29 + $0xe8] sm:$0xff]  ;;  %v4786_v40 = vld [vmem:[%s4850_s29 + $0xf0] sm:$0xff] }
 0x665   : > { %v4017_v31 = vadd.f32 %v4777_v9, %v3964_v61  ;;  %v3676_v43 = vmul.f32 0.5, %v3675_v5  ;;  %vm3671_vm12 = vmor %vm3669_vm11, %vm3670_vm9 }
 0x666   : > { %v3745_v34 = vmul.f32 %v8332_v19, %v3712_v12  ;;  %v3665_v6 = vmul.f32 %v4736_v60, %v3664_v28  ;;  %v4787_v12 = vld [vmem:[%s4850_s29 + $0xf8] sm:$0xff] }
 0x667   : > { %4049 = vst.msk [vmem:[%s7753_s10 + $0xa8] sm:$0xff] %vm243_vm0, %v4017_v31  ;;  %v3677_v23 = vsub.f32 1.5, %v3676_v43 }
 0x668   : > { %v3778_v33 = vadd.f32 %v8341_v10, %v3745_v34  ;;  %v3666_v20 = vmul.f32 0.5, %v3665_v6 }
 0x669   : > { %v3678_v50 = vmul.f32 %v4734_v36, %v3677_v23 }
 0x66a   : > { %4327 = vmatmul.msk.f32.gmra.mxu3 %vm243_vm0, %v3778_v33  ;;  %v3966_v54 = vpop.f32.mrf.mxu3  ;;  %v3667_v13 = vsub.f32 1.5, %v3666_v20 }
 0x66b   : > { %v3967_v39 = vadd.f32 %v8268_v1, %v3966_v54  ;;  %v3682_v24 = vsel %vm3681_vm14, %v4734_v36, %v3678_v50 }
 0x66c   : > { %v3668_v35 = vmul.f32 %v4736_v60, %v3667_v13  ;;  %v3714_v2 = vmul.f32 %v3682_v24, %v8273_v57 }
 0x66d   : > { %v4018_v38 = vadd.f32 %v4778_v15, %v3967_v39 }
 0x66e   : > { %v3672_v63 = vsel %vm3671_vm12, %v4736_v60, %v3668_v35  ;;  %v3747_v53 = vmul.f32 %v8332_v19, %v3714_v2 }
 0x66f   : > { %4050 = vst.msk [vmem:[%s7753_s10 + $0xb0] sm:$0xff] %vm243_vm0, %v4018_v38  ;;  %v3713_v46 = vmul.f32 %v3672_v63, %v8276_v48 }
 0x670   : > { %v3780_v44 = vadd.f32 %v8341_v10, %v3747_v53 }
 0x671   : > { %v3746_v27 = vmul.f32 %v8332_v19, %v3713_v46 }
 0x673   : > { %v3779_v49 = vadd.f32 %v8341_v10, %v3746_v27 }
 0x675   : > { %v3969_v11 = vpop.f32.mrf.mxu3  ;;  %4328 = vmatmul.msk.f32.gmra.mxu3 %vm243_vm0, %v3779_v49 }
 0x676   : > { %v3970_v17 = vadd.f32 %v8268_v1, %v3969_v11 }
 0x678   : > { %v4019_v48 = vadd.f32 %v4779_v32, %v3970_v17 }
 0x67a   : > { %4051 = vst.msk [vmem:[%s7753_s10 + $0xb8] sm:$0xff] %vm243_vm0, %v4019_v48 }
 0x67d   : > { %v3972_v57 = vpop.f32.mrf.mxu3  ;;  %4329 = vmatmul.msk.f32.gmra.mxu3 %vm243_vm0, %v3780_v44 }
 0x67e   : > { %v3973_v3 = vadd.f32 %v8268_v1, %v3972_v57 }
 0x680   : > { %v4020_v58 = vadd.f32 %v4780_v8, %v3973_v3 }
 0x682   : > { %4052 = vst.msk [vmem:[%s7753_s10 + $0xc0] sm:$0xff] %vm243_vm0, %v4020_v58 }
 0x685   : > { %v3975_v19 = vpop.f32.mrf.mxu3 }
 0x686   : > { %v3976_v26 = vadd.f32 %v8268_v1, %v3975_v19 }
 0x688   : > { %v4021_v22 = vadd.f32 %v4781_v16, %v3976_v26 }
 0x68a   : > { %4053 = vst.msk [vmem:[%s7753_s10 + $0xc8] sm:$0xff] %vm243_vm0, %v4021_v22 }
 0x68d   : > { %v3978_v10 = vpop.f32.mrf.mxu3 }
 0x68e   : > { %v3979_v62 = vadd.f32 %v8268_v1, %v3978_v10 }
 0x690   : > { %v4022_v37 = vadd.f32 %v4782_v47, %v3979_v62 }
 0x692   : > { %4054 = vst.msk [vmem:[%s7753_s10 + $0xd0] sm:$0xff] %vm243_vm0, %v4022_v37 }
 0x695   : > { %v3981_v51 = vpop.f32.mrf.mxu3 }
 0x696   : > { %v3982_v45 = vadd.f32 %v8268_v1, %v3981_v51 }
 0x698   : > { %v4023_v4 = vadd.f32 %v4783_v25, %v3982_v45 }
 0x69a   : > { %4055 = vst.msk [vmem:[%s7753_s10 + $0xd8] sm:$0xff] %vm243_vm0, %v4023_v4 }
 0x6e5   : > { %v3984_v42 = vpop.f32.mrf.mxu3 }
 0x6e6   : > { %v3985_v29 = vadd.f32 %v8268_v1, %v3984_v42 }
 0x6e8   : > { %v4024_v7 = vadd.f32 %v4784_v55, %v3985_v29 }
 0x6ea   : > { %4056 = vst.msk [vmem:[%s7753_s10 + $0xe0] sm:$0xff] %vm243_vm0, %v4024_v7 }
 0x6ed   : > { %v3987_v30 = vpop.f32.mrf.mxu3 }
 0x6ee   : > { %v3988_v41 = vadd.f32 %v8268_v1, %v3987_v30 }
 0x6f0   : > { %v4025_v0 = vadd.f32 %v4785_v59, %v3988_v41 }
 0x6f2   : > { %4057 = vst.msk [vmem:[%s7753_s10 + $0xe8] sm:$0xff] %vm243_vm0, %v4025_v0 }
 0x6f8   : > { %v3990_v21 = vpop.f32.mrf.mxu3 }
 0x6f9   : > { %v3991_v52 = vadd.f32 %v8268_v1, %v3990_v21 }
 0x6fb   : > { %v4026_v56 = vadd.f32 %v4786_v40, %v3991_v52 }
 0x6fd   : > { %4058 = vst.msk [vmem:[%s7753_s10 + $0xf0] sm:$0xff] %vm243_vm0, %v4026_v56 }
 0x700   : > { %v3993_v18 = vpop.f32.mrf.mxu3 }
 0x701   : > { %v3994_v61 = vadd.f32 %v8268_v1, %v3993_v18 }
 0x703   : > { %v4027_v36 = vadd.f32 %v4787_v12, %v3994_v61 }
 0x705   : > { %4059 = vst.msk [vmem:[%s7753_s10 + $0xf8] sm:$0xff] %vm243_vm0, %v4027_v36 }
 0x706 PF: > { %s14_s15 = sadd.s32 1, %s4794_s15  }
 0x707   : > { %p11_p4 = scmp.ge.s32.totalorder %s14_s15, 10  }
 0x709   :  { %13 = sbr.rel (!%p11_p4) target bundleno = 1 (0x1), region = 69 }

</bundles_post_ra>
